<compile_context>
chip_gen: v5e
topology: v5e:2x2
jax: 0.10.0
libtpu: 0.0.40
codegen_flags: <defaults>
</compile_context>

<pallas_src>
import functools
import math

import jax
import jax.numpy as jnp
from jax import lax
from jax.experimental import pallas as pl
from jax.experimental.pallas import tpu as pltpu


def _upold_kernel(x1_ref, x2_ref, wup_ref, w1a_ref, w1b_ref, w2_ref,
                  bup_ref, b1_ref, b2_ref, mask_ref, o_ref,
                  out2_buf, y1_buf, *, Gw, L, MC, MU, deconv):
    """Fused Upold forward for one batch element.

    Layout: every activation is (channels, flat) where `flat` indexes a padded
    (Gh, Gw) grid row-major; the real image occupies rows/cols 1..2*H2.  Conv
    inputs carry extra zero margins on the flat axis so a tap (kh, kw) is the
    static lane-slice shifted by (kh-1)*Gw + (kw-1).

    x1_ref  : (1, C1, MC+L+MC)          inputs1 embedded in the padded grid
    x2_ref  : deconv: (1, C2, MU+L+2*Gw+2) dilated inputs2 (4x4-conv form)
              else  : (1, Cb, MC+L+MC)     pre-upsampled outputs2
    w*_ref  : (taps, Cout, Cin_part)    per-tap weight matrices
    b*_ref  : (Cout, 1)
    mask_ref: (1, L) 1.0 on the real image, 0.0 on the zero-pad border
    o_ref   : (1, Cout, L) conv2 output on the padded grid (border discarded
              by the caller)
    """
    mask = mask_ref[...]                       # (1, L)
    cout = o_ref.shape[1]

    if deconv:
        # ConvTranspose2d(k=4,s=2,p=1) == 4x4 stride-1 conv over the dilated
        # input; each tap is one (Cout, C2) @ (C2, L) MXU op.
        acc = jnp.zeros((cout, L), jnp.float32)
        for t in range(16):
            kh, kw = divmod(t, 4)
            s = MU + (kh - 1) * Gw + (kw - 1)
            acc = acc + jnp.dot(wup_ref[t], x2_ref[0, :, s:s + L],
                                preferred_element_type=jnp.float32)
        out2 = (acc + bup_ref[...]) * mask     # zero border == conv1 zero-pad
        out2_buf[...] = jnp.zeros_like(out2_buf)
        out2_buf[:, MC:MC + L] = out2

        def b_slice(s):
            return out2_buf[:, s:s + L]
    else:
        def b_slice(s):
            return x2_ref[0, :, s:s + L]

    # conv1: 3x3 over concat([outputs1, outputs2]); the concat is never
    # materialized — w1 is split along its input channels instead.
    acc = jnp.zeros((cout, L), jnp.float32)
    for t in range(9):
        kh, kw = divmod(t, 3)
        s = MC + (kh - 1) * Gw + (kw - 1)
        acc = acc + jnp.dot(w1a_ref[t], x1_ref[0, :, s:s + L],
                            preferred_element_type=jnp.float32)
        acc = acc + jnp.dot(w1b_ref[t], b_slice(s),
                            preferred_element_type=jnp.float32)
    y1 = jnp.maximum(acc + b1_ref[...], 0.0) * mask
    y1_buf[...] = jnp.zeros_like(y1_buf)
    y1_buf[:, MC:MC + L] = y1

    # conv2: 3x3 on y1.
    acc = jnp.zeros((cout, L), jnp.float32)
    for t in range(9):
        kh, kw = divmod(t, 3)
        s = MC + (kh - 1) * Gw + (kw - 1)
        acc = acc + jnp.dot(w2_ref[t], y1_buf[:, s:s + L],
                            preferred_element_type=jnp.float32)
    o_ref[0] = jnp.maximum(acc + b2_ref[...], 0.0).astype(o_ref.dtype)


def _bilinear_up2x_align_corners_nchw(x):
    """UpsamplingBilinear2d(scale_factor=2), align_corners=True, NCHW. JAX glue."""
    N, C, H, W = x.shape

    def coords(n_in, n_out):
        if n_in == 1:
            z = jnp.zeros((n_out,), jnp.int32)
            return z, z, jnp.zeros((n_out,), jnp.float32)
        src = jnp.arange(n_out, dtype=jnp.float32) * (n_in - 1) / (n_out - 1)
        i0 = jnp.clip(jnp.floor(src).astype(jnp.int32), 0, n_in - 2)
        return i0, i0 + 1, src - i0.astype(jnp.float32)

    h0, h1, hf = coords(H, 2 * H)
    w0, w1, wf = coords(W, 2 * W)
    xh = (x[:, :, h0, :] * (1.0 - hf)[None, None, :, None]
          + x[:, :, h1, :] * hf[None, None, :, None])
    return (xh[:, :, :, w0] * (1.0 - wf)[None, None, None, :]
            + xh[:, :, :, w1] * wf[None, None, None, :])


def upold_forward(params, inputs1, inputs2, is_deconv=True):
    """inputs1, inputs2 and output are NCHW (PyTorch layout)."""
    N, C1, H1, W1 = inputs1.shape
    N2, C2, H2, W2 = inputs2.shape
    assert N == N2
    Hu, Wu = 2 * H2, 2 * W2                    # spatial size of outputs2/output
    assert Hu >= H1 and Wu >= W1 and (Hu - H1) % 2 == 0 and (Wu - W1) % 2 == 0, \
        "F.pad offset must be even and non-negative"
    poh, pow_ = (Hu - H1) // 2, (Wu - W1) // 2

    cout = params["w1"].shape[-1]
    # Padded grid: image at rows/cols 1..Hu / 1..Wu, two spare zero rows/cols
    # so the grid width matches the 4x4-deconv's dilated-input width exactly.
    Gh, Gw = Hu + 3, Wu + 3
    L = Gh * Gw
    MC = Gw + 1                                # 3x3-conv shift margin
    MU = Gw + 1                                # up-conv left margin
    MU_R = 2 * Gw + 2                          # up-conv right margin

    f32 = jnp.float32
    # ---- host-side layout prep (KB-sized pads / reshapes only) -------------
    x1g = jnp.pad(inputs1.astype(f32),
                  ((0, 0), (0, 0),
                   (1 + poh, Gh - 1 - poh - H1),
                   (1 + pow_, Gw - 1 - pow_ - W1)))
    x1p = jnp.pad(x1g.reshape(N, C1, L), ((0, 0), (0, 0), (MC, MC)))

    if is_deconv:
        # dilate(2) + pad(2) in one lax.pad (interior padding) -> (Gh, Gw).
        xd = lax.pad(inputs2.astype(f32), jnp.array(0.0, f32),
                     ((0, 0, 0), (0, 0, 0), (2, 2, 1), (2, 2, 1)))
        x2p = jnp.pad(xd.reshape(N, C2, L), ((0, 0), (0, 0), (MU, MU_R)))
        cb = cout
        wup = jnp.transpose(params["w_up"], (0, 1, 3, 2)).reshape(16, cout, C2)
        bup = params["b_up"].reshape(cout, 1).astype(f32)
    else:
        # TODO(synk): bilinear gather/lerp kept as plain JAX glue (tiny).
        up = _bilinear_up2x_align_corners_nchw(inputs2.astype(f32))
        upg = jnp.pad(up, ((0, 0), (0, 0), (1, 2), (1, 2)))
        x2p = jnp.pad(upg.reshape(N, C2, L), ((0, 0), (0, 0), (MC, MC)))
        cb = C2
        wup = jnp.zeros((1, 1, 1), f32)        # unused in this mode
        bup = jnp.zeros((1, 1), f32)           # unused in this mode

    cin1 = params["w1"].shape[2]
    assert cin1 == C1 + cb, "conv1 in_channels must equal concat channels"
    w1a = jnp.transpose(params["w1"][:, :, :C1, :], (0, 1, 3, 2)).reshape(9, cout, C1)
    w1b = jnp.transpose(params["w1"][:, :, C1:, :], (0, 1, 3, 2)).reshape(9, cout, cb)
    w2 = jnp.transpose(params["w2"], (0, 1, 3, 2)).reshape(9, cout, cout)
    b1 = params["b1"].reshape(cout, 1).astype(f32)
    b2 = params["b2"].reshape(cout, 1).astype(f32)

    rows = jnp.arange(Gh)
    cols = jnp.arange(Gw)
    mask2d = (((rows >= 1) & (rows <= Hu))[:, None]
              & ((cols >= 1) & (cols <= Wu))[None, :])
    mask = mask2d.astype(f32).reshape(1, L)

    kernel = functools.partial(_upold_kernel, Gw=Gw, L=L, MC=MC, MU=MU,
                               deconv=is_deconv)

    def full(shape):
        return pl.BlockSpec(shape, lambda n, _nd=len(shape): (0,) * _nd)

    out_flat = pl.pallas_call(
        kernel,
        out_shape=jax.ShapeDtypeStruct((N, cout, L), f32),
        grid=(N,),
        in_specs=[
            pl.BlockSpec((1, C1, x1p.shape[-1]), lambda n: (n, 0, 0)),
            pl.BlockSpec((1, x2p.shape[1], x2p.shape[-1]), lambda n: (n, 0, 0)),
            full(wup.shape),
            full(w1a.shape),
            full(w1b.shape),
            full(w2.shape),
            full(bup.shape),
            full(b1.shape),
            full(b2.shape),
            full(mask.shape),
        ],
        out_specs=pl.BlockSpec((1, cout, L), lambda n: (n, 0, 0)),
        scratch_shapes=[pltpu.VMEM((cout, MC + L + MC), f32),
                        pltpu.VMEM((cout, MC + L + MC), f32)],
        compiler_params=pltpu.CompilerParams(
            dimension_semantics=("parallel",)),   # v7x: 1 batch elem per TC
    )(x1p, x2p, wup, w1a, w1b, w2, bup, b1, b2, mask)

    # Drop the zero border; already NCHW (lane-dense store, no transpose).
    return out_flat.reshape(N, cout, Gh, Gw)[:, :, 1:1 + Hu, 1:1 + Wu]


def make_params(key, in_size, out_size):
    """Deterministic kaiming-style synthetic weights, conv layout (KH,KW,Cin,Cout)."""
    ks = jax.random.split(key, 6)
    w_up = jax.random.normal(ks[0], (4, 4, in_size, out_size), jnp.float32) \
        * math.sqrt(2.0 / (out_size * 4 * 4))
    b_up = jax.random.normal(ks[1], (1, out_size), jnp.float32) * 0.01
    w1 = jax.random.normal(ks[2], (3, 3, in_size, out_size), jnp.float32) \
        * math.sqrt(2.0 / (in_size * 3 * 3))
    b1 = jax.random.normal(ks[3], (1, out_size), jnp.float32) * 0.01
    w2 = jax.random.normal(ks[4], (3, 3, out_size, out_size), jnp.float32) \
        * math.sqrt(2.0 / (out_size * 3 * 3))
    b2 = jax.random.normal(ks[5], (1, out_size), jnp.float32) * 0.01
    return {"w_up": w_up, "b_up": b_up, "w1": w1, "b1": b1, "w2": w2, "b2": b2}


if __name__ == "__main__":
    key = jax.random.PRNGKey(0)
    k_in, k_p = jax.random.split(key)
    k1, k2 = jax.random.split(k_in)

    in_size, out_size = 8, 4
    N, H1, W1 = 2, 16, 16

    # inputs1: skip features (in_size - out_size channels at full resolution)
    # inputs2: deeper features (in_size channels at half resolution)
    inputs1 = jax.random.normal(k1, (N, in_size - out_size, H1, W1), jnp.float32)
    inputs2 = jax.random.normal(k2, (N, in_size, H1 // 2, W1 // 2), jnp.float32)

    params = make_params(k_p, in_size, out_size)

    out = upold_forward(params, inputs1, inputs2, is_deconv=True)
    out = jax.block_until_ready(out)
    assert out.shape == (N, out_size, H1, W1), out.shape
    assert bool(jnp.all(jnp.isfinite(out)))
    print("KERNEL_OK")
</pallas_src>

<mosaic_0001>
module attributes {stable_mosaic.version = 11 : i64} {
  func.func @_upold_kernel(%arg0: i32, %arg1: memref<1x4x401xf32, #tpu.memory_space<vmem>>, %arg2: memref<1x8x421xf32, #tpu.memory_space<vmem>>, %arg3: memref<16x4x8xf32, #tpu.memory_space<vmem>>, %arg4: memref<9x4x4xf32, #tpu.memory_space<vmem>>, %arg5: memref<9x4x4xf32, #tpu.memory_space<vmem>>, %arg6: memref<9x4x4xf32, #tpu.memory_space<vmem>>, %arg7: memref<4x1xf32, #tpu.memory_space<vmem>>, %arg8: memref<4x1xf32, #tpu.memory_space<vmem>>, %arg9: memref<4x1xf32, #tpu.memory_space<vmem>>, %arg10: memref<1x361xf32, #tpu.memory_space<vmem>>, %arg11: memref<1x4x361xf32, #tpu.memory_space<vmem>>, %arg12: memref<4x401xf32, #tpu.memory_space<vmem>>, %arg13: memref<4x401xf32, #tpu.memory_space<vmem>>) attributes {dimension_semantics = [#tpu.dimension_semantics<parallel>], iteration_bounds = array<i64: 2>, scalar_prefetch = 0 : i64, scratch_operands = 2 : i64, tpu.core_type = #tpu.core_type<tc>, window_params = [{transform_indices = @transform_0, window_bounds = array<i64: 1, 4, 401>}, {transform_indices = @transform_1, window_bounds = array<i64: 1, 8, 421>}, {pipeline_mode = #tpu.pipeline_mode<synchronous>, transform_indices = @transform_2, window_bounds = array<i64: 16, 4, 8>}, {pipeline_mode = #tpu.pipeline_mode<synchronous>, transform_indices = @transform_3, window_bounds = array<i64: 9, 4, 4>}, {pipeline_mode = #tpu.pipeline_mode<synchronous>, transform_indices = @transform_4, window_bounds = array<i64: 9, 4, 4>}, {pipeline_mode = #tpu.pipeline_mode<synchronous>, transform_indices = @transform_5, window_bounds = array<i64: 9, 4, 4>}, {pipeline_mode = #tpu.pipeline_mode<synchronous>, transform_indices = @transform_6, window_bounds = array<i64: 4, 1>}, {pipeline_mode = #tpu.pipeline_mode<synchronous>, transform_indices = @transform_7, window_bounds = array<i64: 4, 1>}, {pipeline_mode = #tpu.pipeline_mode<synchronous>, transform_indices = @transform_8, window_bounds = array<i64: 4, 1>}, {pipeline_mode = #tpu.pipeline_mode<synchronous>, transform_indices = @transform_9, window_bounds = array<i64: 1, 361>}, {transform_indices = @transform_10, window_bounds = array<i64: 1, 4, 361>}]} {
    %c0 = arith.constant 0 : index
    %c0_0 = arith.constant 0 : index
    %0 = vector.load %arg10[%c0, %c0_0] : memref<1x361xf32, #tpu.memory_space<vmem>>, vector<1x361xf32>
    %cst = arith.constant 0.000000e+00 : f32
    %1 = vector.broadcast %cst : f32 to vector<4x361xf32>
    %c0_1 = arith.constant 0 : index
    %c0_2 = arith.constant 0 : index
    %c0_3 = arith.constant 0 : index
    %2 = vector.load %arg3[%c0_1, %c0_2, %c0_3] : memref<16x4x8xf32, #tpu.memory_space<vmem>>, vector<1x4x8xf32>
    %3 = vector.shape_cast %2 : vector<1x4x8xf32> to vector<4x8xf32>
    %c0_4 = arith.constant 0 : index
    %c0_5 = arith.constant 0 : index
    %c0_6 = arith.constant 0 : index
    %4 = vector.load %arg2[%c0_4, %c0_5, %c0_6] : memref<1x8x421xf32, #tpu.memory_space<vmem>>, vector<1x8x361xf32>
    %5 = vector.shape_cast %4 : vector<1x8x361xf32> to vector<8x361xf32>
    %cst_7 = arith.constant dense<0.000000e+00> : vector<4x361xf32>
    %6 = tpu.matmul %3, %5, %cst_7 {dimension_numbers = #tpu.dot_dimension_numbers<[1], [0], [0], [1], [0, 0, 1, 1], [], []>} : vector<4x8xf32>, vector<8x361xf32>, vector<4x361xf32> -> vector<4x361xf32>
    %7 = arith.addf %1, %6 : vector<4x361xf32>
    %c1 = arith.constant 1 : index
    %c0_8 = arith.constant 0 : index
    %c0_9 = arith.constant 0 : index
    %8 = vector.load %arg3[%c1, %c0_8, %c0_9] : memref<16x4x8xf32, #tpu.memory_space<vmem>>, vector<1x4x8xf32>
    %9 = vector.shape_cast %8 : vector<1x4x8xf32> to vector<4x8xf32>
    %c0_10 = arith.constant 0 : index
    %c0_11 = arith.constant 0 : index
    %c1_12 = arith.constant 1 : index
    %10 = vector.load %arg2[%c0_10, %c0_11, %c1_12] : memref<1x8x421xf32, #tpu.memory_space<vmem>>, vector<1x8x361xf32>
    %11 = vector.shape_cast %10 : vector<1x8x361xf32> to vector<8x361xf32>
    %cst_13 = arith.constant dense<0.000000e+00> : vector<4x361xf32>
    %12 = tpu.matmul %9, %11, %cst_13 {dimension_numbers = #tpu.dot_dimension_numbers<[1], [0], [0], [1], [0, 0, 1, 1], [], []>} : vector<4x8xf32>, vector<8x361xf32>, vector<4x361xf32> -> vector<4x361xf32>
    %13 = arith.addf %7, %12 : vector<4x361xf32>
    %c2 = arith.constant 2 : index
    %c0_14 = arith.constant 0 : index
    %c0_15 = arith.constant 0 : index
    %14 = vector.load %arg3[%c2, %c0_14, %c0_15] : memref<16x4x8xf32, #tpu.memory_space<vmem>>, vector<1x4x8xf32>
    %15 = vector.shape_cast %14 : vector<1x4x8xf32> to vector<4x8xf32>
    %c0_16 = arith.constant 0 : index
    %c0_17 = arith.constant 0 : index
    %c2_18 = arith.constant 2 : index
    %16 = vector.load %arg2[%c0_16, %c0_17, %c2_18] : memref<1x8x421xf32, #tpu.memory_space<vmem>>, vector<1x8x361xf32>
    %17 = vector.shape_cast %16 : vector<1x8x361xf32> to vector<8x361xf32>
    %cst_19 = arith.constant dense<0.000000e+00> : vector<4x361xf32>
    %18 = tpu.matmul %15, %17, %cst_19 {dimension_numbers = #tpu.dot_dimension_numbers<[1], [0], [0], [1], [0, 0, 1, 1], [], []>} : vector<4x8xf32>, vector<8x361xf32>, vector<4x361xf32> -> vector<4x361xf32>
    %19 = arith.addf %13, %18 : vector<4x361xf32>
    %c3 = arith.constant 3 : index
    %c0_20 = arith.constant 0 : index
    %c0_21 = arith.constant 0 : index
    %20 = vector.load %arg3[%c3, %c0_20, %c0_21] : memref<16x4x8xf32, #tpu.memory_space<vmem>>, vector<1x4x8xf32>
    %21 = vector.shape_cast %20 : vector<1x4x8xf32> to vector<4x8xf32>
    %c0_22 = arith.constant 0 : index
    %c0_23 = arith.constant 0 : index
    %c3_24 = arith.constant 3 : index
    %22 = vector.load %arg2[%c0_22, %c0_23, %c3_24] : memref<1x8x421xf32, #tpu.memory_space<vmem>>, vector<1x8x361xf32>
    %23 = vector.shape_cast %22 : vector<1x8x361xf32> to vector<8x361xf32>
    %cst_25 = arith.constant dense<0.000000e+00> : vector<4x361xf32>
    %24 = tpu.matmul %21, %23, %cst_25 {dimension_numbers = #tpu.dot_dimension_numbers<[1], [0], [0], [1], [0, 0, 1, 1], [], []>} : vector<4x8xf32>, vector<8x361xf32>, vector<4x361xf32> -> vector<4x361xf32>
    %25 = arith.addf %19, %24 : vector<4x361xf32>
    %c4 = arith.constant 4 : index
    %c0_26 = arith.constant 0 : index
    %c0_27 = arith.constant 0 : index
    %26 = vector.load %arg3[%c4, %c0_26, %c0_27] : memref<16x4x8xf32, #tpu.memory_space<vmem>>, vector<1x4x8xf32>
    %27 = vector.shape_cast %26 : vector<1x4x8xf32> to vector<4x8xf32>
    %c0_28 = arith.constant 0 : index
    %c0_29 = arith.constant 0 : index
    %c19 = arith.constant 19 : index
    %28 = vector.load %arg2[%c0_28, %c0_29, %c19] : memref<1x8x421xf32, #tpu.memory_space<vmem>>, vector<1x8x361xf32>
    %29 = vector.shape_cast %28 : vector<1x8x361xf32> to vector<8x361xf32>
    %cst_30 = arith.constant dense<0.000000e+00> : vector<4x361xf32>
    %30 = tpu.matmul %27, %29, %cst_30 {dimension_numbers = #tpu.dot_dimension_numbers<[1], [0], [0], [1], [0, 0, 1, 1], [], []>} : vector<4x8xf32>, vector<8x361xf32>, vector<4x361xf32> -> vector<4x361xf32>
    %31 = arith.addf %25, %30 : vector<4x361xf32>
    %c5 = arith.constant 5 : index
    %c0_31 = arith.constant 0 : index
    %c0_32 = arith.constant 0 : index
    %32 = vector.load %arg3[%c5, %c0_31, %c0_32] : memref<16x4x8xf32, #tpu.memory_space<vmem>>, vector<1x4x8xf32>
    %33 = vector.shape_cast %32 : vector<1x4x8xf32> to vector<4x8xf32>
    %c0_33 = arith.constant 0 : index
    %c0_34 = arith.constant 0 : index
    %c20 = arith.constant 20 : index
    %34 = vector.load %arg2[%c0_33, %c0_34, %c20] : memref<1x8x421xf32, #tpu.memory_space<vmem>>, vector<1x8x361xf32>
    %35 = vector.shape_cast %34 : vector<1x8x361xf32> to vector<8x361xf32>
    %cst_35 = arith.constant dense<0.000000e+00> : vector<4x361xf32>
    %36 = tpu.matmul %33, %35, %cst_35 {dimension_numbers = #tpu.dot_dimension_numbers<[1], [0], [0], [1], [0, 0, 1, 1], [], []>} : vector<4x8xf32>, vector<8x361xf32>, vector<4x361xf32> -> vector<4x361xf32>
    %37 = arith.addf %31, %36 : vector<4x361xf32>
    %c6 = arith.constant 6 : index
    %c0_36 = arith.constant 0 : index
    %c0_37 = arith.constant 0 : index
    %38 = vector.load %arg3[%c6, %c0_36, %c0_37] : memref<16x4x8xf32, #tpu.memory_space<vmem>>, vector<1x4x8xf32>
    %39 = vector.shape_cast %38 : vector<1x4x8xf32> to vector<4x8xf32>
    %c0_38 = arith.constant 0 : index
    %c0_39 = arith.constant 0 : index
    %c21 = arith.constant 21 : index
    %40 = vector.load %arg2[%c0_38, %c0_39, %c21] : memref<1x8x421xf32, #tpu.memory_space<vmem>>, vector<1x8x361xf32>
    %41 = vector.shape_cast %40 : vector<1x8x361xf32> to vector<8x361xf32>
    %cst_40 = arith.constant dense<0.000000e+00> : vector<4x361xf32>
    %42 = tpu.matmul %39, %41, %cst_40 {dimension_numbers = #tpu.dot_dimension_numbers<[1], [0], [0], [1], [0, 0, 1, 1], [], []>} : vector<4x8xf32>, vector<8x361xf32>, vector<4x361xf32> -> vector<4x361xf32>
    %43 = arith.addf %37, %42 : vector<4x361xf32>
    %c7 = arith.constant 7 : index
    %c0_41 = arith.constant 0 : index
    %c0_42 = arith.constant 0 : index
    %44 = vector.load %arg3[%c7, %c0_41, %c0_42] : memref<16x4x8xf32, #tpu.memory_space<vmem>>, vector<1x4x8xf32>
    %45 = vector.shape_cast %44 : vector<1x4x8xf32> to vector<4x8xf32>
    %c0_43 = arith.constant 0 : index
    %c0_44 = arith.constant 0 : index
    %c22 = arith.constant 22 : index
    %46 = vector.load %arg2[%c0_43, %c0_44, %c22] : memref<1x8x421xf32, #tpu.memory_space<vmem>>, vector<1x8x361xf32>
    %47 = vector.shape_cast %46 : vector<1x8x361xf32> to vector<8x361xf32>
    %cst_45 = arith.constant dense<0.000000e+00> : vector<4x361xf32>
    %48 = tpu.matmul %45, %47, %cst_45 {dimension_numbers = #tpu.dot_dimension_numbers<[1], [0], [0], [1], [0, 0, 1, 1], [], []>} : vector<4x8xf32>, vector<8x361xf32>, vector<4x361xf32> -> vector<4x361xf32>
    %49 = arith.addf %43, %48 : vector<4x361xf32>
    %c8 = arith.constant 8 : index
    %c0_46 = arith.constant 0 : index
    %c0_47 = arith.constant 0 : index
    %50 = vector.load %arg3[%c8, %c0_46, %c0_47] : memref<16x4x8xf32, #tpu.memory_space<vmem>>, vector<1x4x8xf32>
    %51 = vector.shape_cast %50 : vector<1x4x8xf32> to vector<4x8xf32>
    %c0_48 = arith.constant 0 : index
    %c0_49 = arith.constant 0 : index
    %c38 = arith.constant 38 : index
    %52 = vector.load %arg2[%c0_48, %c0_49, %c38] : memref<1x8x421xf32, #tpu.memory_space<vmem>>, vector<1x8x361xf32>
    %53 = vector.shape_cast %52 : vector<1x8x361xf32> to vector<8x361xf32>
    %cst_50 = arith.constant dense<0.000000e+00> : vector<4x361xf32>
    %54 = tpu.matmul %51, %53, %cst_50 {dimension_numbers = #tpu.dot_dimension_numbers<[1], [0], [0], [1], [0, 0, 1, 1], [], []>} : vector<4x8xf32>, vector<8x361xf32>, vector<4x361xf32> -> vector<4x361xf32>
    %55 = arith.addf %49, %54 : vector<4x361xf32>
    %c9 = arith.constant 9 : index
    %c0_51 = arith.constant 0 : index
    %c0_52 = arith.constant 0 : index
    %56 = vector.load %arg3[%c9, %c0_51, %c0_52] : memref<16x4x8xf32, #tpu.memory_space<vmem>>, vector<1x4x8xf32>
    %57 = vector.shape_cast %56 : vector<1x4x8xf32> to vector<4x8xf32>
    %c0_53 = arith.constant 0 : index
    %c0_54 = arith.constant 0 : index
    %c39 = arith.constant 39 : index
    %58 = vector.load %arg2[%c0_53, %c0_54, %c39] : memref<1x8x421xf32, #tpu.memory_space<vmem>>, vector<1x8x361xf32>
    %59 = vector.shape_cast %58 : vector<1x8x361xf32> to vector<8x361xf32>
    %cst_55 = arith.constant dense<0.000000e+00> : vector<4x361xf32>
    %60 = tpu.matmul %57, %59, %cst_55 {dimension_numbers = #tpu.dot_dimension_numbers<[1], [0], [0], [1], [0, 0, 1, 1], [], []>} : vector<4x8xf32>, vector<8x361xf32>, vector<4x361xf32> -> vector<4x361xf32>
    %61 = arith.addf %55, %60 : vector<4x361xf32>
    %c10 = arith.constant 10 : index
    %c0_56 = arith.constant 0 : index
    %c0_57 = arith.constant 0 : index
    %62 = vector.load %arg3[%c10, %c0_56, %c0_57] : memref<16x4x8xf32, #tpu.memory_space<vmem>>, vector<1x4x8xf32>
    %63 = vector.shape_cast %62 : vector<1x4x8xf32> to vector<4x8xf32>
    %c0_58 = arith.constant 0 : index
    %c0_59 = arith.constant 0 : index
    %c40 = arith.constant 40 : index
    %64 = vector.load %arg2[%c0_58, %c0_59, %c40] : memref<1x8x421xf32, #tpu.memory_space<vmem>>, vector<1x8x361xf32>
    %65 = vector.shape_cast %64 : vector<1x8x361xf32> to vector<8x361xf32>
    %cst_60 = arith.constant dense<0.000000e+00> : vector<4x361xf32>
    %66 = tpu.matmul %63, %65, %cst_60 {dimension_numbers = #tpu.dot_dimension_numbers<[1], [0], [0], [1], [0, 0, 1, 1], [], []>} : vector<4x8xf32>, vector<8x361xf32>, vector<4x361xf32> -> vector<4x361xf32>
    %67 = arith.addf %61, %66 : vector<4x361xf32>
    %c11 = arith.constant 11 : index
    %c0_61 = arith.constant 0 : index
    %c0_62 = arith.constant 0 : index
    %68 = vector.load %arg3[%c11, %c0_61, %c0_62] : memref<16x4x8xf32, #tpu.memory_space<vmem>>, vector<1x4x8xf32>
    %69 = vector.shape_cast %68 : vector<1x4x8xf32> to vector<4x8xf32>
    %c0_63 = arith.constant 0 : index
    %c0_64 = arith.constant 0 : index
    %c41 = arith.constant 41 : index
    %70 = vector.load %arg2[%c0_63, %c0_64, %c41] : memref<1x8x421xf32, #tpu.memory_space<vmem>>, vector<1x8x361xf32>
    %71 = vector.shape_cast %70 : vector<1x8x361xf32> to vector<8x361xf32>
    %cst_65 = arith.constant dense<0.000000e+00> : vector<4x361xf32>
    %72 = tpu.matmul %69, %71, %cst_65 {dimension_numbers = #tpu.dot_dimension_numbers<[1], [0], [0], [1], [0, 0, 1, 1], [], []>} : vector<4x8xf32>, vector<8x361xf32>, vector<4x361xf32> -> vector<4x361xf32>
    %73 = arith.addf %67, %72 : vector<4x361xf32>
    %c12 = arith.constant 12 : index
    %c0_66 = arith.constant 0 : index
    %c0_67 = arith.constant 0 : index
    %74 = vector.load %arg3[%c12, %c0_66, %c0_67] : memref<16x4x8xf32, #tpu.memory_space<vmem>>, vector<1x4x8xf32>
    %75 = vector.shape_cast %74 : vector<1x4x8xf32> to vector<4x8xf32>
    %c0_68 = arith.constant 0 : index
    %c0_69 = arith.constant 0 : index
    %c57 = arith.constant 57 : index
    %76 = vector.load %arg2[%c0_68, %c0_69, %c57] : memref<1x8x421xf32, #tpu.memory_space<vmem>>, vector<1x8x361xf32>
    %77 = vector.shape_cast %76 : vector<1x8x361xf32> to vector<8x361xf32>
    %cst_70 = arith.constant dense<0.000000e+00> : vector<4x361xf32>
    %78 = tpu.matmul %75, %77, %cst_70 {dimension_numbers = #tpu.dot_dimension_numbers<[1], [0], [0], [1], [0, 0, 1, 1], [], []>} : vector<4x8xf32>, vector<8x361xf32>, vector<4x361xf32> -> vector<4x361xf32>
    %79 = arith.addf %73, %78 : vector<4x361xf32>
    %c13 = arith.constant 13 : index
    %c0_71 = arith.constant 0 : index
    %c0_72 = arith.constant 0 : index
    %80 = vector.load %arg3[%c13, %c0_71, %c0_72] : memref<16x4x8xf32, #tpu.memory_space<vmem>>, vector<1x4x8xf32>
    %81 = vector.shape_cast %80 : vector<1x4x8xf32> to vector<4x8xf32>
    %c0_73 = arith.constant 0 : index
    %c0_74 = arith.constant 0 : index
    %c58 = arith.constant 58 : index
    %82 = vector.load %arg2[%c0_73, %c0_74, %c58] : memref<1x8x421xf32, #tpu.memory_space<vmem>>, vector<1x8x361xf32>
    %83 = vector.shape_cast %82 : vector<1x8x361xf32> to vector<8x361xf32>
    %cst_75 = arith.constant dense<0.000000e+00> : vector<4x361xf32>
    %84 = tpu.matmul %81, %83, %cst_75 {dimension_numbers = #tpu.dot_dimension_numbers<[1], [0], [0], [1], [0, 0, 1, 1], [], []>} : vector<4x8xf32>, vector<8x361xf32>, vector<4x361xf32> -> vector<4x361xf32>
    %85 = arith.addf %79, %84 : vector<4x361xf32>
    %c14 = arith.constant 14 : index
    %c0_76 = arith.constant 0 : index
    %c0_77 = arith.constant 0 : index
    %86 = vector.load %arg3[%c14, %c0_76, %c0_77] : memref<16x4x8xf32, #tpu.memory_space<vmem>>, vector<1x4x8xf32>
    %87 = vector.shape_cast %86 : vector<1x4x8xf32> to vector<4x8xf32>
    %c0_78 = arith.constant 0 : index
    %c0_79 = arith.constant 0 : index
    %c59 = arith.constant 59 : index
    %88 = vector.load %arg2[%c0_78, %c0_79, %c59] : memref<1x8x421xf32, #tpu.memory_space<vmem>>, vector<1x8x361xf32>
    %89 = vector.shape_cast %88 : vector<1x8x361xf32> to vector<8x361xf32>
    %cst_80 = arith.constant dense<0.000000e+00> : vector<4x361xf32>
    %90 = tpu.matmul %87, %89, %cst_80 {dimension_numbers = #tpu.dot_dimension_numbers<[1], [0], [0], [1], [0, 0, 1, 1], [], []>} : vector<4x8xf32>, vector<8x361xf32>, vector<4x361xf32> -> vector<4x361xf32>
    %91 = arith.addf %85, %90 : vector<4x361xf32>
    %c15 = arith.constant 15 : index
    %c0_81 = arith.constant 0 : index
    %c0_82 = arith.constant 0 : index
    %92 = vector.load %arg3[%c15, %c0_81, %c0_82] : memref<16x4x8xf32, #tpu.memory_space<vmem>>, vector<1x4x8xf32>
    %93 = vector.shape_cast %92 : vector<1x4x8xf32> to vector<4x8xf32>
    %c0_83 = arith.constant 0 : index
    %c0_84 = arith.constant 0 : index
    %c60 = arith.constant 60 : index
    %94 = vector.load %arg2[%c0_83, %c0_84, %c60] : memref<1x8x421xf32, #tpu.memory_space<vmem>>, vector<1x8x361xf32>
    %95 = vector.shape_cast %94 : vector<1x8x361xf32> to vector<8x361xf32>
    %cst_85 = arith.constant dense<0.000000e+00> : vector<4x361xf32>
    %96 = tpu.matmul %93, %95, %cst_85 {dimension_numbers = #tpu.dot_dimension_numbers<[1], [0], [0], [1], [0, 0, 1, 1], [], []>} : vector<4x8xf32>, vector<8x361xf32>, vector<4x361xf32> -> vector<4x361xf32>
    %97 = arith.addf %91, %96 : vector<4x361xf32>
    %c0_86 = arith.constant 0 : index
    %c0_87 = arith.constant 0 : index
    %98 = vector.load %arg7[%c0_86, %c0_87] : memref<4x1xf32, #tpu.memory_space<vmem>>, vector<4x1xf32>
    %99 = vector.broadcast %98 : vector<4x1xf32> to vector<4x361xf32>
    %100 = arith.addf %97, %99 : vector<4x361xf32>
    %101 = vector.broadcast %0 : vector<1x361xf32> to vector<4x361xf32>
    %102 = arith.mulf %100, %101 : vector<4x361xf32>
    %cst_88 = arith.constant 0.000000e+00 : f32
    %103 = vector.broadcast %cst_88 : f32 to vector<4x401xf32>
    %c0_89 = arith.constant 0 : index
    %c0_90 = arith.constant 0 : index
    %104 = vector.load %arg12[%c0_89, %c0_90] : memref<4x401xf32, #tpu.memory_space<vmem>>, vector<4x401xf32>
    tpu.vector_store %arg12[%c0_89, %c0_90], %103 {strides = array<i32>} : memref<4x401xf32, #tpu.memory_space<vmem>>, vector<4x401xf32>,
    %c0_91 = arith.constant 0 : index
    %c20_92 = arith.constant 20 : index
    %105 = vector.load %arg12[%c0_91, %c20_92] : memref<4x401xf32, #tpu.memory_space<vmem>>, vector<4x361xf32>
    tpu.vector_store %arg12[%c0_91, %c20_92], %102 {strides = array<i32>} : memref<4x401xf32, #tpu.memory_space<vmem>>, vector<4x361xf32>,
    %cst_93 = arith.constant 0.000000e+00 : f32
    %106 = vector.broadcast %cst_93 : f32 to vector<4x361xf32>
    %c0_94 = arith.constant 0 : index
    %c0_95 = arith.constant 0 : index
    %c0_96 = arith.constant 0 : index
    %107 = vector.load %arg4[%c0_94, %c0_95, %c0_96] : memref<9x4x4xf32, #tpu.memory_space<vmem>>, vector<1x4x4xf32>
    %108 = vector.shape_cast %107 : vector<1x4x4xf32> to vector<4x4xf32>
    %c0_97 = arith.constant 0 : index
    %c0_98 = arith.constant 0 : index
    %c0_99 = arith.constant 0 : index
    %109 = vector.load %arg1[%c0_97, %c0_98, %c0_99] : memref<1x4x401xf32, #tpu.memory_space<vmem>>, vector<1x4x361xf32>
    %110 = vector.shape_cast %109 : vector<1x4x361xf32> to vector<4x361xf32>
    %cst_100 = arith.constant dense<0.000000e+00> : vector<4x361xf32>
    %111 = tpu.matmul %108, %110, %cst_100 {dimension_numbers = #tpu.dot_dimension_numbers<[1], [0], [0], [1], [0, 0, 1, 1], [], []>} : vector<4x4xf32>, vector<4x361xf32>, vector<4x361xf32> -> vector<4x361xf32>
    %112 = arith.addf %106, %111 : vector<4x361xf32>
    %c0_101 = arith.constant 0 : index
    %c0_102 = arith.constant 0 : index
    %c0_103 = arith.constant 0 : index
    %113 = vector.load %arg5[%c0_101, %c0_102, %c0_103] : memref<9x4x4xf32, #tpu.memory_space<vmem>>, vector<1x4x4xf32>
    %114 = vector.shape_cast %113 : vector<1x4x4xf32> to vector<4x4xf32>
    %c0_104 = arith.constant 0 : index
    %c0_105 = arith.constant 0 : index
    %115 = vector.load %arg12[%c0_104, %c0_105] : memref<4x401xf32, #tpu.memory_space<vmem>>, vector<4x361xf32>
    %cst_106 = arith.constant dense<0.000000e+00> : vector<4x361xf32>
    %116 = tpu.matmul %114, %115, %cst_106 {dimension_numbers = #tpu.dot_dimension_numbers<[1], [0], [0], [1], [0, 0, 1, 1], [], []>} : vector<4x4xf32>, vector<4x361xf32>, vector<4x361xf32> -> vector<4x361xf32>
    %117 = arith.addf %112, %116 : vector<4x361xf32>
    %c1_107 = arith.constant 1 : index
    %c0_108 = arith.constant 0 : index
    %c0_109 = arith.constant 0 : index
    %118 = vector.load %arg4[%c1_107, %c0_108, %c0_109] : memref<9x4x4xf32, #tpu.memory_space<vmem>>, vector<1x4x4xf32>
    %119 = vector.shape_cast %118 : vector<1x4x4xf32> to vector<4x4xf32>
    %c0_110 = arith.constant 0 : index
    %c0_111 = arith.constant 0 : index
    %c1_112 = arith.constant 1 : index
    %120 = vector.load %arg1[%c0_110, %c0_111, %c1_112] : memref<1x4x401xf32, #tpu.memory_space<vmem>>, vector<1x4x361xf32>
    %121 = vector.shape_cast %120 : vector<1x4x361xf32> to vector<4x361xf32>
    %cst_113 = arith.constant dense<0.000000e+00> : vector<4x361xf32>
    %122 = tpu.matmul %119, %121, %cst_113 {dimension_numbers = #tpu.dot_dimension_numbers<[1], [0], [0], [1], [0, 0, 1, 1], [], []>} : vector<4x4xf32>, vector<4x361xf32>, vector<4x361xf32> -> vector<4x361xf32>
    %123 = arith.addf %117, %122 : vector<4x361xf32>
    %c1_114 = arith.constant 1 : index
    %c0_115 = arith.constant 0 : index
    %c0_116 = arith.constant 0 : index
    %124 = vector.load %arg5[%c1_114, %c0_115, %c0_116] : memref<9x4x4xf32, #tpu.memory_space<vmem>>, vector<1x4x4xf32>
    %125 = vector.shape_cast %124 : vector<1x4x4xf32> to vector<4x4xf32>
    %c0_117 = arith.constant 0 : index
    %c1_118 = arith.constant 1 : index
    %126 = vector.load %arg12[%c0_117, %c1_118] : memref<4x401xf32, #tpu.memory_space<vmem>>, vector<4x361xf32>
    %cst_119 = arith.constant dense<0.000000e+00> : vector<4x361xf32>
    %127 = tpu.matmul %125, %126, %cst_119 {dimension_numbers = #tpu.dot_dimension_numbers<[1], [0], [0], [1], [0, 0, 1, 1], [], []>} : vector<4x4xf32>, vector<4x361xf32>, vector<4x361xf32> -> vector<4x361xf32>
    %128 = arith.addf %123, %127 : vector<4x361xf32>
    %c2_120 = arith.constant 2 : index
    %c0_121 = arith.constant 0 : index
    %c0_122 = arith.constant 0 : index
    %129 = vector.load %arg4[%c2_120, %c0_121, %c0_122] : memref<9x4x4xf32, #tpu.memory_space<vmem>>, vector<1x4x4xf32>
    %130 = vector.shape_cast %129 : vector<1x4x4xf32> to vector<4x4xf32>
    %c0_123 = arith.constant 0 : index
    %c0_124 = arith.constant 0 : index
    %c2_125 = arith.constant 2 : index
    %131 = vector.load %arg1[%c0_123, %c0_124, %c2_125] : memref<1x4x401xf32, #tpu.memory_space<vmem>>, vector<1x4x361xf32>
    %132 = vector.shape_cast %131 : vector<1x4x361xf32> to vector<4x361xf32>
    %cst_126 = arith.constant dense<0.000000e+00> : vector<4x361xf32>
    %133 = tpu.matmul %130, %132, %cst_126 {dimension_numbers = #tpu.dot_dimension_numbers<[1], [0], [0], [1], [0, 0, 1, 1], [], []>} : vector<4x4xf32>, vector<4x361xf32>, vector<4x361xf32> -> vector<4x361xf32>
    %134 = arith.addf %128, %133 : vector<4x361xf32>
    %c2_127 = arith.constant 2 : index
    %c0_128 = arith.constant 0 : index
    %c0_129 = arith.constant 0 : index
    %135 = vector.load %arg5[%c2_127, %c0_128, %c0_129] : memref<9x4x4xf32, #tpu.memory_space<vmem>>, vector<1x4x4xf32>
    %136 = vector.shape_cast %135 : vector<1x4x4xf32> to vector<4x4xf32>
    %c0_130 = arith.constant 0 : index
    %c2_131 = arith.constant 2 : index
    %137 = vector.load %arg12[%c0_130, %c2_131] : memref<4x401xf32, #tpu.memory_space<vmem>>, vector<4x361xf32>
    %cst_132 = arith.constant dense<0.000000e+00> : vector<4x361xf32>
    %138 = tpu.matmul %136, %137, %cst_132 {dimension_numbers = #tpu.dot_dimension_numbers<[1], [0], [0], [1], [0, 0, 1, 1], [], []>} : vector<4x4xf32>, vector<4x361xf32>, vector<4x361xf32> -> vector<4x361xf32>
    %139 = arith.addf %134, %138 : vector<4x361xf32>
    %c3_133 = arith.constant 3 : index
    %c0_134 = arith.constant 0 : index
    %c0_135 = arith.constant 0 : index
    %140 = vector.load %arg4[%c3_133, %c0_134, %c0_135] : memref<9x4x4xf32, #tpu.memory_space<vmem>>, vector<1x4x4xf32>
    %141 = vector.shape_cast %140 : vector<1x4x4xf32> to vector<4x4xf32>
    %c0_136 = arith.constant 0 : index
    %c0_137 = arith.constant 0 : index
    %c19_138 = arith.constant 19 : index
    %142 = vector.load %arg1[%c0_136, %c0_137, %c19_138] : memref<1x4x401xf32, #tpu.memory_space<vmem>>, vector<1x4x361xf32>
    %143 = vector.shape_cast %142 : vector<1x4x361xf32> to vector<4x361xf32>
    %cst_139 = arith.constant dense<0.000000e+00> : vector<4x361xf32>
    %144 = tpu.matmul %141, %143, %cst_139 {dimension_numbers = #tpu.dot_dimension_numbers<[1], [0], [0], [1], [0, 0, 1, 1], [], []>} : vector<4x4xf32>, vector<4x361xf32>, vector<4x361xf32> -> vector<4x361xf32>
    %145 = arith.addf %139, %144 : vector<4x361xf32>
    %c3_140 = arith.constant 3 : index
    %c0_141 = arith.constant 0 : index
    %c0_142 = arith.constant 0 : index
    %146 = vector.load %arg5[%c3_140, %c0_141, %c0_142] : memref<9x4x4xf32, #tpu.memory_space<vmem>>, vector<1x4x4xf32>
    %147 = vector.shape_cast %146 : vector<1x4x4xf32> to vector<4x4xf32>
    %c0_143 = arith.constant 0 : index
    %c19_144 = arith.constant 19 : index
    %148 = vector.load %arg12[%c0_143, %c19_144] : memref<4x401xf32, #tpu.memory_space<vmem>>, vector<4x361xf32>
    %cst_145 = arith.constant dense<0.000000e+00> : vector<4x361xf32>
    %149 = tpu.matmul %147, %148, %cst_145 {dimension_numbers = #tpu.dot_dimension_numbers<[1], [0], [0], [1], [0, 0, 1, 1], [], []>} : vector<4x4xf32>, vector<4x361xf32>, vector<4x361xf32> -> vector<4x361xf32>
    %150 = arith.addf %145, %149 : vector<4x361xf32>
    %c4_146 = arith.constant 4 : index
    %c0_147 = arith.constant 0 : index
    %c0_148 = arith.constant 0 : index
    %151 = vector.load %arg4[%c4_146, %c0_147, %c0_148] : memref<9x4x4xf32, #tpu.memory_space<vmem>>, vector<1x4x4xf32>
    %152 = vector.shape_cast %151 : vector<1x4x4xf32> to vector<4x4xf32>
    %c0_149 = arith.constant 0 : index
    %c0_150 = arith.constant 0 : index
    %c20_151 = arith.constant 20 : index
    %153 = vector.load %arg1[%c0_149, %c0_150, %c20_151] : memref<1x4x401xf32, #tpu.memory_space<vmem>>, vector<1x4x361xf32>
    %154 = vector.shape_cast %153 : vector<1x4x361xf32> to vector<4x361xf32>
    %cst_152 = arith.constant dense<0.000000e+00> : vector<4x361xf32>
    %155 = tpu.matmul %152, %154, %cst_152 {dimension_numbers = #tpu.dot_dimension_numbers<[1], [0], [0], [1], [0, 0, 1, 1], [], []>} : vector<4x4xf32>, vector<4x361xf32>, vector<4x361xf32> -> vector<4x361xf32>
    %156 = arith.addf %150, %155 : vector<4x361xf32>
    %c4_153 = arith.constant 4 : index
    %c0_154 = arith.constant 0 : index
    %c0_155 = arith.constant 0 : index
    %157 = vector.load %arg5[%c4_153, %c0_154, %c0_155] : memref<9x4x4xf32, #tpu.memory_space<vmem>>, vector<1x4x4xf32>
    %158 = vector.shape_cast %157 : vector<1x4x4xf32> to vector<4x4xf32>
    %c0_156 = arith.constant 0 : index
    %c20_157 = arith.constant 20 : index
    %159 = vector.load %arg12[%c0_156, %c20_157] : memref<4x401xf32, #tpu.memory_space<vmem>>, vector<4x361xf32>
    %cst_158 = arith.constant dense<0.000000e+00> : vector<4x361xf32>
    %160 = tpu.matmul %158, %159, %cst_158 {dimension_numbers = #tpu.dot_dimension_numbers<[1], [0], [0], [1], [0, 0, 1, 1], [], []>} : vector<4x4xf32>, vector<4x361xf32>, vector<4x361xf32> -> vector<4x361xf32>
    %161 = arith.addf %156, %160 : vector<4x361xf32>
    %c5_159 = arith.constant 5 : index
    %c0_160 = arith.constant 0 : index
    %c0_161 = arith.constant 0 : index
    %162 = vector.load %arg4[%c5_159, %c0_160, %c0_161] : memref<9x4x4xf32, #tpu.memory_space<vmem>>, vector<1x4x4xf32>
    %163 = vector.shape_cast %162 : vector<1x4x4xf32> to vector<4x4xf32>
    %c0_162 = arith.constant 0 : index
    %c0_163 = arith.constant 0 : index
    %c21_164 = arith.constant 21 : index
    %164 = vector.load %arg1[%c0_162, %c0_163, %c21_164] : memref<1x4x401xf32, #tpu.memory_space<vmem>>, vector<1x4x361xf32>
    %165 = vector.shape_cast %164 : vector<1x4x361xf32> to vector<4x361xf32>
    %cst_165 = arith.constant dense<0.000000e+00> : vector<4x361xf32>
    %166 = tpu.matmul %163, %165, %cst_165 {dimension_numbers = #tpu.dot_dimension_numbers<[1], [0], [0], [1], [0, 0, 1, 1], [], []>} : vector<4x4xf32>, vector<4x361xf32>, vector<4x361xf32> -> vector<4x361xf32>
    %167 = arith.addf %161, %166 : vector<4x361xf32>
    %c5_166 = arith.constant 5 : index
    %c0_167 = arith.constant 0 : index
    %c0_168 = arith.constant 0 : index
    %168 = vector.load %arg5[%c5_166, %c0_167, %c0_168] : memref<9x4x4xf32, #tpu.memory_space<vmem>>, vector<1x4x4xf32>
    %169 = vector.shape_cast %168 : vector<1x4x4xf32> to vector<4x4xf32>
    %c0_169 = arith.constant 0 : index
    %c21_170 = arith.constant 21 : index
    %170 = vector.load %arg12[%c0_169, %c21_170] : memref<4x401xf32, #tpu.memory_space<vmem>>, vector<4x361xf32>
    %cst_171 = arith.constant dense<0.000000e+00> : vector<4x361xf32>
    %171 = tpu.matmul %169, %170, %cst_171 {dimension_numbers = #tpu.dot_dimension_numbers<[1], [0], [0], [1], [0, 0, 1, 1], [], []>} : vector<4x4xf32>, vector<4x361xf32>, vector<4x361xf32> -> vector<4x361xf32>
    %172 = arith.addf %167, %171 : vector<4x361xf32>
    %c6_172 = arith.constant 6 : index
    %c0_173 = arith.constant 0 : index
    %c0_174 = arith.constant 0 : index
    %173 = vector.load %arg4[%c6_172, %c0_173, %c0_174] : memref<9x4x4xf32, #tpu.memory_space<vmem>>, vector<1x4x4xf32>
    %174 = vector.shape_cast %173 : vector<1x4x4xf32> to vector<4x4xf32>
    %c0_175 = arith.constant 0 : index
    %c0_176 = arith.constant 0 : index
    %c38_177 = arith.constant 38 : index
    %175 = vector.load %arg1[%c0_175, %c0_176, %c38_177] : memref<1x4x401xf32, #tpu.memory_space<vmem>>, vector<1x4x361xf32>
    %176 = vector.shape_cast %175 : vector<1x4x361xf32> to vector<4x361xf32>
    %cst_178 = arith.constant dense<0.000000e+00> : vector<4x361xf32>
    %177 = tpu.matmul %174, %176, %cst_178 {dimension_numbers = #tpu.dot_dimension_numbers<[1], [0], [0], [1], [0, 0, 1, 1], [], []>} : vector<4x4xf32>, vector<4x361xf32>, vector<4x361xf32> -> vector<4x361xf32>
    %178 = arith.addf %172, %177 : vector<4x361xf32>
    %c6_179 = arith.constant 6 : index
    %c0_180 = arith.constant 0 : index
    %c0_181 = arith.constant 0 : index
    %179 = vector.load %arg5[%c6_179, %c0_180, %c0_181] : memref<9x4x4xf32, #tpu.memory_space<vmem>>, vector<1x4x4xf32>
    %180 = vector.shape_cast %179 : vector<1x4x4xf32> to vector<4x4xf32>
    %c0_182 = arith.constant 0 : index
    %c38_183 = arith.constant 38 : index
    %181 = vector.load %arg12[%c0_182, %c38_183] : memref<4x401xf32, #tpu.memory_space<vmem>>, vector<4x361xf32>
    %cst_184 = arith.constant dense<0.000000e+00> : vector<4x361xf32>
    %182 = tpu.matmul %180, %181, %cst_184 {dimension_numbers = #tpu.dot_dimension_numbers<[1], [0], [0], [1], [0, 0, 1, 1], [], []>} : vector<4x4xf32>, vector<4x361xf32>, vector<4x361xf32> -> vector<4x361xf32>
    %183 = arith.addf %178, %182 : vector<4x361xf32>
    %c7_185 = arith.constant 7 : index
    %c0_186 = arith.constant 0 : index
    %c0_187 = arith.constant 0 : index
    %184 = vector.load %arg4[%c7_185, %c0_186, %c0_187] : memref<9x4x4xf32, #tpu.memory_space<vmem>>, vector<1x4x4xf32>
    %185 = vector.shape_cast %184 : vector<1x4x4xf32> to vector<4x4xf32>
    %c0_188 = arith.constant 0 : index
    %c0_189 = arith.constant 0 : index
    %c39_190 = arith.constant 39 : index
    %186 = vector.load %arg1[%c0_188, %c0_189, %c39_190] : memref<1x4x401xf32, #tpu.memory_space<vmem>>, vector<1x4x361xf32>
    %187 = vector.shape_cast %186 : vector<1x4x361xf32> to vector<4x361xf32>
    %cst_191 = arith.constant dense<0.000000e+00> : vector<4x361xf32>
    %188 = tpu.matmul %185, %187, %cst_191 {dimension_numbers = #tpu.dot_dimension_numbers<[1], [0], [0], [1], [0, 0, 1, 1], [], []>} : vector<4x4xf32>, vector<4x361xf32>, vector<4x361xf32> -> vector<4x361xf32>
    %189 = arith.addf %183, %188 : vector<4x361xf32>
    %c7_192 = arith.constant 7 : index
    %c0_193 = arith.constant 0 : index
    %c0_194 = arith.constant 0 : index
    %190 = vector.load %arg5[%c7_192, %c0_193, %c0_194] : memref<9x4x4xf32, #tpu.memory_space<vmem>>, vector<1x4x4xf32>
    %191 = vector.shape_cast %190 : vector<1x4x4xf32> to vector<4x4xf32>
    %c0_195 = arith.constant 0 : index
    %c39_196 = arith.constant 39 : index
    %192 = vector.load %arg12[%c0_195, %c39_196] : memref<4x401xf32, #tpu.memory_space<vmem>>, vector<4x361xf32>
    %cst_197 = arith.constant dense<0.000000e+00> : vector<4x361xf32>
    %193 = tpu.matmul %191, %192, %cst_197 {dimension_numbers = #tpu.dot_dimension_numbers<[1], [0], [0], [1], [0, 0, 1, 1], [], []>} : vector<4x4xf32>, vector<4x361xf32>, vector<4x361xf32> -> vector<4x361xf32>
    %194 = arith.addf %189, %193 : vector<4x361xf32>
    %c8_198 = arith.constant 8 : index
    %c0_199 = arith.constant 0 : index
    %c0_200 = arith.constant 0 : index
    %195 = vector.load %arg4[%c8_198, %c0_199, %c0_200] : memref<9x4x4xf32, #tpu.memory_space<vmem>>, vector<1x4x4xf32>
    %196 = vector.shape_cast %195 : vector<1x4x4xf32> to vector<4x4xf32>
    %c0_201 = arith.constant 0 : index
    %c0_202 = arith.constant 0 : index
    %c40_203 = arith.constant 40 : index
    %197 = vector.load %arg1[%c0_201, %c0_202, %c40_203] : memref<1x4x401xf32, #tpu.memory_space<vmem>>, vector<1x4x361xf32>
    %198 = vector.shape_cast %197 : vector<1x4x361xf32> to vector<4x361xf32>
    %cst_204 = arith.constant dense<0.000000e+00> : vector<4x361xf32>
    %199 = tpu.matmul %196, %198, %cst_204 {dimension_numbers = #tpu.dot_dimension_numbers<[1], [0], [0], [1], [0, 0, 1, 1], [], []>} : vector<4x4xf32>, vector<4x361xf32>, vector<4x361xf32> -> vector<4x361xf32>
    %200 = arith.addf %194, %199 : vector<4x361xf32>
    %c8_205 = arith.constant 8 : index
    %c0_206 = arith.constant 0 : index
    %c0_207 = arith.constant 0 : index
    %201 = vector.load %arg5[%c8_205, %c0_206, %c0_207] : memref<9x4x4xf32, #tpu.memory_space<vmem>>, vector<1x4x4xf32>
    %202 = vector.shape_cast %201 : vector<1x4x4xf32> to vector<4x4xf32>
    %c0_208 = arith.constant 0 : index
    %c40_209 = arith.constant 40 : index
    %203 = vector.load %arg12[%c0_208, %c40_209] : memref<4x401xf32, #tpu.memory_space<vmem>>, vector<4x361xf32>
    %cst_210 = arith.constant dense<0.000000e+00> : vector<4x361xf32>
    %204 = tpu.matmul %202, %203, %cst_210 {dimension_numbers = #tpu.dot_dimension_numbers<[1], [0], [0], [1], [0, 0, 1, 1], [], []>} : vector<4x4xf32>, vector<4x361xf32>, vector<4x361xf32> -> vector<4x361xf32>
    %205 = arith.addf %200, %204 : vector<4x361xf32>
    %c0_211 = arith.constant 0 : index
    %c0_212 = arith.constant 0 : index
    %206 = vector.load %arg8[%c0_211, %c0_212] : memref<4x1xf32, #tpu.memory_space<vmem>>, vector<4x1xf32>
    %207 = vector.broadcast %206 : vector<4x1xf32> to vector<4x361xf32>
    %208 = arith.addf %205, %207 : vector<4x361xf32>
    %cst_213 = arith.constant 0.000000e+00 : f32
    %209 = vector.broadcast %cst_213 : f32 to vector<4x361xf32>
    %210 = arith.maximumf %208, %209 : vector<4x361xf32>
    %211 = vector.broadcast %0 : vector<1x361xf32> to vector<4x361xf32>
    %212 = arith.mulf %210, %211 : vector<4x361xf32>
    %cst_214 = arith.constant 0.000000e+00 : f32
    %213 = vector.broadcast %cst_214 : f32 to vector<4x401xf32>
    %c0_215 = arith.constant 0 : index
    %c0_216 = arith.constant 0 : index
    %214 = vector.load %arg13[%c0_215, %c0_216] : memref<4x401xf32, #tpu.memory_space<vmem>>, vector<4x401xf32>
    tpu.vector_store %arg13[%c0_215, %c0_216], %213 {strides = array<i32>} : memref<4x401xf32, #tpu.memory_space<vmem>>, vector<4x401xf32>,
    %c0_217 = arith.constant 0 : index
    %c20_218 = arith.constant 20 : index
    %215 = vector.load %arg13[%c0_217, %c20_218] : memref<4x401xf32, #tpu.memory_space<vmem>>, vector<4x361xf32>
    tpu.vector_store %arg13[%c0_217, %c20_218], %212 {strides = array<i32>} : memref<4x401xf32, #tpu.memory_space<vmem>>, vector<4x361xf32>,
    %cst_219 = arith.constant 0.000000e+00 : f32
    %216 = vector.broadcast %cst_219 : f32 to vector<4x361xf32>
    %c0_220 = arith.constant 0 : index
    %c0_221 = arith.constant 0 : index
    %c0_222 = arith.constant 0 : index
    %217 = vector.load %arg6[%c0_220, %c0_221, %c0_222] : memref<9x4x4xf32, #tpu.memory_space<vmem>>, vector<1x4x4xf32>
    %218 = vector.shape_cast %217 : vector<1x4x4xf32> to vector<4x4xf32>
    %c0_223 = arith.constant 0 : index
    %c0_224 = arith.constant 0 : index
    %219 = vector.load %arg13[%c0_223, %c0_224] : memref<4x401xf32, #tpu.memory_space<vmem>>, vector<4x361xf32>
    %cst_225 = arith.constant dense<0.000000e+00> : vector<4x361xf32>
    %220 = tpu.matmul %218, %219, %cst_225 {dimension_numbers = #tpu.dot_dimension_numbers<[1], [0], [0], [1], [0, 0, 1, 1], [], []>} : vector<4x4xf32>, vector<4x361xf32>, vector<4x361xf32> -> vector<4x361xf32>
    %221 = arith.addf %216, %220 : vector<4x361xf32>
    %c1_226 = arith.constant 1 : index
    %c0_227 = arith.constant 0 : index
    %c0_228 = arith.constant 0 : index
    %222 = vector.load %arg6[%c1_226, %c0_227, %c0_228] : memref<9x4x4xf32, #tpu.memory_space<vmem>>, vector<1x4x4xf32>
    %223 = vector.shape_cast %222 : vector<1x4x4xf32> to vector<4x4xf32>
    %c0_229 = arith.constant 0 : index
    %c1_230 = arith.constant 1 : index
    %224 = vector.load %arg13[%c0_229, %c1_230] : memref<4x401xf32, #tpu.memory_space<vmem>>, vector<4x361xf32>
    %cst_231 = arith.constant dense<0.000000e+00> : vector<4x361xf32>
    %225 = tpu.matmul %223, %224, %cst_231 {dimension_numbers = #tpu.dot_dimension_numbers<[1], [0], [0], [1], [0, 0, 1, 1], [], []>} : vector<4x4xf32>, vector<4x361xf32>, vector<4x361xf32> -> vector<4x361xf32>
    %226 = arith.addf %221, %225 : vector<4x361xf32>
    %c2_232 = arith.constant 2 : index
    %c0_233 = arith.constant 0 : index
    %c0_234 = arith.constant 0 : index
    %227 = vector.load %arg6[%c2_232, %c0_233, %c0_234] : memref<9x4x4xf32, #tpu.memory_space<vmem>>, vector<1x4x4xf32>
    %228 = vector.shape_cast %227 : vector<1x4x4xf32> to vector<4x4xf32>
    %c0_235 = arith.constant 0 : index
    %c2_236 = arith.constant 2 : index
    %229 = vector.load %arg13[%c0_235, %c2_236] : memref<4x401xf32, #tpu.memory_space<vmem>>, vector<4x361xf32>
    %cst_237 = arith.constant dense<0.000000e+00> : vector<4x361xf32>
    %230 = tpu.matmul %228, %229, %cst_237 {dimension_numbers = #tpu.dot_dimension_numbers<[1], [0], [0], [1], [0, 0, 1, 1], [], []>} : vector<4x4xf32>, vector<4x361xf32>, vector<4x361xf32> -> vector<4x361xf32>
    %231 = arith.addf %226, %230 : vector<4x361xf32>
    %c3_238 = arith.constant 3 : index
    %c0_239 = arith.constant 0 : index
    %c0_240 = arith.constant 0 : index
    %232 = vector.load %arg6[%c3_238, %c0_239, %c0_240] : memref<9x4x4xf32, #tpu.memory_space<vmem>>, vector<1x4x4xf32>
    %233 = vector.shape_cast %232 : vector<1x4x4xf32> to vector<4x4xf32>
    %c0_241 = arith.constant 0 : index
    %c19_242 = arith.constant 19 : index
    %234 = vector.load %arg13[%c0_241, %c19_242] : memref<4x401xf32, #tpu.memory_space<vmem>>, vector<4x361xf32>
    %cst_243 = arith.constant dense<0.000000e+00> : vector<4x361xf32>
    %235 = tpu.matmul %233, %234, %cst_243 {dimension_numbers = #tpu.dot_dimension_numbers<[1], [0], [0], [1], [0, 0, 1, 1], [], []>} : vector<4x4xf32>, vector<4x361xf32>, vector<4x361xf32> -> vector<4x361xf32>
    %236 = arith.addf %231, %235 : vector<4x361xf32>
    %c4_244 = arith.constant 4 : index
    %c0_245 = arith.constant 0 : index
    %c0_246 = arith.constant 0 : index
    %237 = vector.load %arg6[%c4_244, %c0_245, %c0_246] : memref<9x4x4xf32, #tpu.memory_space<vmem>>, vector<1x4x4xf32>
    %238 = vector.shape_cast %237 : vector<1x4x4xf32> to vector<4x4xf32>
    %c0_247 = arith.constant 0 : index
    %c20_248 = arith.constant 20 : index
    %239 = vector.load %arg13[%c0_247, %c20_248] : memref<4x401xf32, #tpu.memory_space<vmem>>, vector<4x361xf32>
    %cst_249 = arith.constant dense<0.000000e+00> : vector<4x361xf32>
    %240 = tpu.matmul %238, %239, %cst_249 {dimension_numbers = #tpu.dot_dimension_numbers<[1], [0], [0], [1], [0, 0, 1, 1], [], []>} : vector<4x4xf32>, vector<4x361xf32>, vector<4x361xf32> -> vector<4x361xf32>
    %241 = arith.addf %236, %240 : vector<4x361xf32>
    %c5_250 = arith.constant 5 : index
    %c0_251 = arith.constant 0 : index
    %c0_252 = arith.constant 0 : index
    %242 = vector.load %arg6[%c5_250, %c0_251, %c0_252] : memref<9x4x4xf32, #tpu.memory_space<vmem>>, vector<1x4x4xf32>
    %243 = vector.shape_cast %242 : vector<1x4x4xf32> to vector<4x4xf32>
    %c0_253 = arith.constant 0 : index
    %c21_254 = arith.constant 21 : index
    %244 = vector.load %arg13[%c0_253, %c21_254] : memref<4x401xf32, #tpu.memory_space<vmem>>, vector<4x361xf32>
    %cst_255 = arith.constant dense<0.000000e+00> : vector<4x361xf32>
    %245 = tpu.matmul %243, %244, %cst_255 {dimension_numbers = #tpu.dot_dimension_numbers<[1], [0], [0], [1], [0, 0, 1, 1], [], []>} : vector<4x4xf32>, vector<4x361xf32>, vector<4x361xf32> -> vector<4x361xf32>
    %246 = arith.addf %241, %245 : vector<4x361xf32>
    %c6_256 = arith.constant 6 : index
    %c0_257 = arith.constant 0 : index
    %c0_258 = arith.constant 0 : index
    %247 = vector.load %arg6[%c6_256, %c0_257, %c0_258] : memref<9x4x4xf32, #tpu.memory_space<vmem>>, vector<1x4x4xf32>
    %248 = vector.shape_cast %247 : vector<1x4x4xf32> to vector<4x4xf32>
    %c0_259 = arith.constant 0 : index
    %c38_260 = arith.constant 38 : index
    %249 = vector.load %arg13[%c0_259, %c38_260] : memref<4x401xf32, #tpu.memory_space<vmem>>, vector<4x361xf32>
    %cst_261 = arith.constant dense<0.000000e+00> : vector<4x361xf32>
    %250 = tpu.matmul %248, %249, %cst_261 {dimension_numbers = #tpu.dot_dimension_numbers<[1], [0], [0], [1], [0, 0, 1, 1], [], []>} : vector<4x4xf32>, vector<4x361xf32>, vector<4x361xf32> -> vector<4x361xf32>
    %251 = arith.addf %246, %250 : vector<4x361xf32>
    %c7_262 = arith.constant 7 : index
    %c0_263 = arith.constant 0 : index
    %c0_264 = arith.constant 0 : index
    %252 = vector.load %arg6[%c7_262, %c0_263, %c0_264] : memref<9x4x4xf32, #tpu.memory_space<vmem>>, vector<1x4x4xf32>
    %253 = vector.shape_cast %252 : vector<1x4x4xf32> to vector<4x4xf32>
    %c0_265 = arith.constant 0 : index
    %c39_266 = arith.constant 39 : index
    %254 = vector.load %arg13[%c0_265, %c39_266] : memref<4x401xf32, #tpu.memory_space<vmem>>, vector<4x361xf32>
    %cst_267 = arith.constant dense<0.000000e+00> : vector<4x361xf32>
    %255 = tpu.matmul %253, %254, %cst_267 {dimension_numbers = #tpu.dot_dimension_numbers<[1], [0], [0], [1], [0, 0, 1, 1], [], []>} : vector<4x4xf32>, vector<4x361xf32>, vector<4x361xf32> -> vector<4x361xf32>
    %256 = arith.addf %251, %255 : vector<4x361xf32>
    %c8_268 = arith.constant 8 : index
    %c0_269 = arith.constant 0 : index
    %c0_270 = arith.constant 0 : index
    %257 = vector.load %arg6[%c8_268, %c0_269, %c0_270] : memref<9x4x4xf32, #tpu.memory_space<vmem>>, vector<1x4x4xf32>
    %258 = vector.shape_cast %257 : vector<1x4x4xf32> to vector<4x4xf32>
    %c0_271 = arith.constant 0 : index
    %c40_272 = arith.constant 40 : index
    %259 = vector.load %arg13[%c0_271, %c40_272] : memref<4x401xf32, #tpu.memory_space<vmem>>, vector<4x361xf32>
    %cst_273 = arith.constant dense<0.000000e+00> : vector<4x361xf32>
    %260 = tpu.matmul %258, %259, %cst_273 {dimension_numbers = #tpu.dot_dimension_numbers<[1], [0], [0], [1], [0, 0, 1, 1], [], []>} : vector<4x4xf32>, vector<4x361xf32>, vector<4x361xf32> -> vector<4x361xf32>
    %261 = arith.addf %256, %260 : vector<4x361xf32>
    %c0_274 = arith.constant 0 : index
    %c0_275 = arith.constant 0 : index
    %262 = vector.load %arg9[%c0_274, %c0_275] : memref<4x1xf32, #tpu.memory_space<vmem>>, vector<4x1xf32>
    %263 = vector.broadcast %262 : vector<4x1xf32> to vector<4x361xf32>
    %264 = arith.addf %261, %263 : vector<4x361xf32>
    %cst_276 = arith.constant 0.000000e+00 : f32
    %265 = vector.broadcast %cst_276 : f32 to vector<4x361xf32>
    %266 = arith.maximumf %264, %265 : vector<4x361xf32>
    %c0_277 = arith.constant 0 : index
    %c0_278 = arith.constant 0 : index
    %c0_279 = arith.constant 0 : index
    %267 = vector.load %arg11[%c0_277, %c0_278, %c0_279] : memref<1x4x361xf32, #tpu.memory_space<vmem>>, vector<1x4x361xf32>
    %268 = vector.shape_cast %267 : vector<1x4x361xf32> to vector<4x361xf32>
    %269 = vector.shape_cast %266 : vector<4x361xf32> to vector<1x4x361xf32>
    tpu.vector_store %arg11[%c0_277, %c0_278, %c0_279], %269 {strides = array<i32>} : memref<1x4x361xf32, #tpu.memory_space<vmem>>, vector<1x4x361xf32>,
    return
  }
  func.func @transform_0(%arg0: i32) -> (i32, i32, i32) {
    %c0_i32 = arith.constant 0 : i32
    %c0_i32_0 = arith.constant 0 : i32
    %c0_i32_1 = arith.constant 0 : i32
    return %arg0, %c0_i32, %c0_i32_0 : i32, i32, i32
  }
  func.func @transform_1(%arg0: i32) -> (i32, i32, i32) {
    %c0_i32 = arith.constant 0 : i32
    %c0_i32_0 = arith.constant 0 : i32
    %c0_i32_1 = arith.constant 0 : i32
    return %arg0, %c0_i32, %c0_i32_0 : i32, i32, i32
  }
  func.func @transform_2(%arg0: i32) -> (i32, i32, i32) {
    %c0_i32 = arith.constant 0 : i32
    %c0_i32_0 = arith.constant 0 : i32
    %c0_i32_1 = arith.constant 0 : i32
    %c0_i32_2 = arith.constant 0 : i32
    return %c0_i32, %c0_i32_0, %c0_i32_1 : i32, i32, i32
  }
  func.func @transform_3(%arg0: i32) -> (i32, i32, i32) {
    %c0_i32 = arith.constant 0 : i32
    %c0_i32_0 = arith.constant 0 : i32
    %c0_i32_1 = arith.constant 0 : i32
    %c0_i32_2 = arith.constant 0 : i32
    return %c0_i32, %c0_i32_0, %c0_i32_1 : i32, i32, i32
  }
  func.func @transform_4(%arg0: i32) -> (i32, i32, i32) {
    %c0_i32 = arith.constant 0 : i32
    %c0_i32_0 = arith.constant 0 : i32
    %c0_i32_1 = arith.constant 0 : i32
    %c0_i32_2 = arith.constant 0 : i32
    return %c0_i32, %c0_i32_0, %c0_i32_1 : i32, i32, i32
  }
  func.func @transform_5(%arg0: i32) -> (i32, i32, i32) {
    %c0_i32 = arith.constant 0 : i32
    %c0_i32_0 = arith.constant 0 : i32
    %c0_i32_1 = arith.constant 0 : i32
    %c0_i32_2 = arith.constant 0 : i32
    return %c0_i32, %c0_i32_0, %c0_i32_1 : i32, i32, i32
  }
  func.func @transform_6(%arg0: i32) -> (i32, i32) {
    %c0_i32 = arith.constant 0 : i32
    %c0_i32_0 = arith.constant 0 : i32
    %c0_i32_1 = arith.constant 0 : i32
    return %c0_i32, %c0_i32_0 : i32, i32
  }
  func.func @transform_7(%arg0: i32) -> (i32, i32) {
    %c0_i32 = arith.constant 0 : i32
    %c0_i32_0 = arith.constant 0 : i32
    %c0_i32_1 = arith.constant 0 : i32
    return %c0_i32, %c0_i32_0 : i32, i32
  }
  func.func @transform_8(%arg0: i32) -> (i32, i32) {
    %c0_i32 = arith.constant 0 : i32
    %c0_i32_0 = arith.constant 0 : i32
    %c0_i32_1 = arith.constant 0 : i32
    return %c0_i32, %c0_i32_0 : i32, i32
  }
  func.func @transform_9(%arg0: i32) -> (i32, i32) {
    %c0_i32 = arith.constant 0 : i32
    %c0_i32_0 = arith.constant 0 : i32
    %c0_i32_1 = arith.constant 0 : i32
    return %c0_i32, %c0_i32_0 : i32, i32
  }
  func.func @transform_10(%arg0: i32) -> (i32, i32, i32) {
    %c0_i32 = arith.constant 0 : i32
    %c0_i32_0 = arith.constant 0 : i32
    %c0_i32_1 = arith.constant 0 : i32
    return %arg0, %c0_i32, %c0_i32_0 : i32, i32, i32
  }
}

</mosaic_0001>

<bundles_post_ra>
// kernel: tpu_custom_call.1
= control target key start
LH: loop header
LB: loop body
LE: loop exit
PB: predicated region body
PF: predicated region fallthrough
CT: control target
= control target key end

     0   :  { %15 = vsyncpa [#allocation5], 0  ;;  %s5666_s0 = inlined_call_operand.vmem [shape: f32[2,4,401], index: 0, kind: input, shape index: {}]   ;;  %s5667_s1 = inlined_call_operand.vmem [shape: f32[2,8,421], index: 1, kind: input, shape index: {}]   ;;  %s5668_s2 = inlined_call_operand.vmem [shape: f32[16,4,8], index: 2, kind: input, shape index: {}]   ;;  %s5669_s3 = inlined_call_operand.vmem [shape: f32[9,4,4], index: 3, kind: input, shape index: {}]   ;;  %s5670_s4 = inlined_call_operand.vmem [shape: f32[9,4,4], index: 4, kind: input, shape index: {}]   ;;  %s5671_s5 = inlined_call_operand.vmem [shape: f32[9,4,4], index: 5, kind: input, shape index: {}]   ;;  %s5672_s6 = inlined_call_operand.vmem [shape: f32[4,1], index: 6, kind: input, shape index: {}]   ;;  %s5673_s7 = inlined_call_operand.vmem [shape: f32[4,1], index: 7, kind: input, shape index: {}]   ;;  %s5674_s8 = inlined_call_operand.vmem [shape: f32[4,1], index: 8, kind: input, shape index: {}]   ;;  %s5675_s9 = inlined_call_operand.vmem [shape: f32[1,361], index: 9, kind: input, shape index: {}]   ;;  %s5676_s10 = inlined_call_operand.hbm [shape: f32[2,4,361], index: 10, kind: output, shape index: {}]  }
   0x1   :  { %17 = vsyncpa [#allocation5 + $0x1], 0  ;;  %s4913_s13 = smov 0   ;;  %s4915_s14 = smov 0  }
   0x2   :  { %s4917_s15 = smov 0   ;;  %s4919_s16 = smov 0  }
   0x3 LB: > { %s4934_s17 = sadd.s32 4294967295, %s4838_s16   ;;  %s4343_s18 = sadd.s32 4294967294, %s4838_s16   ;;  %s4838_s16 = sphi %s4919_s16, %s5705_s16   ;;  %s4834_s15 = sphi %s4917_s15, %s5704_s15   ;;  %s4830_s14 = sphi %s4915_s14, %s5703_s14   ;;  %s4826_s13 = sphi %s4913_s13, %s5702_s13  }
   0x4   : > { %s4938_s19 = sadd.s32 1, %s4838_s16   ;;  %s250_s20 = sadd.s32 1, %s4834_s15 }
   0x5   : > { %s247_s21 = ssub.s32 %s4838_s16, %s4938_s19  ;;  %p260_p0 = scmp.ne.s32.totalorder %s4834_s15, %s4830_s14 }
   0x6   : > { %p248_p1 = scmp.eq.s32.totalorder %s247_s21, 0  ;;  %p261_p2 = scmp.eq.s32.totalorder %s4934_s17, 1 }
   0x7   : > { %p266_p3 = scmp.ne.s32.totalorder %s4830_s14, %s4826_s13  ;;  %p267_p4 = scmp.eq.s32.totalorder %s4343_s18, 1 }
   0x8   : > { %s4949_s22 = scalar_select %p248_p1, %s4834_s15, %s250_s20  }
   0x9   : > { %p4951_p5 = por %p261_p2, %p260_p0  ;;  %p4955_p6 = por %p267_p4, %p266_p3 }
   0xa   : > { %p4346_p7 = scmp.ge.s32.totalorder %s4838_s16, 1  ;;  %p325_p8 = scmp.lt.s32.totalorder %s4838_s16, 3 }
   0xc   : > { %p326_p9 = pnand %p4346_p7, %p325_p8 }
   0xd   : > { %p368_p10 = scmp.lt.s32.totalorder (!%p326_p9), %s4934_s17, 1  ;;  %s4840_s30 = smov (!%p326_p9), 127  }
   0xe   : > { %329 = sbr.rel (%p326_p9) target bundleno = 1371 (0x55b), region = 60  ;;  %s4841_s11 = smov (!%p326_p9), 125  }
   0xf   : > { %s5689_s12 = smov (!%p326_p9), 126   ;;  %s5679_s18 = smov (!%p326_p9), 108  }
  0x10   : > { %s5687_s20 = smov (!%p326_p9), 109   ;;  %s5677_s21 = smov (!%p326_p9), 107  }
  0x11   : > { %s5681_s27 = smov (!%p326_p9), 90   ;;  %s5685_s28 = smov (!%p326_p9), 89  }
  0x13   : > { %s4963_s25 = scalar_select %p368_p10, %s4934_s17, 1  ;;  %v379_v11 = vld [vmem:[%s5668_s2] sm:$0xf]  ;;  %vm400_vm0 = vcmask 64512   ;;  %vm394_vm1 = vcmask 1039360   ;;  %vm615_vm2 = vcmask 1022976  }
  0x14   : > { %v4351_v20 = vld [vmem:[%s5668_s2 + $0x4] sm:$0xf]  ;;  %vm535_vm3 = vcmask 1031168   ;;  %v4358_v32 = vld [vmem:[%s5668_s2 + $0x8] sm:$0xf]  ;;  %vm695_vm4 = vcmask 891904  }
  0x15   : > { %s4604_s26 = sshll.u32 %s4963_s25, 5  ;;  %vm775_vm5 = vcmask 883712   ;;  %vm855_vm6 = vcmask 875520   ;;  %v4362_v42 = vld [vmem:[%s5668_s2 + $0xc] sm:$0xf]  ;;  %vm935_vm7 = vcmask 867328  }
  0x16   : > { %s377_s29 = scalar_lea.vmem %s5667_s1, %s4604_s26  ;;  %s4846_s26 = smov 106   ;;  %v4366_v53 = vld [vmem:[%s5668_s2 + $0x10] sm:$0xf]  ;;  %v4370_v54 = vld [vmem:[%s5668_s2 + $0x14] sm:$0xf]  ;;  %vm1025_vm8 = vcmask 736256  }
  0x17   : > { %v4969_v0 = vld [vmem:[%s377_s29 + $0x8] sm:$0xff]  ;;  %v4971_v1 = vld [vmem:[%s377_s29 + $0x10] sm:$0xff]  ;;  %v380_v3 = vld [vmem:[%s377_s29] sm:$0xff]  ;;  %vm1108_vm9 = vcmask 728064   ;;  %vm1191_vm10 = vcmask 719872   ;;  %vm1274_vm11 = vcmask 711680  }
  0x18   : > { %v4664_v2 = vpack.i.bf16 %v4969_v0, %v4971_v1  ;;  %388 = vrot.lane.b32.xlu1 %v380_v3, %s4840_s30  ;;  %482 = vmatpush.msra.mxu3 %v380_v3  ;;  %v4674_v4 = vpack.i.bf16 %v4971_v1, %v4969_v0  ;;  %v4669_v5 = vpack.i.bf16 %v4969_v0, %v380_v3  ;;  %v1012_v6 = vld [vmem:[%s377_s29 + $0x18] sm:$0xff]  ;;  %s4850_s29 = smov 87   ;;  %vm1357_vm12 = vcmask 580608  }
  0x19   : > { %v4724_v7 = vpack.i.bf16 %v1012_v6, %v4971_v1  ;;  %v4709_v8 = vpack.i.bf16 %v380_v3, %v4969_v0  ;;  %v4734_v9 = vpack.i.bf16 %v380_v3, %v1012_v6  ;;  %v4769_v10 = vpack.i.bf16 %v1012_v6, %v380_v3  ;;  %4355 = vmatmul.msk.f32.vlgmr.msra.gmra.mxu3 %vm400_vm0, %v379_v11  ;;  %v4374_v63 = vld [vmem:[%s5668_s2 + $0x18] sm:$0xf] }
  0x1a   : > { %4665 = vrot.lane.b32.xlu0 %v4664_v2, %s4840_s30  ;;  %4675 = vrot.lane.b32.xlu2 %v4674_v4, %s4841_s11  ;;  %vm1440_vm13 = vcmask 572416   ;;  %vm1523_vm14 = vcmask 564224   ;;  %vm1606_vm15 = vcmask 556032  }
  0x20   : > { %533 = vrot.lane.b32.xlu1 %v4971_v1, %s5689_s12 }
  0x22   : > { %4670 = vrot.lane.b32.xlu0 %v4669_v5, %s5689_s12  ;;  %609 = vrot.lane.b32.xlu2 %v380_v3, %s4841_s11  ;;  %s5683_s11 = smov 88  }
  0x28   : > { %4685 = vrot.lane.b32.xlu1 %v4669_v5, %s5679_s18 }
  0x2a   : > { %4680 = vrot.lane.b32.xlu0 %v4664_v2, %s5687_s20  ;;  %4690 = vrot.lane.b32.xlu2 %v4669_v5, %s5677_s21 }
  0x30   : > { %853 = vrot.lane.b32.xlu1 %v4971_v1, %s5677_s21  ;;  %s4852_s21 = smov 70  }
  0x32   : > { %689 = vrot.lane.b32.xlu0 %v380_v3, %s5687_s20  ;;  %4695 = vrot.lane.b32.xlu2 %v4674_v4, %s4846_s26 }
  0x38   : > { %929 = vrot.lane.b32.xlu1 %v380_v3, %s4846_s26  ;;  %s4851_s26 = smov 71  }
  0x3a   : > { %773 = vrot.lane.b32.xlu0 %v4971_v1, %s5679_s18  ;;  %4700 = vrot.lane.b32.xlu2 %v4724_v7, %s5681_s27  ;;  %s4853_s18 = smov 69  }
  0x40   : > { %4710 = vrot.lane.b32.xlu1 %v4709_v8, %s5681_s27  ;;  %s4854_s27 = smov 68  }
  0x42   : > { %4705 = vrot.lane.b32.xlu0 %v4669_v5, %s5685_s28  ;;  %4715 = vrot.lane.b32.xlu2 %v4669_v5, %s5683_s11 }
  0x48   : > { %4725 = vrot.lane.b32.xlu1 %v4724_v7, %s5685_s28 }
  0x4a   : > { %4720 = vrot.lane.b32.xlu0 %v4724_v7, %s5683_s11  ;;  %4730 = vrot.lane.b32.xlu2 %v4674_v4, %s4850_s29  ;;  %s5696_s11 = smov 107  }
  0x50   : > { %4740 = vrot.lane.b32.xlu1 %v4724_v7, %s4851_s26 }
  0x52   : > { %4735 = vrot.lane.b32.xlu0 %v4734_v9, %s4850_s29  ;;  %4745 = vrot.lane.b32.xlu2 %v4669_v5, %s4852_s21  ;;  %s5697_s29 = smov 90  }
  0x58   : > { %4755 = vrot.lane.b32.xlu1 %v4669_v5, %s4853_s18 }
  0x5a   : > { %4750 = vrot.lane.b32.xlu0 %v4709_v8, %s4851_s26  ;;  %1519 = vrot.lane.b32.xlu2 %v4971_v1, %s4853_s18  ;;  %s4857_s26 = smov 20  }
  0x60   : > { %4765 = vrot.lane.b32.xlu1 %v4674_v4, %s4854_s27 }
  0x62   : > { %4760 = vrot.lane.b32.xlu0 %v4724_v7, %s4852_s21  ;;  %4770 = vrot.lane.b32.xlu2 %v4769_v10, %s4854_s27  ;;  %v4378_v10 = vld [vmem:[%s5668_s2 + $0x1c] sm:$0xf]  ;;  %s4603_s21 = sshll.u32 %s4963_s25, 4  ;;  %s5695_s25 = smov 108  }
  0x63   : > { %s5182_s28 = scalar_lea.vmem %s5666_s0, %s4603_s21  ;;  %s5699_s21 = smov 88  }
  0x6a   : > { %1521 = vrot.lane.b32.xlu0 %v1012_v6, %s4853_s18  ;;  %s5698_s18 = smov 89  }
  0x74   : > { %v4676_v12 = vpop.permute.xlu2 %4675 }
  0x75   : > { %v4677_v19 = vunpack.i.l.bf16 %v4676_v12  ;;  %v4678_v26 = vunpack.i.h.bf16 %v4676_v12 }
  0x77   : > { %v617_v33 = vsel %vm615_vm2, %v4677_v19, %v4678_v26 }
  0x7c   : > { %v610_v13 = vpop.permute.xlu2 %609 }
  0x7d   : > { %v616_v23 = vsel %vm615_vm2, %v610_v13, %v4677_v19  ;;  %vm1700_vm2 = vcmask 138244  }
  0x84   : > { %v5004_v15 = vpop.permute.xlu2 %4690 }
  0x85   : > { %v4693_v38 = vunpack.i.h.bf16 %v5004_v15  ;;  %v4692_v39 = vunpack.i.l.bf16 %v5004_v15 }
  0x87   : > { %v856_v46 = vsel %vm855_vm6, %v4692_v39, %v4693_v38  ;;  %v4390_v39 = vld [vmem:[%s5668_s2 + $0x28] sm:$0xf] }
  0x8a   : > { %v389_v14 = vpop.permute.xlu1 %388 }
  0x8c   : > { %v4666_v16 = vpop.permute.xlu0 %4665  ;;  %v4696_v29 = vpop.permute.xlu2 %4695 }
  0x8d   : > { %v4668_v17 = vunpack.i.h.bf16 %v4666_v16  ;;  %v4667_v18 = vunpack.i.l.bf16 %v4666_v16  ;;  %v4698_v50 = vunpack.i.h.bf16 %v4696_v29  ;;  %v4697_v51 = vunpack.i.l.bf16 %v4696_v29 }
  0x8f   : > { %459 = vmatpush.msra.mxu2 %v4667_v18  ;;  %v395_v21 = vsel %vm394_vm1, %v389_v14, %v4668_v17  ;;  %v396_v22 = vsel %vm394_vm1, %v4668_v17, %v4667_v18  ;;  %v937_v55 = vsel %vm935_vm7, %v4697_v51, %v4698_v50 }
  0x90   : > { %419 = vmatpush.msra.mxu0 %v395_v21  ;;  %439 = vmatpush.msra.mxu1 %v396_v22 }
  0x91   : > { %4352 = vmatmul.msk.f32.vlgmr.msra.gmra.mxu0 %vm400_vm0, %v4351_v20  ;;  %4353 = vmatmul.msk.f32.vlgmr.msra.gmra.mxu1 %vm400_vm0, %v4351_v20 }
  0x92   : > { %4354 = vmatmul.msk.f32.vlgmr.msra.gmra.mxu2 %vm400_vm0, %v4351_v20  ;;  %502 = vmatpush.msrb.mxu0 %v4969_v0  ;;  %v534_v24 = vpop.permute.xlu1 %533 }
  0x93   : > { %522 = vmatpush.msrb.mxu1 %v4971_v1 }
  0x94   : > { %v4671_v25 = vpop.permute.xlu0 %4670  ;;  %599 = vmatpush.msra.mxu0 %v534_v24  ;;  %v4701_v45 = vpop.permute.xlu2 %4700 }
  0x95   : > { %639 = vmatpush.msra.mxu1 %v616_v23  ;;  %v4673_v27 = vunpack.i.h.bf16 %v4671_v25  ;;  %v4672_v28 = vunpack.i.l.bf16 %v4671_v25  ;;  %v4703_v60 = vunpack.i.h.bf16 %v4701_v45  ;;  %v4702_v61 = vunpack.i.l.bf16 %v4701_v45  ;;  %v4382_v25 = vld [vmem:[%s5668_s2 + $0x20] sm:$0xf] }
  0x96   : > { %v1679_v45 = vld [vmem:[%s5672_s6] sm:$0xf] }
  0x97   : > { %v536_v30 = vsel %vm535_vm3, %v4672_v28, %v4673_v27  ;;  %v537_v31 = vsel %vm535_vm3, %v4673_v27, %v534_v24  ;;  %v1028_v0 = vsel %vm1025_vm8, %v4702_v61, %v4703_v60  ;;  %v4386_v27 = vld [vmem:[%s5668_s2 + $0x24] sm:$0xf] }
  0x98   : > { %559 = vmatpush.msrb.mxu2 %v536_v30  ;;  %579 = vmatpush.msrb.mxu3 %v537_v31 }
  0x99   : > { %4356 = vmatmul.msk.f32.vlgmr.msrb.gmra.mxu0 %vm400_vm0, %v379_v11  ;;  %4357 = vmatmul.msk.f32.vlgmr.msrb.gmra.mxu1 %vm400_vm0, %v379_v11 }
  0x9a   : > { %4359 = vmatmul.msk.f32.vlgmr.msrb.gmra.mxu2 %vm400_vm0, %v4358_v32  ;;  %4360 = vmatmul.msk.f32.vlgmr.msrb.gmra.mxu3 %vm400_vm0, %v4358_v32  ;;  %v4686_v34 = vpop.permute.xlu1 %4685 }
  0x9b   : > { %679 = vmatpush.msra.mxu3 %v4678_v26  ;;  %659 = vmatpush.msra.mxu2 %v617_v33  ;;  %v4688_v35 = vunpack.i.h.bf16 %v4686_v34  ;;  %v4687_v36 = vunpack.i.l.bf16 %v4686_v34 }
  0x9c   : > { %v4681_v37 = vpop.permute.xlu0 %4680  ;;  %v5049_v56 = vpop.permute.xlu2 %4715 }
  0x9d   : > { %v4683_v40 = vunpack.i.h.bf16 %v4681_v37  ;;  %v4682_v41 = vunpack.i.l.bf16 %v4681_v37  ;;  %v776_v43 = vsel %vm775_vm5, %v4687_v36, %v4688_v35  ;;  %v4718_v6 = vunpack.i.h.bf16 %v5049_v56 }
  0x9e   : > { %799 = vmatpush.msrb.mxu3 %v776_v43  ;;  %v4717_v7 = vunpack.i.l.bf16 %v5049_v56 }
  0x9f   : > { %759 = vmatpush.msrb.mxu2 %v4682_v41  ;;  %v697_v44 = vsel %vm695_vm4, %v4683_v40, %v4682_v41 }
  0xa0   : > { %739 = vmatpush.msrb.mxu1 %v697_v44  ;;  %v1192_v14 = vsel %vm1191_vm10, %v4717_v7, %v4718_v6 }
  0xa1   : > { %4361 = vmatmul.msk.f32.vlgmr.msra.gmra.mxu0 %vm400_vm0, %v4358_v32  ;;  %4363 = vmatmul.msk.f32.vlgmr.msra.gmra.mxu1 %vm400_vm0, %v4362_v42 }
  0xa2   : > { %4364 = vmatmul.msk.f32.vlgmr.msra.gmra.mxu2 %vm400_vm0, %v4362_v42  ;;  %4365 = vmatmul.msk.f32.vlgmr.msra.gmra.mxu3 %vm400_vm0, %v4362_v42  ;;  %v854_v47 = vpop.permute.xlu1 %853 }
  0xa3   : > { %879 = vmatpush.msra.mxu2 %v856_v46  ;;  %v857_v49 = vsel %vm855_vm6, %v4693_v38, %v854_v47 }
  0xa4   : > { %v690_v48 = vpop.permute.xlu0 %689  ;;  %899 = vmatpush.msra.mxu3 %v857_v49  ;;  %v4731_v2 = vpop.permute.xlu2 %4730 }
  0xa5   : > { %v696_v52 = vsel %vm695_vm4, %v690_v48, %v4683_v40  ;;  %v4733_v19 = vunpack.i.h.bf16 %v4731_v2  ;;  %v4732_v20 = vunpack.i.l.bf16 %v4731_v2 }
  0xa6   : > { %719 = vmatpush.msrb.mxu0 %v696_v52 }
  0xa7   : > { %v1276_v30 = vsel %vm1274_vm11, %v4732_v20, %v4733_v19 }
  0xa9   : > { %4367 = vmatmul.msk.f32.vlgmr.msrb.gmra.mxu0 %vm400_vm0, %v4366_v53  ;;  %4368 = vmatmul.msk.f32.vlgmr.msrb.gmra.mxu1 %vm400_vm0, %v4366_v53 }
  0xaa   : > { %4369 = vmatmul.msk.f32.vlgmr.msrb.gmra.mxu2 %vm400_vm0, %v4366_v53  ;;  %4371 = vmatmul.msk.f32.vlgmr.msrb.gmra.mxu3 %vm400_vm0, %v4370_v54  ;;  %v930_v57 = vpop.permute.xlu1 %929  ;;  %v4394_v53 = vld [vmem:[%s5668_s2 + $0x2c] sm:$0xf] }
  0xab   : > { %999 = vmatpush.msrb.mxu3 %v4698_v50  ;;  %979 = vmatpush.msrb.mxu2 %v937_v55  ;;  %v936_v59 = vsel %vm935_vm7, %v930_v57, %v4697_v51  ;;  %v4855_v50 = vmov 0  }
  0xac   : > { %v774_v58 = vpop.permute.xlu0 %773  ;;  %v5075_v23 = vpop.permute.xlu2 %4745  ;;  %4774 = vset.pattern.permute.xlu1 %v4855_v50  ;;  %4775 = vset.pattern.permute.xlu0 %v4855_v50 }
  0xad   : > { %v777_v62 = vsel %vm775_vm5, %v4688_v35, %v774_v58  ;;  %839 = vmatpush.msra.mxu1 %v774_v58  ;;  %v4748_v35 = vunpack.i.h.bf16 %v5075_v23  ;;  %v4747_v36 = vunpack.i.l.bf16 %v5075_v23  ;;  %1682 = vperm.xlu1 %4774, %v1679_v45  }
  0xae   : > { %819 = vmatpush.msra.mxu0 %v777_v62 }
  0xaf   : > { %959 = vmatpush.msrb.mxu1 %v936_v59  ;;  %v1441_v44 = vsel %vm1440_vm13, %v4747_v36, %v4748_v35 }
  0xb0   : > { %919 = vmatpush.msrb.mxu0 %v854_v47 }
  0xb1   : > { %4372 = vmatmul.msk.f32.vlgmr.msra.gmra.mxu0 %vm400_vm0, %v4370_v54  ;;  %4373 = vmatmul.msk.f32.vlgmr.msra.gmra.mxu1 %vm400_vm0, %v4370_v54 }
  0xb2   : > { %4375 = vmatmul.msk.f32.vlgmr.msra.gmra.mxu2 %vm400_vm0, %v4374_v63  ;;  %4376 = vmatmul.msk.f32.vlgmr.msra.gmra.mxu3 %vm400_vm0, %v4374_v63  ;;  %v4711_v1 = vpop.permute.xlu1 %4710 }
  0xb3   : > { %1090 = vmatpush.msra.mxu2 %v1028_v0  ;;  %v4713_v3 = vunpack.i.h.bf16 %v4711_v1  ;;  %v4712_v4 = vunpack.i.l.bf16 %v4711_v1 }
  0xb4   : > { %v4706_v5 = vpop.permute.xlu0 %4705  ;;  %v5099_v42 = vpop.permute.xlu2 %1519 }
  0xb5   : > { %v4708_v8 = vunpack.i.h.bf16 %v4706_v5  ;;  %v4707_v9 = vunpack.i.l.bf16 %v4706_v5  ;;  %v1026_v11 = vsel %vm1025_vm8, %v4713_v3, %v4712_v4  ;;  %v1027_v12 = vsel %vm1025_vm8, %v4712_v4, %v4702_v61  ;;  %v4398_v3 = vld [vmem:[%s5668_s2 + $0x30] sm:$0xf]  ;;  %v4402_v5 = vld [vmem:[%s5668_s2 + $0x34] sm:$0xf] }
  0xb6   : > { %1050 = vmatpush.msra.mxu0 %v1026_v11  ;;  %1070 = vmatpush.msra.mxu1 %v1027_v12  ;;  %v4406_v12 = vld [vmem:[%s5668_s2 + $0x38] sm:$0xf] }
  0xb7   : > { %v1109_v13 = vsel %vm1108_vm9, %v4707_v9, %v4708_v8 }
  0xb8   : > { %1133 = vmatpush.msra.mxu3 %v1109_v13  ;;  %v4410_v13 = vld [vmem:[%s5668_s2 + $0x3c] sm:$0xf] }
  0xb9   : > { %4377 = vmatmul.msk.f32.vlgmr.msrb.gmra.mxu0 %vm400_vm0, %v4374_v63  ;;  %4379 = vmatmul.msk.f32.vlgmr.msrb.gmra.mxu1 %vm400_vm0, %v4378_v10 }
  0xba   : > { %4380 = vmatmul.msk.f32.vlgmr.msrb.gmra.mxu2 %vm400_vm0, %v4378_v10  ;;  %4381 = vmatmul.msk.f32.vlgmr.msrb.gmra.mxu3 %vm400_vm0, %v4378_v10  ;;  %v4726_v15 = vpop.permute.xlu1 %4725 }
  0xbb   : > { %1216 = vmatpush.msrb.mxu2 %v1192_v14  ;;  %v4728_v16 = vunpack.i.h.bf16 %v4726_v15  ;;  %v4727_v17 = vunpack.i.l.bf16 %v4726_v15 }
  0xbc   : > { %v4721_v18 = vpop.permute.xlu0 %4720  ;;  %v4771_v58 = vpop.permute.xlu2 %4770 }
  0xbd   : > { %v4723_v21 = vunpack.i.h.bf16 %v4721_v18  ;;  %v4722_v22 = vunpack.i.l.bf16 %v4721_v18  ;;  %v1110_v24 = vsel %vm1108_vm9, %v4708_v8, %v4727_v17  ;;  %v1111_v26 = vsel %vm1108_vm9, %v4727_v17, %v4728_v16  ;;  %v484_v16 = vpop.f32.mrf.mxu3 }
  0xbe   : > { %1153 = vmatpush.msrb.mxu0 %v1110_v24  ;;  %1173 = vmatpush.msrb.mxu1 %v1111_v26  ;;  %v4772_v61 = vunpack.i.l.bf16 %v4771_v58  ;;  %v4773_v2 = vunpack.i.h.bf16 %v4771_v58 }
  0xbf   : > { %v1193_v28 = vsel %vm1191_vm10, %v4718_v6, %v4722_v22  ;;  %v1194_v29 = vsel %vm1191_vm10, %v4722_v22, %v4723_v21 }
  0xc0   : > { %1236 = vmatpush.msrb.mxu3 %v1193_v28 }
  0xc1   : > { %4383 = vmatmul.msk.f32.vlgmr.msra.gmra.mxu0 %vm400_vm0, %v4382_v25  ;;  %4384 = vmatmul.msk.f32.vlgmr.msra.gmra.mxu1 %vm400_vm0, %v4382_v25 }
  0xc2   : > { %4385 = vmatmul.msk.f32.vlgmr.msra.gmra.mxu2 %vm400_vm0, %v4382_v25  ;;  %4387 = vmatmul.msk.f32.vlgmr.msra.gmra.mxu3 %vm400_vm0, %v4386_v27  ;;  %v4741_v31 = vpop.permute.xlu1 %4740 }
  0xc3   : > { %1256 = vmatpush.msra.mxu0 %v1194_v29  ;;  %1319 = vmatpush.msra.mxu2 %v1276_v30  ;;  %v4743_v33 = vunpack.i.h.bf16 %v4741_v31  ;;  %v4742_v34 = vunpack.i.l.bf16 %v4741_v31 }
  0xc4   : > { %v4736_v32 = vpop.permute.xlu0 %4735 }
  0xc5   : > { %v4738_v37 = vunpack.i.h.bf16 %v4736_v32  ;;  %v4737_v38 = vunpack.i.l.bf16 %v4736_v32  ;;  %v1360_v43 = vsel %vm1357_vm12, %v4742_v34, %v4743_v33 }
  0xc7   : > { %v1275_v40 = vsel %vm1274_vm11, %v4738_v37, %v4732_v20  ;;  %v1277_v41 = vsel %vm1274_vm11, %v4733_v19, %v4737_v38  ;;  %vm1718_vm11 = vcmask 1043616  }
  0xc8   : > { %1299 = vmatpush.msra.mxu1 %v1275_v40  ;;  %1339 = vmatpush.msra.mxu3 %v1277_v41 }
  0xc9   : > { %4388 = vmatmul.msk.f32.vlgmr.msrb.gmra.mxu0 %vm400_vm0, %v4386_v27  ;;  %4389 = vmatmul.msk.f32.vlgmr.msrb.gmra.mxu1 %vm400_vm0, %v4386_v27 }
  0xca   : > { %4391 = vmatmul.msk.f32.vlgmr.msrb.gmra.mxu2 %vm400_vm0, %v4390_v39  ;;  %4392 = vmatmul.msk.f32.vlgmr.msrb.gmra.mxu3 %vm400_vm0, %v4390_v39  ;;  %v4756_v46 = vpop.permute.xlu1 %4755 }
  0xcb   : > { %1422 = vmatpush.msrb.mxu2 %v1360_v43  ;;  %1465 = vmatpush.msrb.mxu3 %v1441_v44  ;;  %v4758_v48 = vunpack.i.h.bf16 %v4756_v46  ;;  %v4757_v49 = vunpack.i.l.bf16 %v4756_v46 }
  0xcc   : > { %v4751_v47 = vpop.permute.xlu0 %4750 }
  0xcd   : > { %v4753_v51 = vunpack.i.h.bf16 %v4751_v47  ;;  %v4752_v52 = vunpack.i.l.bf16 %v4751_v47  ;;  %v1525_v56 = vsel %vm1523_vm14, %v4758_v48, %v5099_v42  ;;  %v1524_v57 = vsel %vm1523_vm14, %v4757_v49, %v4758_v48 }
  0xcf   : > { %v1358_v54 = vsel %vm1357_vm12, %v4753_v51, %v4752_v52  ;;  %v1359_v55 = vsel %vm1357_vm12, %v4752_v52, %v4742_v34  ;;  %vm1719_vm12 = vcmask 1047556  }
  0xd0   : > { %1382 = vmatpush.msrb.mxu0 %v1358_v54  ;;  %1402 = vmatpush.msrb.mxu1 %v1359_v55 }
  0xd1   : > { %4393 = vmatmul.msk.f32.vlgmr.msra.gmra.mxu0 %vm400_vm0, %v4390_v39  ;;  %4395 = vmatmul.msk.f32.vlgmr.msra.gmra.mxu1 %vm400_vm0, %v4394_v53 }
  0xd2   : > { %4396 = vmatmul.msk.f32.vlgmr.msra.gmra.mxu2 %vm400_vm0, %v4394_v53  ;;  %4397 = vmatmul.msk.f32.vlgmr.msra.gmra.mxu3 %vm400_vm0, %v4394_v53  ;;  %v4766_v59 = vpop.permute.xlu1 %4765 }
  0xd3   : > { %1568 = vmatpush.msra.mxu3 %v1525_v56  ;;  %1548 = vmatpush.msra.mxu2 %v1524_v57  ;;  %v4768_v62 = vunpack.i.h.bf16 %v4766_v59  ;;  %v4767_v63 = vunpack.i.l.bf16 %v4766_v59 }
  0xd4   : > { %v4761_v60 = vpop.permute.xlu0 %4760 }
  0xd5   : > { %v4763_v0 = vunpack.i.h.bf16 %v4761_v60  ;;  %v4762_v1 = vunpack.i.l.bf16 %v4761_v60  ;;  %v1607_v7 = vsel %vm1606_vm15, %v4772_v61, %v4767_v63  ;;  %v1608_v8 = vsel %vm1606_vm15, %v4767_v63, %v4768_v62 }
  0xd6   : > { %v1609_v9 = vsel %vm1606_vm15, %v4768_v62, %v4773_v2  ;;  %vm1722_vm15 = vcmask 1018880  }
  0xd7   : > { %v1442_v4 = vsel %vm1440_vm13, %v4748_v35, %v4762_v1  ;;  %v1443_v6 = vsel %vm1440_vm13, %v4762_v1, %v4763_v0  ;;  %vm1713_vm13 = vcmask 162816  }
  0xd8   : > { %1485 = vmatpush.msra.mxu0 %v1442_v4  ;;  %1505 = vmatpush.msra.mxu1 %v1443_v6 }
  0xd9   : > { %4399 = vmatmul.msk.f32.vlgmr.msrb.gmra.mxu0 %vm400_vm0, %v4398_v3  ;;  %4400 = vmatmul.msk.f32.vlgmr.msrb.gmra.mxu1 %vm400_vm0, %v4398_v3 }
  0xda   : > { %4401 = vmatmul.msk.f32.vlgmr.msrb.gmra.mxu2 %vm400_vm0, %v4398_v3  ;;  %4403 = vmatmul.msk.f32.vlgmr.msrb.gmra.mxu3 %vm400_vm0, %v4402_v5 }
  0xdb   : > { %1631 = vmatpush.msrb.mxu1 %v1607_v7  ;;  %1651 = vmatpush.msrb.mxu2 %v1608_v8  ;;  %v4856_v7 = vmov 0.0  }
  0xdc   : > { %v1522_v10 = vpop.permute.xlu0 %1521  ;;  %1671 = vmatpush.msrb.mxu3 %v1609_v9  ;;  %1698 = vst [vmem:[#allocation2] sm:$0xff] %v4856_v7 }
  0xdd   : > { %v1526_v11 = vsel %vm1523_vm14, %v5099_v42, %v1522_v10  ;;  %3396 = vst [vmem:[#allocation3] sm:$0xff] %v4856_v7  ;;  %vm5168_vm14 = vmor %vm1719_vm12, %vm1718_vm11 }
  0xde   : > { %1588 = vmatpush.msrb.mxu0 %v1526_v11 }
  0xe1   : > { %4404 = vmatmul.msk.f32.vlgmr.msra.gmra.mxu0 %vm400_vm0, %v4402_v5  ;;  %4405 = vmatmul.msk.f32.vlgmr.msra.gmra.mxu1 %vm400_vm0, %v4402_v5 }
  0xe2   : > { %4407 = vmatmul.msk.f32.vlgmr.msra.gmra.mxu2 %vm400_vm0, %v4406_v12  ;;  %4408 = vmatmul.msk.f32.vlgmr.msra.gmra.mxu3 %vm400_vm0, %v4406_v12 }
  0xe9   : > { %4409 = vmatmul.msk.f32.vlgmr.msrb.gmra.mxu0 %vm400_vm0, %v4406_v12  ;;  %4411 = vmatmul.msk.f32.vlgmr.msrb.gmra.mxu1 %vm400_vm0, %v4410_v13 }
  0xea   : > { %4412 = vmatmul.msk.f32.vlgmr.msrb.gmra.mxu2 %vm400_vm0, %v4410_v13  ;;  %4413 = vmatmul.msk.f32.vlgmr.msrb.gmra.mxu3 %vm400_vm0, %v4410_v13  ;;  %vm1699_vm0 = vcmask 1043456  }
  0xeb   : > { %vm1701_vm7 = vmor %vm1700_vm2, %vm1699_vm0  ;;  %vm1738_vm2 = vcmask 31744  }
  0xec   : > { %1702 = vst.msk [vmem:[#allocation2 + $0x8] sm:$0xff] %vm1701_vm7, %v4856_v7 }
  0xed   : > { %3397 = vst.msk [vmem:[#allocation3 + $0x8] sm:$0xff] %vm1701_vm7, %v4856_v7 }
 0x10e   : > { %v421_v14 = vpop.f32.mrf.mxu0  ;;  %v441_v15 = vpop.f32.mrf.mxu1 }
 0x10f   : > { %v485_v44 = vadd.f32 %v484_v16, %v421_v14 }
 0x115   : > { %v461_v17 = vpop.f32.mrf.mxu2 }
 0x116   : > { %v504_v18 = vpop.f32.mrf.mxu0  ;;  %v524_v19 = vpop.f32.mrf.mxu1 }
 0x117   : > { %v525_v45 = vadd.f32 %v524_v19, %v461_v17  ;;  %v505_v47 = vadd.f32 %v504_v18, %v441_v15 }
 0x11d   : > { %v561_v20 = vpop.f32.mrf.mxu2  ;;  %v581_v21 = vpop.f32.mrf.mxu3 }
 0x11e   : > { %v601_v22 = vpop.f32.mrf.mxu0  ;;  %v641_v23 = vpop.f32.mrf.mxu1  ;;  %v604_v46 = vadd.f32 %v561_v20, %v485_v44  ;;  %v605_v50 = vadd.f32 %v581_v21, %v505_v47 }
 0x11f   : > { %v606_v51 = vadd.f32 %v601_v22, %v525_v45 }
 0x120   : > { %v684_v52 = vadd.f32 %v641_v23, %v604_v46 }
 0x125   : > { %v661_v24 = vpop.f32.mrf.mxu2  ;;  %v681_v25 = vpop.f32.mrf.mxu3 }
 0x126   : > { %v721_v26 = vpop.f32.mrf.mxu0  ;;  %v741_v27 = vpop.f32.mrf.mxu1  ;;  %v685_v55 = vadd.f32 %v661_v24, %v605_v50  ;;  %v686_v56 = vadd.f32 %v681_v25, %v606_v51 }
 0x127   : > { %v764_v57 = vadd.f32 %v721_v26, %v684_v52 }
 0x128   : > { %v765_v60 = vadd.f32 %v741_v27, %v685_v55 }
 0x12d   : > { %v761_v28 = vpop.f32.mrf.mxu2  ;;  %v801_v29 = vpop.f32.mrf.mxu3 }
 0x12e   : > { %v821_v30 = vpop.f32.mrf.mxu0  ;;  %v841_v31 = vpop.f32.mrf.mxu1  ;;  %v766_v58 = vadd.f32 %v761_v28, %v686_v56  ;;  %v844_v59 = vadd.f32 %v801_v29, %v764_v57 }
 0x12f   : > { %v845_v0 = vadd.f32 %v821_v30, %v765_v60 }
 0x130   : > { %v846_v1 = vadd.f32 %v841_v31, %v766_v58 }
 0x135   : > { %v881_v32 = vpop.f32.mrf.mxu2  ;;  %v901_v33 = vpop.f32.mrf.mxu3 }
 0x136   : > { %v921_v34 = vpop.f32.mrf.mxu0  ;;  %v961_v35 = vpop.f32.mrf.mxu1  ;;  %v924_v61 = vadd.f32 %v881_v32, %v844_v59  ;;  %v925_v4 = vadd.f32 %v901_v33, %v845_v0 }
 0x137   : > { %v926_v5 = vadd.f32 %v921_v34, %v846_v1 }
 0x138   : > { %v1004_v6 = vadd.f32 %v961_v35, %v924_v61 }
 0x13d   : > { %v981_v36 = vpop.f32.mrf.mxu2  ;;  %v1001_v37 = vpop.f32.mrf.mxu3 }
 0x13e   : > { %v1052_v38 = vpop.f32.mrf.mxu0  ;;  %v1072_v39 = vpop.f32.mrf.mxu1  ;;  %v1005_v8 = vadd.f32 %v981_v36, %v925_v4  ;;  %v1006_v9 = vadd.f32 %v1001_v37, %v926_v5 }
 0x13f   : > { %v1095_v10 = vadd.f32 %v1052_v38, %v1004_v6 }
 0x140   : > { %v1096_v15 = vadd.f32 %v1072_v39, %v1005_v8  ;;  %v1726_v8 = vld [vmem:[%s5182_s28 + $0x8] sm:$0xf] }
 0x145   : > { %v1092_v40 = vpop.f32.mrf.mxu2  ;;  %v1135_v41 = vpop.f32.mrf.mxu3 }
 0x146   : > { %v1155_v42 = vpop.f32.mrf.mxu0  ;;  %v1175_v43 = vpop.f32.mrf.mxu1  ;;  %v1097_v11 = vadd.f32 %v1092_v40, %v1006_v9  ;;  %v1178_v12 = vadd.f32 %v1135_v41, %v1095_v10  ;;  %v5153_v41 = vld [vmem:[%s5675_s9] sm:$0x7] }
 0x147   : > { %v1179_v19 = vadd.f32 %v1155_v42, %v1096_v15  ;;  %v1683_v40 = vpop.permute.xlu1 %1682  ;;  %v1690_v45 = vperm.slane %v5153_v41, 1  ;;  %v1691_v47 = vperm.slane %v5153_v41, 2 }
 0x148   : > { %v1180_v20 = vadd.f32 %v1175_v43, %v1097_v11 }
 0x14d   : > { %v1218_v48 = vpop.f32.mrf.mxu2  ;;  %v1238_v49 = vpop.f32.mrf.mxu3 }
 0x14e   : > { %v1258_v53 = vpop.f32.mrf.mxu0  ;;  %v1301_v54 = vpop.f32.mrf.mxu1  ;;  %v1261_v16 = vadd.f32 %v1218_v48, %v1178_v12  ;;  %v1262_v21 = vadd.f32 %v1238_v49, %v1179_v19  ;;  %v1689_v48 = vperm.slane %v5153_v41, 0  ;;  %v1888_v12 = vld [vmem:[%s5182_s28 + $0x8] sm:$0xf] }
 0x14f   : > { %v1263_v22 = vadd.f32 %v1258_v53, %v1180_v20  ;;  %v2072_v20 = vld [vmem:[%s5182_s28 + $0x8] sm:$0xf] }
 0x150   : > { %v1344_v23 = vadd.f32 %v1301_v54, %v1261_v16 }
 0x155   : > { %v1321_v62 = vpop.f32.mrf.mxu2  ;;  %v1341_v63 = vpop.f32.mrf.mxu3 }
 0x156   : > { %v1384_v2 = vpop.f32.mrf.mxu0  ;;  %v1404_v3 = vpop.f32.mrf.mxu1  ;;  %v1345_v24 = vadd.f32 %v1321_v62, %v1262_v21  ;;  %v1346_v25 = vadd.f32 %v1341_v63, %v1263_v22  ;;  %v5185_v62 = vld [vmem:[%s5182_s28] sm:$0xff] }
 0x157   : > { %v1427_v26 = vadd.f32 %v1384_v2, %v1344_v23 }
 0x158   : > { %v1428_v31 = vadd.f32 %v1404_v3, %v1345_v24 }
 0x15d   : > { %v1424_v13 = vpop.f32.mrf.mxu2  ;;  %v1467_v14 = vpop.f32.mrf.mxu3 }
 0x15e   : > { %v1487_v17 = vpop.f32.mrf.mxu0  ;;  %v1507_v18 = vpop.f32.mrf.mxu1  ;;  %v1429_v29 = vadd.f32 %v1424_v13, %v1346_v25  ;;  %v1510_v30 = vadd.f32 %v1467_v14, %v1427_v26 }
 0x15f   : > { %v1511_v35 = vadd.f32 %v1487_v17, %v1428_v31 }
 0x160   : > { %v1512_v36 = vadd.f32 %v1507_v18, %v1429_v29 }
 0x165   : > { %v1550_v27 = vpop.f32.mrf.mxu2  ;;  %v1570_v28 = vpop.f32.mrf.mxu3 }
 0x166   : > { %v1593_v32 = vadd.f32 %v1550_v27, %v1510_v30  ;;  %v1590_v33 = vpop.f32.mrf.mxu0  ;;  %v1633_v34 = vpop.f32.mrf.mxu1  ;;  %v1594_v37 = vadd.f32 %v1570_v28, %v1511_v35  ;;  %v2256_v28 = vld [vmem:[%s5182_s28 + $0x8] sm:$0xf] }
 0x167   : > { %v1595_v38 = vadd.f32 %v1590_v33, %v1512_v36  ;;  %v2440_v36 = vld [vmem:[%s5182_s28 + $0x8] sm:$0xf] }
 0x168   : > { %v1676_v39 = vadd.f32 %v1633_v34, %v1593_v32 }
 0x16a   : > { %v1685_v49 = vadd.f32 %v1683_v40, %v1676_v39 }
 0x16c   : > { %v1695_v54 = vmul.f32 %v1689_v48, %v1685_v49 }
 0x16d   : > { %v1653_v42 = vpop.f32.mrf.mxu2  ;;  %v1673_v43 = vpop.f32.mrf.mxu3 }
 0x16e   : > { %v1677_v44 = vadd.f32 %v1653_v42, %v1594_v37  ;;  %v1678_v46 = vadd.f32 %v1673_v43, %v1595_v38 }
 0x170   : > { %v1686_v50 = vadd.f32 %v1683_v40, %v1677_v44  ;;  %v1687_v51 = vadd.f32 %v1683_v40, %v1678_v46  ;;  %v2624_v46 = vld [vmem:[%s5182_s28 + $0x8] sm:$0xf] }
 0x172   : > { %v1696_v52 = vmul.f32 %v1690_v45, %v1686_v50  ;;  %v1697_v53 = vmul.f32 %v1691_v47, %v1687_v51 }
 0x174   : > { %v1706_v55 = vrot.slane %v1696_v52, 4  ;;  %1710 = vrot.lane.b32.xlu0 %v1697_v53, %s4857_s26 }
 0x176   : > { %v1707_v56 = vsel %vm1699_vm0, %v1695_v54, %v1706_v55 }
 0x177   : > { %1708 = vrot.lane.b32.xlu2 %v1707_v56, %s4857_s26  ;;  %v2808_v56 = vld [vmem:[%s5182_s28 + $0x8] sm:$0xff] }
 0x1d1   : > { %v1709_v57 = vpop.permute.xlu2 %1708 }
 0x1d2   : > { %v1712_v59 = vrot.slane %v1709_v57, 4 }
 0x1d4   : > { %v1714_v60 = vsel %vm1713_vm13, %v1712_v59, %v1709_v57 }
 0x1d5   : > { %1721 = vst.msk [vmem:[#allocation2] sm:$0xff] %vm5168_vm14, %v1714_v60 }
 0x1dc   : > { %v5176_v61 = vld [vmem:[#allocation2] sm:$0xff] }
 0x1dd   : > { %1732 = vst [vmem:[#allocation1] ss:$2 sm:$0xff] %v5176_v61 }
 0x1e4   : > { %v1735_v63 = vld.sshfl [vmem:[#allocation1] sm:$0xff pattern:$0x75316420]  ;;  %v1736_v0 = vld.sshfl [vmem:[#allocation1 + $0x8] sm:$0xff pattern:$0x75316420] }
 0x1e5   : > { %1810 = vst [vmem:[#allocation1] ss:$2 sm:$0xff] %v5185_v62  ;;  %4414 = vmatpush.msk.msra.mxu0 %vm1699_vm0, %v1735_v63  ;;  %4416 = vmatpush.msk.msra.mxu1 %vm1699_vm0, %v1736_v0 }
 0x1e6   : > { %v1711_v1 = vpop.permute.xlu0 %1710 }
 0x1e7   : > { %v1715_v2 = vsel %vm1713_vm13, %v1712_v59, %v1711_v1  ;;  %v1727_v59 = vld [vmem:[%s5670_s4] sm:$0xf] }
 0x1e8   : > { %1723 = vst.msk [vmem:[#allocation2 + $0x8] sm:$0xf] %vm1722_vm15, %v1715_v2  ;;  %4417 = vmatmul.msk.f32.vlgmr.msra.gmra.mxu1 %vm1738_vm2, %v1727_v59  ;;  %4415 = vmatmul.msk.f32.vlgmr.msra.gmra.mxu0 %vm1738_vm2, %v1727_v59 }
 0x1ec   : > { %v1813_v3 = vld.sshfl [vmem:[#allocation1] sm:$0xff pattern:$0x75316420]  ;;  %v1814_v4 = vld.sshfl [vmem:[#allocation1 + $0x8] sm:$0xff pattern:$0x75316420] }
 0x1ed   : > { %1891 = vst [vmem:[#allocation1] ss:$2 sm:$0xff] %v5185_v62  ;;  %4420 = vmatpush.msk.msra.mxu3 %vm1699_vm0, %v1813_v3  ;;  %4422 = vmatpush.msk.msrb.mxu0 %vm1699_vm0, %v1814_v4  ;;  %v1724_v3 = vld [vmem:[%s5669_s3] sm:$0xf] }
 0x1ee   : > { %4421 = vmatmul.msk.f32.vlgmr.msra.gmra.mxu3 %vm1738_vm2, %v1724_v3 }
 0x1ef   : > { %v1729_v5 = vld [vmem:[#allocation2 + $0x8] sm:$0xf] }
 0x1f0   : > { %1734 = vst [vmem:[#allocation1 + $0x10] ss:$2 sm:$0xff] %v1729_v5  ;;  %v1980_v17 = vld [vmem:[#allocation2 + $0x8] sm:$0xf]  ;;  %4423 = vmatmul.msk.f32.vlgmr.msrb.gmra.mxu0 %vm1738_vm2, %v1724_v3 }
 0x1f1   : > { %v2164_v25 = vld [vmem:[#allocation2 + $0x8] sm:$0xf] }
 0x1f2   : > { %v2348_v33 = vld [vmem:[#allocation2 + $0x8] sm:$0xf] }
 0x1f3   : > { %v2532_v42 = vld [vmem:[#allocation2 + $0x8] sm:$0xf] }
 0x1f4   : > { %v1894_v6 = vld.sshfl [vmem:[#allocation1] sm:$0xff pattern:$0x75316420]  ;;  %v1895_v7 = vld.sshfl [vmem:[#allocation1 + $0x8] sm:$0xff pattern:$0x75316420] }
 0x1f5   : > { %1983 = vst [vmem:[#allocation1] ss:$2 sm:$0xff] %v5176_v61  ;;  %1899 = vrot.lane.b32.xlu1 %v1895_v7, %s4840_s30  ;;  %1897 = vrot.lane.b32.xlu0 %v1894_v6, %s4840_s30  ;;  %v2716_v52 = vld [vmem:[#allocation2 + $0x8] sm:$0xf] }
 0x1f6   : > { %v2904_v0 = vld [vmem:[#allocation2 + $0x8] sm:$0xff] }
 0x1f7   : > { %v1737_v9 = vld.sshfl [vmem:[#allocation1 + $0x10] sm:$0xff pattern:$0x75316420] }
 0x1f8   : > { %1812 = vst [vmem:[#allocation1 + $0x10] ss:$2 sm:$0xff] %v1726_v8  ;;  %4418 = vmatpush.msk.msra.mxu2 %vm1699_vm0, %v1737_v9 }
 0x1f9   : > { %4419 = vmatmul.msk.f32.vlgmr.msra.gmra.mxu2 %vm1738_vm2, %v1727_v59 }
 0x1fc   : > { %v1986_v10 = vld.sshfl [vmem:[#allocation1] sm:$0xff pattern:$0x75316420]  ;;  %v1987_v11 = vld.sshfl [vmem:[#allocation1 + $0x8] sm:$0xff pattern:$0x75316420] }
 0x1fd   : > { %2075 = vst [vmem:[#allocation1] ss:$2 sm:$0xff] %v5185_v62  ;;  %1989 = vrot.lane.b32.xlu1 %v1986_v10, %s4840_s30 }
 0x1ff   : > { %v1815_v13 = vld.sshfl [vmem:[#allocation1 + $0x10] sm:$0xff pattern:$0x75316420] }
 0x200   : > { %1893 = vst [vmem:[#allocation1 + $0x10] ss:$2 sm:$0xff] %v1888_v12  ;;  %4424 = vmatpush.msk.msrb.mxu1 %vm1699_vm0, %v1815_v13 }
 0x201   : > { %4425 = vmatmul.msk.f32.vlgmr.msrb.gmra.mxu1 %vm1738_vm2, %v1724_v3 }
 0x204   : > { %v2078_v14 = vld.sshfl [vmem:[#allocation1] sm:$0xff pattern:$0x75316420]  ;;  %v2079_v15 = vld.sshfl [vmem:[#allocation1 + $0x8] sm:$0xff pattern:$0x75316420] }
 0x205   : > { %2167 = vst [vmem:[#allocation1] ss:$2 sm:$0xff] %v5176_v61  ;;  %2081 = vrot.lane.b32.xlu1 %v2078_v14, %s5689_s12 }
 0x207   : > { %v1896_v16 = vld.sshfl [vmem:[#allocation1 + $0x10] sm:$0xff pattern:$0x75316420] }
 0x208   : > { %1985 = vst [vmem:[#allocation1 + $0x10] ss:$2 sm:$0xff] %v1980_v17  ;;  %1901 = vrot.lane.b32.xlu2 %v1896_v16, %s4840_s30  ;;  %v4433_v17 = vld [vmem:[%s5670_s4 + $0x4] sm:$0xf] }
 0x20c   : > { %v2170_v18 = vld.sshfl [vmem:[#allocation1] sm:$0xff pattern:$0x75316420]  ;;  %v2171_v19 = vld.sshfl [vmem:[#allocation1 + $0x8] sm:$0xff pattern:$0x75316420] }
 0x20d   : > { %2259 = vst [vmem:[#allocation1] ss:$2 sm:$0xff] %v5185_v62  ;;  %2175 = vrot.lane.b32.xlu1 %v2171_v19, %s5689_s12 }
 0x20f   : > { %v1988_v21 = vld.sshfl [vmem:[#allocation1 + $0x10] sm:$0xff pattern:$0x75316420] }
 0x210   : > { %2077 = vst [vmem:[#allocation1 + $0x10] ss:$2 sm:$0xff] %v2072_v20  ;;  %1993 = vrot.lane.b32.xlu0 %v1988_v21, %s4840_s30  ;;  %1991 = vrot.lane.b32.xlu2 %v1987_v11, %s4840_s30 }
 0x214   : > { %v2262_v22 = vld.sshfl [vmem:[#allocation1] sm:$0xff pattern:$0x75316420]  ;;  %v2263_v23 = vld.sshfl [vmem:[#allocation1 + $0x8] sm:$0xff pattern:$0x75316420] }
 0x215   : > { %2351 = vst [vmem:[#allocation1] ss:$2 sm:$0xff] %v5176_v61  ;;  %2267 = vrot.lane.b32.xlu1 %v2263_v23, %s5687_s20  ;;  %v4440_v23 = vld [vmem:[%s5669_s3 + $0x8] sm:$0xf] }
 0x217   : > { %v2080_v24 = vld.sshfl [vmem:[#allocation1 + $0x10] sm:$0xff pattern:$0x75316420] }
 0x218   : > { %2169 = vst [vmem:[#allocation1 + $0x10] ss:$2 sm:$0xff] %v2164_v25  ;;  %2083 = vrot.lane.b32.xlu2 %v2079_v15, %s5689_s12  ;;  %2173 = vrot.lane.b32.xlu0 %v2170_v18, %s5689_s12 }
 0x21c   : > { %v2355_v26 = vld.sshfl [vmem:[#allocation1 + $0x8] sm:$0xff pattern:$0x75316420]  ;;  %v2354_v27 = vld.sshfl [vmem:[#allocation1] sm:$0xff pattern:$0x75316420] }
 0x21d   : > { %2357 = vrot.lane.b32.xlu1 %v2354_v27, %s5687_s20  ;;  %2443 = vst [vmem:[#allocation1] ss:$2 sm:$0xff] %v5185_v62 }
 0x21f   : > { %v2172_v29 = vld.sshfl [vmem:[#allocation1 + $0x10] sm:$0xff pattern:$0x75316420] }
 0x220   : > { %2261 = vst [vmem:[#allocation1 + $0x10] ss:$2 sm:$0xff] %v2256_v28  ;;  %2085 = vrot.lane.b32.xlu2 %v2080_v24, %s5689_s12  ;;  %2177 = vrot.lane.b32.xlu0 %v2172_v29, %s5689_s12  ;;  %s5701_s12 = smov 109  }
 0x224   : > { %v2446_v30 = vld.sshfl [vmem:[#allocation1] sm:$0xff pattern:$0x75316420]  ;;  %v2447_v31 = vld.sshfl [vmem:[#allocation1 + $0x8] sm:$0xff pattern:$0x75316420] }
 0x225   : > { %2449 = vrot.lane.b32.xlu1 %v2446_v30, %s5695_s25  ;;  %2535 = vst [vmem:[#allocation1] ss:$2 sm:$0xff] %v5176_v61 }
 0x227   : > { %v2264_v32 = vld.sshfl [vmem:[#allocation1 + $0x10] sm:$0xff pattern:$0x75316420] }
 0x228   : > { %2353 = vst [vmem:[#allocation1 + $0x10] ss:$2 sm:$0xff] %v2348_v33  ;;  %2269 = vrot.lane.b32.xlu2 %v2264_v32, %s5687_s20  ;;  %2265 = vrot.lane.b32.xlu0 %v2262_v22, %s5687_s20 }
 0x22c   : > { %v2539_v34 = vld.sshfl [vmem:[#allocation1 + $0x8] sm:$0xff pattern:$0x75316420]  ;;  %v2538_v35 = vld.sshfl [vmem:[#allocation1] sm:$0xff pattern:$0x75316420] }
 0x22d   : > { %2543 = vrot.lane.b32.xlu1 %v2539_v34, %s5695_s25  ;;  %2627 = vst [vmem:[#allocation1] ss:$2 sm:$0xff] %v5185_v62 }
 0x22f   : > { %v2356_v37 = vld.sshfl [vmem:[#allocation1 + $0x10] sm:$0xff pattern:$0x75316420] }
 0x230   : > { %2445 = vst [vmem:[#allocation1 + $0x10] ss:$2 sm:$0xff] %v2440_v36  ;;  %2361 = vrot.lane.b32.xlu0 %v2356_v37, %s5687_s20  ;;  %2359 = vrot.lane.b32.xlu2 %v2355_v26, %s5687_s20 }
 0x234   : > { %v2630_v38 = vld.sshfl [vmem:[#allocation1] sm:$0xff pattern:$0x75316420]  ;;  %v2631_v39 = vld.sshfl [vmem:[#allocation1 + $0x8] sm:$0xff pattern:$0x75316420] }
 0x235   : > { %2635 = vrot.lane.b32.xlu1 %v2631_v39, %s5696_s11  ;;  %2719 = vst [vmem:[#allocation1] ss:$2 sm:$0xff] %v5176_v61 }
 0x237   : > { %v2448_v40 = vld.sshfl [vmem:[#allocation1 + $0x10] sm:$0xff pattern:$0x75316420] }
 0x238   : > { %2537 = vst [vmem:[#allocation1 + $0x10] ss:$2 sm:$0xff] %v2532_v42  ;;  %2451 = vrot.lane.b32.xlu2 %v2447_v31, %s5695_s25  ;;  %2541 = vrot.lane.b32.xlu0 %v2538_v35, %s5695_s25  ;;  %v4447_v42 = vld [vmem:[%s5670_s4 + $0x8] sm:$0xf] }
 0x23c   : > { %v2723_v43 = vld.sshfl [vmem:[#allocation1 + $0x8] sm:$0xff pattern:$0x75316420]  ;;  %v2722_v44 = vld.sshfl [vmem:[#allocation1] sm:$0xff pattern:$0x75316420] }
 0x23d   : > { %2725 = vrot.lane.b32.xlu1 %v2722_v44, %s5696_s11  ;;  %2811 = vst [vmem:[#allocation1] ss:$2 sm:$0xff] %v5185_v62 }
 0x23f   : > { %v2540_v49 = vld.sshfl [vmem:[#allocation1 + $0x10] sm:$0xff pattern:$0x75316420] }
 0x240   : > { %2453 = vrot.lane.b32.xlu2 %v2448_v40, %s5695_s25  ;;  %2545 = vrot.lane.b32.xlu0 %v2540_v49, %s5695_s25  ;;  %2629 = vst [vmem:[#allocation1 + $0x10] ss:$2 sm:$0xff] %v2624_v46 }
 0x244   : > { %v2815_v50 = vld.sshfl [vmem:[#allocation1 + $0x8] sm:$0xff pattern:$0x75316420]  ;;  %v2814_v51 = vld.sshfl [vmem:[#allocation1] sm:$0xff pattern:$0x75316420] }
 0x245   : > { %2818 = vrot.lane.b32.xlu1 %v2814_v51, %s5697_s29  ;;  %2907 = vst [vmem:[#allocation1] ss:$2 sm:$0xff] %v5176_v61 }
 0x247   : > { %v2632_v53 = vld.sshfl [vmem:[#allocation1 + $0x10] sm:$0xff pattern:$0x75316420] }
 0x248   : > { %2637 = vrot.lane.b32.xlu2 %v2632_v53, %s5696_s11  ;;  %2721 = vst [vmem:[#allocation1 + $0x10] ss:$2 sm:$0xff] %v2716_v52  ;;  %2633 = vrot.lane.b32.xlu0 %v2630_v38, %s5696_s11 }
 0x24c   : > { %v2911_v54 = vld.sshfl [vmem:[#allocation1 + $0x8] sm:$0xff pattern:$0x75316420]  ;;  %v2910_v55 = vld.sshfl [vmem:[#allocation1] sm:$0xff pattern:$0x75316420] }
 0x24d   : > { %2916 = vrot.lane.b32.xlu1 %v2911_v54, %s5697_s29  ;;  %3003 = vst [vmem:[#allocation1] ss:$2 sm:$0xff] %v5185_v62  ;;  %v4454_v54 = vld [vmem:[%s5669_s3 + $0xc] sm:$0xf] }
 0x24f   : > { %v2724_v57 = vld.sshfl [vmem:[#allocation1 + $0x10] sm:$0xff pattern:$0x75316420] }
 0x250   : > { %2729 = vrot.lane.b32.xlu0 %v2724_v57, %s5696_s11  ;;  %2813 = vst [vmem:[#allocation1 + $0x10] ss:$2 sm:$0xff] %v2808_v56  ;;  %2727 = vrot.lane.b32.xlu2 %v2723_v43, %s5696_s11  ;;  %v3381_v43 = vld [vmem:[%s5673_s7] sm:$0xf] }
 0x254   : > { %v3007_v60 = vld.sshfl [vmem:[#allocation1 + $0x8] sm:$0xff pattern:$0x75316420]  ;;  %v3006_v63 = vld.sshfl [vmem:[#allocation1] sm:$0xff pattern:$0x75316420] }
 0x255   : > { %3099 = vst [vmem:[#allocation1] ss:$2 sm:$0xff] %v5176_v61 }
 0x257   : > { %v2817_v1 = vld.sshfl [vmem:[#allocation1 + $0x18] sm:$0xff pattern:$0x75316420]  ;;  %v2816_v2 = vld.sshfl [vmem:[#allocation1 + $0x10] sm:$0xff pattern:$0x75316420] }
 0x258   : > { %2824 = vrot.lane.b32.xlu0 %v2817_v1, %s5697_s29  ;;  %2820 = vrot.lane.b32.xlu2 %v2815_v50, %s5697_s29  ;;  %2909 = vst [vmem:[#allocation1 + $0x10] ss:$2 sm:$0xff] %v2904_v0 }
 0x25c   : > { %v3103_v4 = vld.sshfl [vmem:[#allocation1 + $0x8] sm:$0xff pattern:$0x75316420]  ;;  %v3102_v5 = vld.sshfl [vmem:[#allocation1] sm:$0xff pattern:$0x75316420] }
 0x25d   : > { %3195 = vst [vmem:[#allocation1] ss:$2 sm:$0xff] %v5185_v62  ;;  %v4426_v62 = vld [vmem:[%s5669_s3 + $0x4] sm:$0xf] }
 0x25f   : > { %v2912_v6 = vld.sshfl [vmem:[#allocation1 + $0x10] sm:$0xff pattern:$0x75316420]  ;;  %v2913_v7 = vld.sshfl [vmem:[#allocation1 + $0x18] sm:$0xff pattern:$0x75316420] }
 0x260   : > { %2822 = vrot.lane.b32.xlu2 %v2816_v2, %s5697_s29  ;;  %2918 = vrot.lane.b32.xlu1 %v2912_v6, %s5697_s29  ;;  %3005 = vst [vmem:[#allocation1 + $0x10] ss:$2 sm:$0xff] %v2808_v56 }
 0x261   : > { %2914 = vrot.lane.b32.xlu0 %v2910_v55, %s5697_s29 }
 0x262   : > { %v1902_v8 = vpop.permute.xlu2 %1901 }
 0x263   : > { %4431 = vmatpush.msk.msra.mxu0 %vm1699_vm0, %v1902_v8 }
 0x264   : > { %v3199_v9 = vld.sshfl [vmem:[#allocation1 + $0x8] sm:$0xff pattern:$0x75316420]  ;;  %v3198_v10 = vld.sshfl [vmem:[#allocation1] sm:$0xff pattern:$0x75316420]  ;;  %4432 = vmatmul.msk.f32.vlgmr.msra.gmra.mxu0 %vm1738_vm2, %v4426_v62 }
 0x265   : > { %3291 = vst [vmem:[#allocation1] ss:$2 sm:$0xff] %v5176_v61 }
 0x267   : > { %v1900_v11 = vpop.permute.xlu1 %1899  ;;  %v3008_v12 = vld.sshfl [vmem:[#allocation1 + $0x10] sm:$0xff pattern:$0x75316420]  ;;  %v3009_v13 = vld.sshfl [vmem:[#allocation1 + $0x18] sm:$0xff pattern:$0x75316420]  ;;  %v1898_v14 = vpop.permute.xlu0 %1897 }
 0x268   : > { %v1904_v15 = vsel %vm394_vm1, %v1900_v11, %v1902_v8  ;;  %2920 = vrot.lane.b32.xlu1 %v2913_v7, %s5697_s29  ;;  %3101 = vst [vmem:[#allocation1 + $0x10] ss:$2 sm:$0xff] %v2904_v0  ;;  %3012 = vrot.lane.b32.xlu2 %v3007_v60, %s5698_s18  ;;  %v1903_v16 = vsel %vm394_vm1, %v1898_v14, %v1900_v11  ;;  %v4461_v60 = vld [vmem:[%s5670_s4 + $0xc] sm:$0xf] }
 0x269   : > { %3014 = vrot.lane.b32.xlu0 %v3008_v12, %s5698_s18  ;;  %4427 = vmatpush.msk.msrb.mxu2 %vm1699_vm0, %v1903_v16  ;;  %v4482_v16 = vld [vmem:[%s5669_s3 + $0x14] sm:$0xf] }
 0x26a   : > { %v1992_v61 = vpop.permute.xlu2 %1991  ;;  %4429 = vmatpush.msk.msrb.mxu3 %vm1699_vm0, %v1904_v15  ;;  %4428 = vmatmul.msk.f32.vlgmr.msrb.gmra.mxu2 %vm1738_vm2, %v4426_v62 }
 0x26b   : > { %4430 = vmatmul.msk.f32.vlgmr.msrb.gmra.mxu3 %vm1738_vm2, %v4426_v62 }
 0x26c   : > { %v3294_v31 = vld.sshfl [vmem:[#allocation1] sm:$0xff pattern:$0x75316420]  ;;  %v3295_v36 = vld.sshfl [vmem:[#allocation1 + $0x8] sm:$0xff pattern:$0x75316420] }
 0x26f   : > { %v1990_v18 = vpop.permute.xlu1 %1989  ;;  %v3104_v19 = vld.sshfl [vmem:[#allocation1 + $0x10] sm:$0xff pattern:$0x75316420]  ;;  %v3105_v20 = vld.sshfl [vmem:[#allocation1 + $0x18] sm:$0xff pattern:$0x75316420] }
 0x270   : > { %v1995_v21 = vsel %vm394_vm1, %v1990_v18, %v1992_v61  ;;  %3110 = vrot.lane.b32.xlu1 %v3104_v19, %s5698_s18  ;;  %3010 = vrot.lane.b32.xlu2 %v3006_v63, %s5698_s18  ;;  %3197 = vst [vmem:[#allocation1 + $0x10] ss:$2 sm:$0xff] %v2808_v56 }
 0x271   : > { %3016 = vrot.lane.b32.xlu0 %v3009_v13, %s5698_s18  ;;  %4434 = vmatpush.msk.msra.mxu1 %vm1699_vm0, %v1995_v21 }
 0x272   : > { %v2084_v22 = vpop.permute.xlu2 %2083  ;;  %4435 = vmatmul.msk.f32.vlgmr.msra.gmra.mxu1 %vm1738_vm2, %v4433_v17 }
 0x277   : > { %v2082_v24 = vpop.permute.xlu1 %2081  ;;  %v3200_v25 = vld.sshfl [vmem:[#allocation1 + $0x10] sm:$0xff pattern:$0x75316420]  ;;  %v3201_v26 = vld.sshfl [vmem:[#allocation1 + $0x18] sm:$0xff pattern:$0x75316420] }
 0x278   : > { %v2087_v27 = vsel %vm535_vm3, %v2082_v24, %v2084_v22  ;;  %3112 = vrot.lane.b32.xlu2 %v3105_v20, %s5698_s18  ;;  %3108 = vrot.lane.b32.xlu1 %v3103_v4, %s5698_s18  ;;  %3293 = vst [vmem:[#allocation1 + $0x10] ss:$2 sm:$0xff] %v2904_v0  ;;  %v4468_v4 = vld [vmem:[%s5669_s3 + $0x10] sm:$0xf] }
 0x279   : > { %3106 = vrot.lane.b32.xlu0 %v3102_v5, %s5698_s18  ;;  %4441 = vmatpush.msk.msrb.mxu0 %vm1699_vm0, %v2087_v27 }
 0x27a   : > { %v2086_v28 = vpop.permute.xlu2 %2085  ;;  %4442 = vmatmul.msk.f32.vlgmr.msrb.gmra.mxu0 %vm1738_vm2, %v4440_v23 }
 0x27b   : > { %v2088_v29 = vsel %vm535_vm3, %v2084_v22, %v2086_v28  ;;  %v4489_v22 = vld [vmem:[%s5670_s4 + $0x14] sm:$0xf] }
 0x27c   : > { %4443 = vmatpush.msk.msrb.mxu1 %vm1699_vm0, %v2088_v29 }
 0x27d   : > { %4444 = vmatmul.msk.f32.vlgmr.msrb.gmra.mxu1 %vm1738_vm2, %v4440_v23 }
 0x27f   : > { %v2176_v30 = vpop.permute.xlu1 %2175  ;;  %v3296_v46 = vld.sshfl [vmem:[#allocation1 + $0x10] sm:$0xff pattern:$0x75316420]  ;;  %v3297_v49 = vld.sshfl [vmem:[#allocation1 + $0x18] sm:$0xff pattern:$0x75316420] }
 0x280   : > { %3202 = vrot.lane.b32.xlu2 %v3198_v10, %s5699_s21  ;;  %3298 = vrot.lane.b32.xlu1 %v3294_v31, %s5699_s21 }
 0x281   : > { %3204 = vrot.lane.b32.xlu0 %v3199_v9, %s5699_s21  ;;  %v4475_v9 = vld [vmem:[%s5670_s4 + $0x10] sm:$0xf] }
 0x282   : > { %v1994_v32 = vpop.permute.xlu0 %1993  ;;  %v2270_v33 = vpop.permute.xlu2 %2269 }
 0x283   : > { %v1996_v34 = vsel %vm394_vm1, %v1992_v61, %v1994_v32  ;;  %4438 = vmatpush.msk.msra.mxu3 %vm1699_vm0, %v1994_v32 }
 0x284   : > { %4436 = vmatpush.msk.msra.mxu2 %vm1699_vm0, %v1996_v34  ;;  %4439 = vmatmul.msk.f32.vlgmr.msra.gmra.mxu3 %vm1738_vm2, %v4433_v17 }
 0x285   : > { %4437 = vmatmul.msk.f32.vlgmr.msra.gmra.mxu2 %vm1738_vm2, %v4433_v17 }
 0x286   : > { %4445 = vmatpush.msk.msrb.mxu2 %vm1699_vm0, %v2086_v28 }
 0x287   : > { %v2268_v35 = vpop.permute.xlu1 %2267 }
 0x288   : > { %3300 = vrot.lane.b32.xlu2 %v3295_v36, %s5699_s21  ;;  %3208 = vrot.lane.b32.xlu1 %v3201_v26, %s5699_s21  ;;  %v2272_v37 = vsel %vm695_vm4, %v2268_v35, %v2270_v33  ;;  %v4510_v36 = vld [vmem:[%s5669_s3 + $0x1c] sm:$0xf] }
 0x289   : > { %3206 = vrot.lane.b32.xlu0 %v3200_v25, %s5699_s21  ;;  %v4496_v25 = vld [vmem:[%s5669_s3 + $0x18] sm:$0xf] }
 0x28a   : > { %v2174_v38 = vpop.permute.xlu0 %2173  ;;  %v2360_v39 = vpop.permute.xlu2 %2359 }
 0x28b   : > { %v2179_v40 = vsel %vm535_vm3, %v2174_v38, %v2176_v30 }
 0x28c   : > { %4448 = vmatpush.msk.msrb.mxu3 %vm1699_vm0, %v2179_v40  ;;  %v1785_v40 = vpop.f32.mrf.mxu1 }
 0x28d   : > { %4446 = vmatmul.msk.f32.vlgmr.msrb.gmra.mxu2 %vm1738_vm2, %v4440_v23  ;;  %4449 = vmatmul.msk.f32.vlgmr.msrb.gmra.mxu3 %vm1738_vm2, %v4447_v42 }
 0x28e   : > { %4457 = vmatpush.msk.msra.mxu3 %vm1699_vm0, %v2272_v37 }
 0x28f   : > { %v2358_v44 = vpop.permute.xlu1 %2357 }
 0x290   : > { %3302 = vrot.lane.b32.xlu2 %v3296_v46, %s5699_s21  ;;  %3384 = vperm.xlu1 %4774, %v3381_v43   ;;  %v2363_v52 = vsel %vm695_vm4, %v2358_v44, %v2360_v39 }
 0x291   : > { %3304 = vrot.lane.b32.xlu0 %v3297_v49, %s5699_s21 }
 0x292   : > { %v2178_v50 = vpop.permute.xlu0 %2177  ;;  %v2452_v51 = vpop.permute.xlu2 %2451 }
 0x293   : > { %v2180_v53 = vsel %vm535_vm3, %v2176_v30, %v2178_v50  ;;  %4452 = vmatpush.msk.msra.mxu1 %vm1699_vm0, %v2178_v50  ;;  %v1805_v50 = vpop.f32.mrf.mxu2 }
 0x294   : > { %4450 = vmatpush.msk.msra.mxu0 %vm1699_vm0, %v2180_v53  ;;  %4453 = vmatmul.msk.f32.vlgmr.msra.gmra.mxu1 %vm1738_vm2, %v4447_v42 }
 0x295   : > { %4462 = vmatpush.msk.msrb.mxu1 %vm1699_vm0, %v2363_v52  ;;  %4451 = vmatmul.msk.f32.vlgmr.msra.gmra.mxu0 %vm1738_vm2, %v4447_v42 }
 0x296   : > { %4459 = vmatpush.msk.msrb.mxu0 %vm1699_vm0, %v2270_v33  ;;  %4458 = vmatmul.msk.f32.vlgmr.msra.gmra.mxu3 %vm1738_vm2, %v4454_v54  ;;  %v4503_v33 = vld [vmem:[%s5670_s4 + $0x18] sm:$0xf] }
 0x297   : > { %v2450_v55 = vpop.permute.xlu1 %2449 }
 0x298   : > { %v2455_v56 = vsel %vm775_vm5, %v2450_v55, %v2452_v51 }
 0x299   : > { %4469 = vmatpush.msk.msra.mxu0 %vm1699_vm0, %v2455_v56 }
 0x29a   : > { %v2266_v57 = vpop.permute.xlu0 %2265  ;;  %v2454_v59 = vpop.permute.xlu2 %2453 }
 0x29b   : > { %v2271_v63 = vsel %vm695_vm4, %v2266_v57, %v2268_v35  ;;  %v2456_v0 = vsel %vm775_vm5, %v2452_v51, %v2454_v59  ;;  %v1842_v51 = vpop.f32.mrf.mxu3 }
 0x29c   : > { %4455 = vmatpush.msk.msra.mxu2 %vm1699_vm0, %v2271_v63  ;;  %4471 = vmatpush.msk.msra.mxu1 %vm1699_vm0, %v2456_v0  ;;  %v4517_v63 = vld [vmem:[%s5670_s4 + $0x1c] sm:$0xf] }
 0x29d   : > { %4456 = vmatmul.msk.f32.vlgmr.msra.gmra.mxu2 %vm1738_vm2, %v4454_v54  ;;  %4463 = vmatmul.msk.f32.vlgmr.msrb.gmra.mxu1 %vm1738_vm2, %v4461_v60 }
 0x29e   : > { %4460 = vmatmul.msk.f32.vlgmr.msrb.gmra.mxu0 %vm1738_vm2, %v4454_v54  ;;  %v1882_v54 = vpop.f32.mrf.mxu1 }
 0x29f   : > { %v2544_v1 = vpop.permute.xlu1 %2543  ;;  %v1883_v56 = vadd.f32 %v1882_v54, %v1805_v50 }
 0x2a2   : > { %v2362_v2 = vpop.permute.xlu0 %2361  ;;  %v2638_v3 = vpop.permute.xlu2 %2637 }
 0x2a3   : > { %v2364_v5 = vsel %vm695_vm4, %v2360_v39, %v2362_v2  ;;  %4466 = vmatpush.msk.msrb.mxu3 %vm1699_vm0, %v2362_v2  ;;  %v1765_v39 = vpop.f32.mrf.mxu0 }
 0x2a4   : > { %4464 = vmatpush.msk.msrb.mxu2 %vm1699_vm0, %v2364_v5  ;;  %4467 = vmatmul.msk.f32.vlgmr.msrb.gmra.mxu3 %vm1738_vm2, %v4461_v60  ;;  %v5431_v52 = vadd.f32 %v1842_v51, %v1765_v39 }
 0x2a5   : > { %4465 = vmatmul.msk.f32.vlgmr.msrb.gmra.mxu2 %vm1738_vm2, %v4461_v60  ;;  %4472 = vmatmul.msk.f32.vlgmr.msra.gmra.mxu1 %vm1738_vm2, %v4468_v4 }
 0x2a6   : > { %4473 = vmatpush.msk.msra.mxu2 %vm1699_vm0, %v2454_v59  ;;  %4470 = vmatmul.msk.f32.vlgmr.msra.gmra.mxu0 %vm1738_vm2, %v4468_v4 }
 0x2a7   : > { %v2636_v6 = vpop.permute.xlu1 %2635 }
 0x2a8   : > { %v2640_v10 = vsel %vm855_vm6, %v2636_v6, %v2638_v3 }
 0x2aa   : > { %v2542_v7 = vpop.permute.xlu0 %2541  ;;  %v2728_v8 = vpop.permute.xlu2 %2727 }
 0x2ab   : > { %v2547_v62 = vsel %vm775_vm5, %v2542_v7, %v2544_v1  ;;  %v1862_v53 = vpop.f32.mrf.mxu0 }
 0x2ac   : > { %4476 = vmatpush.msk.msra.mxu3 %vm1699_vm0, %v2547_v62  ;;  %v5433_v55 = vadd.f32 %v1862_v53, %v1785_v40 }
 0x2ad   : > { %4474 = vmatmul.msk.f32.vlgmr.msra.gmra.mxu2 %vm1738_vm2, %v4468_v4  ;;  %4477 = vmatmul.msk.f32.vlgmr.msra.gmra.mxu3 %vm1738_vm2, %v4475_v9 }
 0x2ae   : > { %4485 = vmatpush.msk.msrb.mxu3 %vm1699_vm0, %v2640_v10 }
 0x2af   : > { %v2726_v11 = vpop.permute.xlu1 %2725 }
 0x2b0   : > { %v2731_v14 = vsel %vm855_vm6, %v2726_v11, %v2728_v8 }
 0x2b2   : > { %v2546_v12 = vpop.permute.xlu0 %2545  ;;  %v2821_v13 = vpop.permute.xlu2 %2820 }
 0x2b3   : > { %v2548_v15 = vsel %vm775_vm5, %v2544_v1, %v2546_v12  ;;  %4480 = vmatpush.msk.msrb.mxu1 %vm1699_vm0, %v2546_v12  ;;  %v4524_v12 = vld [vmem:[%s5669_s3 + $0x20] sm:$0xf] }
 0x2b4   : > { %4478 = vmatpush.msk.msrb.mxu0 %vm1699_vm0, %v2548_v15  ;;  %4481 = vmatmul.msk.f32.vlgmr.msrb.gmra.mxu1 %vm1738_vm2, %v4475_v9 }
 0x2b5   : > { %4490 = vmatpush.msk.msra.mxu1 %vm1699_vm0, %v2731_v14  ;;  %4479 = vmatmul.msk.f32.vlgmr.msrb.gmra.mxu0 %vm1738_vm2, %v4475_v9  ;;  %v4531_v9 = vld [vmem:[%s5670_s4 + $0x20] sm:$0xf] }
 0x2b6   : > { %4486 = vmatmul.msk.f32.vlgmr.msrb.gmra.mxu3 %vm1738_vm2, %v4482_v16  ;;  %4487 = vmatpush.msk.msra.mxu0 %vm1699_vm0, %v2638_v3 }
 0x2b7   : > { %v2819_v61 = vpop.permute.xlu1 %2818 }
 0x2b8   : > { %v2826_v17 = vsel %vm1025_vm8, %v2819_v61, %v2821_v13 }
 0x2b9   : > { %4497 = vmatpush.msk.msrb.mxu0 %vm1699_vm0, %v2826_v17 }
 0x2ba   : > { %v2634_v18 = vpop.permute.xlu0 %2633  ;;  %v2823_v19 = vpop.permute.xlu2 %2822 }
 0x2bb   : > { %v2639_v20 = vsel %vm855_vm6, %v2634_v18, %v2636_v6  ;;  %v2827_v21 = vsel %vm1025_vm8, %v2821_v13, %v2823_v19 }
 0x2bc   : > { %4483 = vmatpush.msk.msrb.mxu2 %vm1699_vm0, %v2639_v20  ;;  %4499 = vmatpush.msk.msrb.mxu1 %vm1699_vm0, %v2827_v21 }
 0x2bd   : > { %4484 = vmatmul.msk.f32.vlgmr.msrb.gmra.mxu2 %vm1738_vm2, %v4482_v16  ;;  %4488 = vmatmul.msk.f32.vlgmr.msra.gmra.mxu0 %vm1738_vm2, %v4482_v16 }
 0x2be   : > { %4491 = vmatmul.msk.f32.vlgmr.msra.gmra.mxu1 %vm1738_vm2, %v4489_v22 }
 0x2bf   : > { %v2917_v27 = vpop.permute.xlu1 %2916 }
 0x2c2   : > { %v2730_v23 = vpop.permute.xlu0 %2729  ;;  %v3013_v24 = vpop.permute.xlu2 %3012 }
 0x2c3   : > { %v2732_v26 = vsel %vm855_vm6, %v2728_v8, %v2730_v23  ;;  %4494 = vmatpush.msk.msra.mxu3 %vm1699_vm0, %v2730_v23 }
 0x2c4   : > { %4492 = vmatpush.msk.msra.mxu2 %vm1699_vm0, %v2732_v26  ;;  %4495 = vmatmul.msk.f32.vlgmr.msra.gmra.mxu3 %vm1738_vm2, %v4489_v22 }
 0x2c5   : > { %4493 = vmatmul.msk.f32.vlgmr.msra.gmra.mxu2 %vm1738_vm2, %v4489_v22  ;;  %4498 = vmatmul.msk.f32.vlgmr.msrb.gmra.mxu0 %vm1738_vm2, %v4496_v25 }
 0x2c6   : > { %4500 = vmatmul.msk.f32.vlgmr.msrb.gmra.mxu1 %vm1738_vm2, %v4496_v25 }
 0x2ca   : > { %v2825_v28 = vpop.permute.xlu0 %2824  ;;  %v3011_v29 = vpop.permute.xlu2 %3010 }
 0x2cb   : > { %v2828_v30 = vsel %vm1025_vm8, %v2823_v19, %v2825_v28  ;;  %v3018_v31 = vsel %vm1108_vm9, %v3011_v29, %v3013_v24 }
 0x2cc   : > { %4501 = vmatpush.msk.msrb.mxu2 %vm1699_vm0, %v2828_v30 }
 0x2cd   : > { %4502 = vmatmul.msk.f32.vlgmr.msrb.gmra.mxu2 %vm1738_vm2, %v4496_v25 }
 0x2ce   : > { %4511 = vmatpush.msk.msra.mxu2 %vm1699_vm0, %v3018_v31 }
 0x2d2   : > { %v2919_v32 = vpop.permute.xlu1 %2918  ;;  %v3113_v38 = vpop.permute.xlu2 %3112 }
 0x2d3   : > { %v2923_v34 = vsel %vm1025_vm8, %v2917_v27, %v2919_v32  ;;  %v2915_v35 = vpop.permute.xlu0 %2914 }
 0x2d4   : > { %v2922_v37 = vsel %vm1025_vm8, %v2915_v35, %v2917_v27  ;;  %4506 = vmatpush.msk.msra.mxu0 %vm1699_vm0, %v2923_v34 }
 0x2d5   : > { %4504 = vmatpush.msk.msrb.mxu3 %vm1699_vm0, %v2922_v37  ;;  %4507 = vmatmul.msk.f32.vlgmr.msra.gmra.mxu0 %vm1738_vm2, %v4503_v33 }
 0x2d6   : > { %4505 = vmatmul.msk.f32.vlgmr.msrb.gmra.mxu3 %vm1738_vm2, %v4503_v33  ;;  %4512 = vmatmul.msk.f32.vlgmr.msra.gmra.mxu2 %vm1738_vm2, %v4510_v36 }
 0x2da   : > { %v2921_v42 = vpop.permute.xlu1 %2920  ;;  %v3203_v49 = vpop.permute.xlu2 %3202 }
 0x2db   : > { %v2924_v43 = vsel %vm1025_vm8, %v2919_v32, %v2921_v42  ;;  %v3015_v44 = vpop.permute.xlu0 %3014 }
 0x2dc   : > { %v3019_v46 = vsel %vm1108_vm9, %v3013_v24, %v3015_v44  ;;  %4508 = vmatpush.msk.msra.mxu1 %vm1699_vm0, %v2924_v43 }
 0x2dd   : > { %4513 = vmatpush.msk.msra.mxu3 %vm1699_vm0, %v3019_v46  ;;  %4509 = vmatmul.msk.f32.vlgmr.msra.gmra.mxu1 %vm1738_vm2, %v4503_v33 }
 0x2de   : > { %4514 = vmatmul.msk.f32.vlgmr.msra.gmra.mxu3 %vm1738_vm2, %v4510_v36 }
 0x2e1   : > { %v1971_v1 = vpop.f32.mrf.mxu0 }
 0x2e2   : > { %v3111_v57 = vpop.permute.xlu1 %3110  ;;  %v3301_v2 = vpop.permute.xlu2 %3300  ;;  %v5444_v3 = vadd.f32 %v1971_v1, %v1883_v56 }
 0x2e3   : > { %v3116_v59 = vsel %vm1108_vm9, %v3111_v57, %v3113_v38  ;;  %v3017_v60 = vpop.permute.xlu0 %3016 }
 0x2e4   : > { %v3020_v0 = vsel %vm1108_vm9, %v3015_v44, %v3017_v60  ;;  %4522 = vmatpush.msk.msrb.mxu3 %vm1699_vm0, %v3116_v59 }
 0x2e5   : > { %4515 = vmatpush.msk.msrb.mxu0 %vm1699_vm0, %v3020_v0 }
 0x2e6   : > { %4516 = vmatmul.msk.f32.vlgmr.msrb.gmra.mxu0 %vm1738_vm2, %v4510_v36  ;;  %4523 = vmatmul.msk.f32.vlgmr.msrb.gmra.mxu3 %vm1738_vm2, %v4517_v63 }
 0x2ea   : > { %v3109_v4 = vpop.permute.xlu1 %3108  ;;  %v3303_v10 = vpop.permute.xlu2 %3302 }
 0x2eb   : > { %v3115_v5 = vsel %vm1108_vm9, %v3109_v4, %v3111_v57  ;;  %v3107_v6 = vpop.permute.xlu0 %3106  ;;  %v3307_v14 = vsel %vm1191_vm10, %v3301_v2, %v3303_v10 }
 0x2ec   : > { %v3114_v7 = vsel %vm1108_vm9, %v3107_v6, %v3109_v4  ;;  %4520 = vmatpush.msk.msrb.mxu2 %vm1699_vm0, %v3115_v5 }
 0x2ed   : > { %4518 = vmatpush.msk.msrb.mxu1 %vm1699_vm0, %v3114_v7  ;;  %4521 = vmatmul.msk.f32.vlgmr.msrb.gmra.mxu2 %vm1738_vm2, %v4517_v63  ;;  %v1931_v21 = vpop.f32.mrf.mxu2 }
 0x2ee   : > { %4519 = vmatmul.msk.f32.vlgmr.msrb.gmra.mxu1 %vm1738_vm2, %v4517_v63  ;;  %v1951_v20 = vpop.f32.mrf.mxu3  ;;  %v1974_v40 = vadd.f32 %v1931_v21, %v5431_v52 }
 0x2ef   : > { %v2023_v23 = vpop.f32.mrf.mxu1  ;;  %v1975_v53 = vadd.f32 %v1951_v20, %v5433_v55 }
 0x2f0   : > { %v2066_v44 = vadd.f32 %v2023_v23, %v1974_v40 }
 0x2f2   : > { %v3299_v8 = vpop.permute.xlu1 %3298 }
 0x2f3   : > { %v3205_v62 = vpop.permute.xlu0 %3204  ;;  %v3306_v11 = vsel %vm1191_vm10, %v3299_v8, %v3301_v2 }
 0x2f4   : > { %v3210_v13 = vsel %vm1191_vm10, %v3203_v49, %v3205_v62  ;;  %4532 = vmatpush.msk.msra.mxu3 %vm1699_vm0, %v3306_v11 }
 0x2f5   : > { %4525 = vmatpush.msk.msra.mxu0 %vm1699_vm0, %v3210_v13  ;;  %4533 = vmatmul.msk.f32.vlgmr.msra.gmra.mxu3 %vm1738_vm2, %v4531_v9 }
 0x2f6   : > { %4526 = vmatmul.msk.f32.vlgmr.msra.gmra.mxu0 %vm1738_vm2, %v4524_v12 }
 0x2f7   : > { %4534 = vmatpush.msk.msrb.mxu0 %vm1699_vm0, %v3307_v14  ;;  %v2115_v24 = vpop.f32.mrf.mxu0 }
 0x2f8   : > { %v2158_v49 = vadd.f32 %v2115_v24, %v2066_v44 }
 0x2fa   : > { %v3209_v15 = vpop.permute.xlu1 %3208  ;;  %v2135_v27 = vpop.f32.mrf.mxu1 }
 0x2fb   : > { %v3207_v16 = vpop.permute.xlu0 %3206 }
 0x2fc   : > { %v3211_v61 = vsel %vm1191_vm10, %v3205_v62, %v3207_v16  ;;  %v3212_v17 = vsel %vm1191_vm10, %v3207_v16, %v3209_v15 }
 0x2fd   : > { %4527 = vmatpush.msk.msra.mxu1 %vm1699_vm0, %v3211_v61  ;;  %4529 = vmatpush.msk.msra.mxu2 %vm1699_vm0, %v3212_v17 }
 0x2fe   : > { %4528 = vmatmul.msk.f32.vlgmr.msra.gmra.mxu1 %vm1738_vm2, %v4524_v12  ;;  %4530 = vmatmul.msk.f32.vlgmr.msra.gmra.mxu2 %vm1738_vm2, %v4524_v12 }
 0x2ff   : > { %4535 = vmatmul.msk.f32.vlgmr.msrb.gmra.mxu0 %vm1738_vm2, %v4531_v9 }
 0x303   : > { %v3305_v18 = vpop.permute.xlu0 %3304 }
 0x304   : > { %v3308_v19 = vsel %vm1191_vm10, %v3303_v10, %v3305_v18 }
 0x305   : > { %4536 = vmatpush.msk.msrb.mxu1 %vm1699_vm0, %v3308_v19 }
 0x306   : > { %4537 = vmatmul.msk.f32.vlgmr.msrb.gmra.mxu1 %vm1738_vm2, %v4531_v9 }
 0x307   : > { %v2063_v22 = vpop.f32.mrf.mxu3 }
 0x308   : > { %v2043_v25 = vpop.f32.mrf.mxu2  ;;  %v2068_v5 = vadd.f32 %v2063_v22, %v5444_v3 }
 0x309   : > { %v2067_v59 = vadd.f32 %v2043_v25, %v1975_v53 }
 0x30b   : > { %v2159_v0 = vadd.f32 %v2135_v27, %v2067_v59 }
 0x310   : > { %v2207_v26 = vpop.f32.mrf.mxu3  ;;  %v2155_v29 = vpop.f32.mrf.mxu2 }
 0x311   : > { %v2247_v31 = vpop.f32.mrf.mxu1  ;;  %v2250_v54 = vadd.f32 %v2207_v26, %v2158_v49  ;;  %v2160_v8 = vadd.f32 %v2155_v29, %v2068_v5 }
 0x312   : > { %v2227_v28 = vpop.f32.mrf.mxu0 }
 0x313   : > { %v2251_v6 = vadd.f32 %v2227_v28, %v2159_v0  ;;  %v2252_v11 = vadd.f32 %v2247_v31, %v2160_v8 }
 0x319   : > { %v2319_v30 = vpop.f32.mrf.mxu3 }
 0x31a   : > { %v2391_v35 = vpop.f32.mrf.mxu1  ;;  %v2343_v10 = vadd.f32 %v2319_v30, %v2251_v6 }
 0x31b   : > { %v2339_v32 = vpop.f32.mrf.mxu0 }
 0x31c   : > { %v2344_v16 = vadd.f32 %v2339_v32, %v2252_v11 }
 0x320   : > { %v2299_v33 = vpop.f32.mrf.mxu2 }
 0x321   : > { %v2342_v60 = vadd.f32 %v2299_v33, %v2250_v54  ;;  %v3385_v54 = vpop.permute.xlu1 %3384 }
 0x322   : > { %v2503_v39 = vpop.f32.mrf.mxu1 }
 0x323   : > { %v2483_v36 = vpop.f32.mrf.mxu0  ;;  %v2434_v1 = vadd.f32 %v2391_v35, %v2342_v60 }
 0x325   : > { %v2526_v7 = vadd.f32 %v2483_v36, %v2434_v1 }
 0x327   : > { %v2431_v34 = vpop.f32.mrf.mxu3 }
 0x328   : > { %v2411_v37 = vpop.f32.mrf.mxu2  ;;  %v2436_v21 = vadd.f32 %v2431_v34, %v2344_v16 }
 0x329   : > { %v2435_v12 = vadd.f32 %v2411_v37, %v2343_v10 }
 0x32b   : > { %v2527_v61 = vadd.f32 %v2503_v39, %v2435_v12 }
 0x330   : > { %v2575_v38 = vpop.f32.mrf.mxu3  ;;  %v2523_v43 = vpop.f32.mrf.mxu2 }
 0x331   : > { %v2615_v50 = vpop.f32.mrf.mxu1  ;;  %v2618_v62 = vadd.f32 %v2575_v38, %v2526_v7  ;;  %v2528_v24 = vadd.f32 %v2523_v43, %v2436_v21 }
 0x332   : > { %v2595_v42 = vpop.f32.mrf.mxu0 }
 0x333   : > { %v2619_v19 = vadd.f32 %v2595_v42, %v2527_v61  ;;  %v2620_v29 = vadd.f32 %v2615_v50, %v2528_v24 }
 0x339   : > { %v2687_v46 = vpop.f32.mrf.mxu3 }
 0x33a   : > { %v2707_v56 = vpop.f32.mrf.mxu0  ;;  %v2711_v3 = vadd.f32 %v2687_v46, %v2619_v19 }
 0x33b   : > { %v2759_v63 = vpop.f32.mrf.mxu1  ;;  %v2712_v35 = vadd.f32 %v2707_v56, %v2620_v29 }
 0x340   : > { %v2667_v51 = vpop.f32.mrf.mxu2 }
 0x341   : > { %v2710_v13 = vadd.f32 %v2667_v51, %v2618_v62 }
 0x342   : > { %v2855_v2 = vpop.f32.mrf.mxu0 }
 0x343   : > { %v2875_v9 = vpop.f32.mrf.mxu1  ;;  %v2802_v17 = vadd.f32 %v2759_v63, %v2710_v13 }
 0x345   : > { %v2898_v22 = vadd.f32 %v2855_v2, %v2802_v17 }
 0x347   : > { %v2799_v57 = vpop.f32.mrf.mxu3 }
 0x348   : > { %v2779_v52 = vpop.f32.mrf.mxu2  ;;  %v2804_v38 = vadd.f32 %v2799_v57, %v2712_v35 }
 0x349   : > { %v2803_v25 = vadd.f32 %v2779_v52, %v2711_v3 }
 0x34b   : > { %v2899_v30 = vadd.f32 %v2875_v9, %v2803_v25 }
 0x350   : > { %v2895_v15 = vpop.f32.mrf.mxu2 }
 0x351   : > { %v2900_v42 = vadd.f32 %v2895_v15, %v2804_v38 }
 0x352   : > { %v2971_v55 = vpop.f32.mrf.mxu0 }
 0x353   : > { %v2995_v32 = vadd.f32 %v2971_v55, %v2899_v30 }
 0x359   : > { %v2951_v4 = vpop.f32.mrf.mxu3  ;;  %v3047_v23 = vpop.f32.mrf.mxu2 }
 0x35a   : > { %v2991_v18 = vpop.f32.mrf.mxu1  ;;  %v2994_v26 = vadd.f32 %v2951_v4, %v2898_v22 }
 0x35b   : > { %v2996_v49 = vadd.f32 %v2991_v18, %v2900_v42 }
 0x35c   : > { %v3090_v31 = vadd.f32 %v3047_v23, %v2994_v26 }
 0x361   : > { %v3067_v14 = vpop.f32.mrf.mxu3 }
 0x362   : > { %v3091_v39 = vadd.f32 %v3067_v14, %v2995_v32 }
 0x363   : > { %v3087_v20 = vpop.f32.mrf.mxu0 }
 0x364   : > { %v3092_v50 = vadd.f32 %v3087_v20, %v2996_v49  ;;  %v4235_v49 = vld [vmem:[%s5674_s8] sm:$0xf] }
 0x369   : > { %v3183_v27 = vpop.f32.mrf.mxu3 }
 0x36a   : > { %v3188_v63 = vadd.f32 %v3183_v27, %v3092_v50 }
 0x36b   : > { %v3143_v28 = vpop.f32.mrf.mxu1 }
 0x36c   : > { %v3186_v36 = vadd.f32 %v3143_v28, %v3090_v31 }
 0x370   : > { %v3163_v37 = vpop.f32.mrf.mxu2 }
 0x371   : > { %v3187_v44 = vadd.f32 %v3163_v37, %v3091_v39 }
 0x373   : > { %v3239_v33 = vpop.f32.mrf.mxu0 }
 0x374   : > { %v3282_v40 = vadd.f32 %v3239_v33, %v3186_v36 }
 0x378   : > { %v3335_v34 = vpop.f32.mrf.mxu3 }
 0x379   : > { %v3378_v46 = vadd.f32 %v3335_v34, %v3282_v40 }
 0x37b   : > { %v3259_v43 = vpop.f32.mrf.mxu1  ;;  %v3387_v59 = vadd.f32 %v3385_v54, %v3378_v46 }
 0x37c   : > { %v3283_v51 = vadd.f32 %v3259_v43, %v3187_v44  ;;  %v3355_v53 = vpop.f32.mrf.mxu0 }
 0x37d   : > { %v3390_v1 = vmax.f32 %v3387_v59, 0.0  ;;  %v4538_v59 = vld [vmem:[%s5671_s5 + $0x4] sm:$0xf] }
 0x37e   : > { %v3379_v60 = vadd.f32 %v3355_v53, %v3283_v51 }
 0x37f   : > { %v3393_v6 = vmul.f32 %v3390_v1, %v1689_v48 }
 0x380   : > { %v3388_v56 = vadd.f32 %v3385_v54, %v3379_v60 }
 0x381   : > { %v3279_v0 = vpop.f32.mrf.mxu2 }
 0x382   : > { %v3391_v2 = vmax.f32 %v3388_v56, 0.0  ;;  %v3284_v57 = vadd.f32 %v3279_v0, %v3188_v63  ;;  %v3414_v63 = vld [vmem:[%s5671_s5] sm:$0xf] }
 0x383   : > { %v3375_v4 = vpop.f32.mrf.mxu1 }
 0x384   : > { %v3394_v52 = vmul.f32 %v3391_v2, %v1690_v45  ;;  %v3380_v5 = vadd.f32 %v3375_v4, %v3284_v57  ;;  %v4551_v57 = vld [vmem:[%s5671_s5 + $0x8] sm:$0xf] }
 0x386   : > { %v3401_v7 = vrot.slane %v3394_v52, 4  ;;  %v3389_v8 = vadd.f32 %v3385_v54, %v3380_v5 }
 0x388   : > { %v3392_v9 = vmax.f32 %v3389_v8, 0.0  ;;  %v3402_v10 = vsel %vm1699_vm0, %v3393_v6, %v3401_v7  ;;  %v4558_v6 = vld [vmem:[%s5671_s5 + $0xc] sm:$0xf] }
 0x389   : > { %3403 = vrot.lane.b32.xlu2 %v3402_v10, %s4857_s26 }
 0x38a   : > { %v3395_v62 = vmul.f32 %v3392_v9, %v1691_v47 }
 0x38c   : > { %3405 = vrot.lane.b32.xlu0 %v3395_v62, %s4857_s26  ;;  %s5700_s26 = smov 126  }
 0x3e3   : > { %v3404_v55 = vpop.permute.xlu2 %3403 }
 0x3e4   : > { %v3407_v11 = vrot.slane %v3404_v55, 4 }
 0x3e6   : > { %v3408_v45 = vsel %vm1713_vm13, %v3407_v11, %v3404_v55  ;;  %v4565_v55 = vld [vmem:[%s5671_s5 + $0x10] sm:$0xf] }
 0x3e7   : > { %3412 = vst.msk [vmem:[#allocation3] sm:$0xff] %vm5168_vm14, %v3408_v45 }
 0x3ee   : > { %v3415_v48 = vld [vmem:[#allocation3] sm:$0xff] }
 0x3ef   : > { %3421 = vst [vmem:[#allocation1] ss:$2 sm:$0xff] %v3415_v48 }
 0x3f6   : > { %v3424_v12 = vld.sshfl [vmem:[#allocation1] sm:$0xff pattern:$0x75316420]  ;;  %v3425_v13 = vld.sshfl [vmem:[#allocation1 + $0x8] sm:$0xff pattern:$0x75316420] }
 0x3f7   : > { %3504 = vst [vmem:[#allocation1] ss:$2 sm:$0xff] %v3415_v48  ;;  %3429 = vrot.lane.b32.xlu1 %v3425_v13, %s4840_s30  ;;  %3427 = vrot.lane.b32.xlu0 %v3424_v12, %s4840_s30  ;;  %v4572_v12 = vld [vmem:[%s5671_s5 + $0x14] sm:$0xf] }
 0x3fe   : > { %v3507_v41 = vld.sshfl [vmem:[#allocation1] sm:$0xff pattern:$0x75316420]  ;;  %v5493_v47 = vld.sshfl [vmem:[#allocation1 + $0x8] sm:$0xff pattern:$0x75316420]  ;;  %v3406_v14 = vpop.permute.xlu0 %3405 }
 0x3ff   : > { %3585 = vst [vmem:[#allocation1] ss:$2 sm:$0xff] %v3415_v48  ;;  %v3409_v15 = vsel %vm1713_vm13, %v3407_v11, %v3406_v14  ;;  %4545 = vmatpush.msk.msra.mxu1 %vm1699_vm0, %v3507_v41 }
 0x400   : > { %3413 = vst.msk [vmem:[#allocation3 + $0x8] sm:$0xf] %vm1722_vm15, %v3409_v15  ;;  %4546 = vmatmul.msk.f32.vlgmr.msra.gmra.mxu1 %vm1738_vm2, %v3414_v63 }
 0x406   : > { %v3588_v58 = vld.sshfl [vmem:[#allocation1] sm:$0xff pattern:$0x75316420]  ;;  %v3589_v16 = vld.sshfl [vmem:[#allocation1 + $0x8] sm:$0xff pattern:$0x75316420] }
 0x407   : > { %3677 = vst [vmem:[#allocation1] ss:$2 sm:$0xff] %v3415_v48  ;;  %v3416_v61 = vld [vmem:[#allocation3 + $0x8] sm:$0xf]  ;;  %3593 = vrot.lane.b32.xlu1 %v3589_v16, %s5700_s26  ;;  %3591 = vrot.lane.b32.xlu0 %v3588_v58, %s5700_s26 }
 0x408   : > { %3423 = vst [vmem:[#allocation1 + $0x10] ss:$2 sm:$0xff] %v3416_v61  ;;  %v3582_v20 = vld [vmem:[#allocation3 + $0x8] sm:$0xf] }
 0x409   : > { %v3674_v23 = vld [vmem:[#allocation3 + $0x8] sm:$0xf] }
 0x40a   : > { %v3766_v27 = vld [vmem:[#allocation3 + $0x8] sm:$0xf] }
 0x40b   : > { %v3858_v31 = vld [vmem:[#allocation3 + $0x8] sm:$0xf] }
 0x40c   : > { %v3950_v37 = vld [vmem:[#allocation3 + $0x8] sm:$0xff] }
 0x40e   : > { %v3680_v17 = vld.sshfl [vmem:[#allocation1] sm:$0xff pattern:$0x75316420]  ;;  %v3681_v18 = vld.sshfl [vmem:[#allocation1 + $0x8] sm:$0xff pattern:$0x75316420] }
 0x40f   : > { %3769 = vst [vmem:[#allocation1] ss:$2 sm:$0xff] %v3415_v48  ;;  %v3426_v19 = vld.sshfl [vmem:[#allocation1 + $0x10] sm:$0xff pattern:$0x75316420]  ;;  %3683 = vrot.lane.b32.xlu1 %v3680_v17, %s5701_s12 }
 0x410   : > { %3506 = vst [vmem:[#allocation1 + $0x10] ss:$2 sm:$0xff] %v3416_v61  ;;  %3431 = vrot.lane.b32.xlu2 %v3426_v19, %s4840_s30  ;;  %v4579_v19 = vld [vmem:[%s5671_s5 + $0x18] sm:$0xf] }
 0x416   : > { %v3772_v21 = vld.sshfl [vmem:[#allocation1] sm:$0xff pattern:$0x75316420]  ;;  %v3773_v3 = vld.sshfl [vmem:[#allocation1 + $0x8] sm:$0xff pattern:$0x75316420] }
 0x417   : > { %3861 = vst [vmem:[#allocation1] ss:$2 sm:$0xff] %v3415_v48  ;;  %v5502_v22 = vld.sshfl [vmem:[#allocation1 + $0x10] sm:$0xff pattern:$0x75316420]  ;;  %3777 = vrot.lane.b32.xlu0 %v3773_v3, %s5695_s25 }
 0x418   : > { %3587 = vst [vmem:[#allocation1 + $0x10] ss:$2 sm:$0xff] %v3582_v20 }
 0x41e   : > { %v3865_v24 = vld.sshfl [vmem:[#allocation1 + $0x8] sm:$0xff pattern:$0x75316420]  ;;  %v3864_v25 = vld.sshfl [vmem:[#allocation1] sm:$0xff pattern:$0x75316420] }
 0x41f   : > { %v3590_v26 = vld.sshfl [vmem:[#allocation1 + $0x10] sm:$0xff pattern:$0x75316420]  ;;  %3775 = vrot.lane.b32.xlu0 %v3772_v21, %s5695_s25  ;;  %3953 = vst [vmem:[#allocation1] ss:$2 sm:$0xff] %v3415_v48 }
 0x420   : > { %3679 = vst [vmem:[#allocation1 + $0x10] ss:$2 sm:$0xff] %v3674_v23  ;;  %3595 = vrot.lane.b32.xlu2 %v3590_v26, %s5700_s26  ;;  %s365_s26 = sand.u32 1, %s4830_s14  }
 0x426   : > { %v3956_v28 = vld.sshfl [vmem:[#allocation1] sm:$0xff pattern:$0x75316420]  ;;  %v3957_v29 = vld.sshfl [vmem:[#allocation1 + $0x8] sm:$0xff pattern:$0x75316420] }
 0x427   : > { %v3682_v30 = vld.sshfl [vmem:[#allocation1 + $0x10] sm:$0xff pattern:$0x75316420]  ;;  %3867 = vrot.lane.b32.xlu0 %v3864_v25, %s5696_s11  ;;  %4049 = vst [vmem:[#allocation1] ss:$2 sm:$0xff] %v3415_v48 }
 0x428   : > { %3771 = vst [vmem:[#allocation1 + $0x10] ss:$2 sm:$0xff] %v3766_v27  ;;  %3685 = vrot.lane.b32.xlu2 %v3681_v18, %s5701_s12  ;;  %v4586_v27 = vld [vmem:[%s5671_s5 + $0x1c] sm:$0xf] }
 0x42e   : > { %v4053_v33 = vld.sshfl [vmem:[#allocation1 + $0x8] sm:$0xff pattern:$0x75316420]  ;;  %v4052_v35 = vld.sshfl [vmem:[#allocation1] sm:$0xff pattern:$0x75316420] }
 0x42f   : > { %v3774_v32 = vld.sshfl [vmem:[#allocation1 + $0x10] sm:$0xff pattern:$0x75316420]  ;;  %3960 = vrot.lane.b32.xlu0 %v3956_v28, %s5697_s29  ;;  %4145 = vst [vmem:[#allocation1] ss:$2 sm:$0xff] %v3415_v48 }
 0x430   : > { %3863 = vst [vmem:[#allocation1 + $0x10] ss:$2 sm:$0xff] %v3858_v31  ;;  %3687 = vrot.lane.b32.xlu2 %v3682_v30, %s5701_s12  ;;  %3779 = vrot.lane.b32.xlu1 %v3774_v32, %s5695_s25  ;;  %s4605_s12 = smul.u32 12, %s365_s26 }
 0x431   : > { %s4606_s25 = smul.u32 12, %s4934_s17  ;;  %s4256_s17 = scalar_lea.sflag [#allocation5], %s365_s26 }
 0x432   : > { %s367_s30 = scalar_lea.vmem [#allocation4], %s4605_s12 }
 0x436   : > { %v4149_v42 = vld.sshfl [vmem:[#allocation1 + $0x8] sm:$0xff pattern:$0x75316420]  ;;  %v4148_v43 = vld.sshfl [vmem:[#allocation1] sm:$0xff pattern:$0x75316420] }
 0x437   : > { %v3866_v36 = vld.sshfl [vmem:[#allocation1 + $0x10] sm:$0xff pattern:$0x75316420] }
 0x438   : > { %3955 = vst [vmem:[#allocation1 + $0x10] ss:$2 sm:$0xff] %v3950_v37  ;;  %3871 = vrot.lane.b32.xlu1 %v3866_v36, %s5696_s11  ;;  %3869 = vrot.lane.b32.xlu2 %v3865_v24, %s5696_s11  ;;  %s4796_s11 = scalar_lea.hbm %s5676_s10, 24 }
 0x43f   : > { %v3958_v38 = vld.sshfl [vmem:[#allocation1 + $0x10] sm:$0xff pattern:$0x75316420]  ;;  %v3959_v39 = vld.sshfl [vmem:[#allocation1 + $0x18] sm:$0xff pattern:$0x75316420] }
 0x440   : > { %4051 = vst [vmem:[#allocation1 + $0x10] ss:$2 sm:$0xff] %v3950_v37  ;;  %3964 = vrot.lane.b32.xlu2 %v3958_v38, %s5697_s29  ;;  %3962 = vrot.lane.b32.xlu1 %v3957_v29, %s5697_s29 }
 0x441   : > { %3966 = vrot.lane.b32.xlu0 %v3959_v39, %s5697_s29 }
 0x447   : > { %v4055_v40 = vld.sshfl [vmem:[#allocation1 + $0x18] sm:$0xff pattern:$0x75316420]  ;;  %v4054_v34 = vld.sshfl [vmem:[#allocation1 + $0x10] sm:$0xff pattern:$0x75316420] }
 0x448   : > { %4147 = vst [vmem:[#allocation1 + $0x10] ss:$2 sm:$0xff] %v3950_v37  ;;  %4058 = vrot.lane.b32.xlu2 %v4053_v33, %s5698_s18  ;;  %4056 = vrot.lane.b32.xlu1 %v4052_v35, %s5698_s18  ;;  %v4593_v35 = vld [vmem:[%s5671_s5 + $0x20] sm:$0xf] }
 0x449   : > { %4060 = vrot.lane.b32.xlu0 %v4054_v34, %s5698_s18 }
 0x44f   : > { %v4151_v44 = vld.sshfl [vmem:[#allocation1 + $0x18] sm:$0xff pattern:$0x75316420]  ;;  %v4150_v46 = vld.sshfl [vmem:[#allocation1 + $0x10] sm:$0xff pattern:$0x75316420] }
 0x450   : > { %4156 = vrot.lane.b32.xlu2 %v4150_v46, %s5699_s21  ;;  %4154 = vrot.lane.b32.xlu1 %v4149_v42, %s5699_s21 }
 0x451   : > { %4158 = vrot.lane.b32.xlu0 %v4151_v44, %s5699_s21 }
 0x458   : > { %4062 = vrot.lane.b32.xlu2 %v4055_v40, %s5698_s18  ;;  %4152 = vrot.lane.b32.xlu1 %v4148_v43, %s5699_s21  ;;  %s4267_s18 = scalar_lea.hbm %s5676_s10, %s4606_s25  ;;  %s4269_s21 = sshll.u32 %s367_s30, 4  ;;  %s4270_s21 = int_to_ptr.vmem [resolvable:$true] %s4269_s21 }
 0x459   : > { %s4271_s20 = sshll.u32 %s4267_s18, 4  ;;  %s4272_s20 = int_to_ptr.hbm [resolvable:$true] %s4271_s20 }
 0x45a   : > { %s4790_s27 = sshra.s32 %s4272_s20, 4  ;;  %s4791_s27 = int_to_ptr.hbm [resolvable:$true] %s4790_s27 }
 0x45b   : > { %s4792_s28 = scalar_lea.hbm %s4791_s27, 12  ;;  %p4797_p0 = scmp.lt.s32.totalorder %s4791_s27, %s5676_s10 }
 0x45c   : > { %p4793_p11 = scmp.ne.s32.totalorder %s4791_s27, %s4792_s28  ;;  %p4798_p1 = scmp.lt.s32.totalorder %s4796_s11, %s4792_s28 }
 0x45e   : > { %p4794_p12 = pnand %p4793_p11, %p4951_p5  ;;  %p4799_p2 = por %p4798_p1, %p4797_p0 }
 0x460   : > { %4238 = vperm.xlu1 %4774, %v4235_v49   ;;  %p4795_p13 = pneg %p4794_p12 }
 0x462   : > { %p4800_p3 = pnand %p4799_p2, %p4795_p13 }
 0x469   : > { %v3430_v51 = vpop.permute.xlu1 %3429  ;;  %v3428_v53 = vpop.permute.xlu0 %3427 }
 0x46a   : > { %v3433_v54 = vsel %vm394_vm1, %v3428_v53, %v3430_v51  ;;  %v3432_v50 = vpop.permute.xlu2 %3431 }
 0x46b   : > { %v3434_v60 = vsel %vm394_vm1, %v3430_v51, %v3432_v50  ;;  %4539 = vmatpush.msk.msrb.mxu2 %vm1699_vm0, %v3433_v54  ;;  %4543 = vmatpush.msk.msra.mxu0 %vm1699_vm0, %v3432_v50  ;;  %vm4253_vm1 = vcmask 855040  }
 0x46c   : > { %4541 = vmatpush.msk.msrb.mxu3 %vm1699_vm0, %v3434_v60  ;;  %4540 = vmatmul.msk.f32.vlgmr.msrb.gmra.mxu2 %vm1738_vm2, %v4538_v59 }
 0x46d   : > { %4547 = vmatpush.msk.msra.mxu2 %vm1699_vm0, %v5493_v47  ;;  %4542 = vmatmul.msk.f32.vlgmr.msrb.gmra.mxu3 %vm1738_vm2, %v4538_v59 }
 0x46e   : > { %4549 = vmatpush.msk.msra.mxu3 %vm1699_vm0, %v5502_v22  ;;  %4544 = vmatmul.msk.f32.vlgmr.msra.gmra.mxu0 %vm1738_vm2, %v4538_v59 }
 0x474   : > { %4548 = vmatmul.msk.f32.vlgmr.msra.gmra.mxu2 %vm1738_vm2, %v3414_v63 }
 0x475   : > { %4550 = vmatmul.msk.f32.vlgmr.msra.gmra.mxu3 %vm1738_vm2, %v3414_v63 }
 0x479   : > { %v3594_v56 = vpop.permute.xlu1 %3593  ;;  %v3592_v0 = vpop.permute.xlu0 %3591 }
 0x47a   : > { %v3597_v1 = vsel %vm535_vm3, %v3592_v0, %v3594_v56  ;;  %v3596_v2 = vpop.permute.xlu2 %3595 }
 0x47b   : > { %v3598_v4 = vsel %vm535_vm3, %v3594_v56, %v3596_v2  ;;  %4552 = vmatpush.msk.msrb.mxu0 %vm1699_vm0, %v3597_v1  ;;  %4556 = vmatpush.msk.msrb.mxu2 %vm1699_vm0, %v3596_v2 }
 0x47c   : > { %4554 = vmatpush.msk.msrb.mxu1 %vm1699_vm0, %v3598_v4  ;;  %4553 = vmatmul.msk.f32.vlgmr.msrb.gmra.mxu0 %vm1738_vm2, %v4551_v57 }
 0x47d   : > { %4555 = vmatmul.msk.f32.vlgmr.msrb.gmra.mxu1 %vm1738_vm2, %v4551_v57  ;;  %4557 = vmatmul.msk.f32.vlgmr.msrb.gmra.mxu2 %vm1738_vm2, %v4551_v57  ;;  %v3536_v40 = vpop.f32.mrf.mxu1 }
 0x481   : > { %v3684_v52 = vpop.permute.xlu1 %3683 }
 0x482   : > { %v3686_v5 = vpop.permute.xlu2 %3685 }
 0x483   : > { %v3689_v7 = vsel %vm695_vm4, %v3684_v52, %v3686_v5 }
 0x484   : > { %4559 = vmatpush.msk.msrb.mxu3 %vm1699_vm0, %v3689_v7 }
 0x485   : > { %4560 = vmatmul.msk.f32.vlgmr.msrb.gmra.mxu3 %vm1738_vm2, %v4558_v6 }
 0x489   : > { %v3778_v8 = vpop.permute.xlu0 %3777 }
 0x48a   : > { %v3688_v9 = vpop.permute.xlu2 %3687 }
 0x48b   : > { %v3690_v10 = vsel %vm695_vm4, %v3686_v5, %v3688_v9  ;;  %4563 = vmatpush.msk.msra.mxu1 %vm1699_vm0, %v3688_v9 }
 0x48c   : > { %4561 = vmatpush.msk.msra.mxu0 %vm1699_vm0, %v3690_v10  ;;  %4564 = vmatmul.msk.f32.vlgmr.msra.gmra.mxu1 %vm1738_vm2, %v4558_v6 }
 0x48d   : > { %4562 = vmatmul.msk.f32.vlgmr.msra.gmra.mxu0 %vm1738_vm2, %v4558_v6 }
 0x491   : > { %v3776_v62 = vpop.permute.xlu0 %3775 }
 0x492   : > { %v3781_v11 = vsel %vm775_vm5, %v3776_v62, %v3778_v8  ;;  %v3870_v45 = vpop.permute.xlu2 %3869 }
 0x493   : > { %4566 = vmatpush.msk.msra.mxu2 %vm1699_vm0, %v3781_v11 }
 0x494   : > { %4567 = vmatmul.msk.f32.vlgmr.msra.gmra.mxu2 %vm1738_vm2, %v4565_v55 }
 0x499   : > { %v3868_v48 = vpop.permute.xlu0 %3867 }
 0x49a   : > { %v3873_v13 = vsel %vm855_vm6, %v3868_v48, %v3870_v45  ;;  %v3965_v41 = vpop.permute.xlu2 %3964 }
 0x49b   : > { %4573 = vmatpush.msk.msrb.mxu1 %vm1699_vm0, %v3873_v13 }
 0x49c   : > { %4574 = vmatmul.msk.f32.vlgmr.msrb.gmra.mxu1 %vm1738_vm2, %v4572_v12 }
 0x4a1   : > { %v3961_v16 = vpop.permute.xlu0 %3960 }
 0x4a2   : > { %v3780_v47 = vpop.permute.xlu1 %3779  ;;  %v4059_v15 = vpop.permute.xlu2 %4058 }
 0x4a3   : > { %v3782_v14 = vsel %vm775_vm5, %v3778_v8, %v3780_v47  ;;  %4570 = vmatpush.msk.msrb.mxu0 %vm1699_vm0, %v3780_v47 }
 0x4a4   : > { %4568 = vmatpush.msk.msra.mxu3 %vm1699_vm0, %v3782_v14  ;;  %4571 = vmatmul.msk.f32.vlgmr.msrb.gmra.mxu0 %vm1738_vm2, %v4565_v55 }
 0x4a5   : > { %4569 = vmatmul.msk.f32.vlgmr.msra.gmra.mxu3 %vm1738_vm2, %v4565_v55 }
 0x4aa   : > { %v3872_v58 = vpop.permute.xlu1 %3871  ;;  %v4157_v17 = vpop.permute.xlu2 %4156 }
 0x4ab   : > { %v3874_v61 = vsel %vm855_vm6, %v3870_v45, %v3872_v58  ;;  %4577 = vmatpush.msk.msrb.mxu3 %vm1699_vm0, %v3872_v58 }
 0x4ac   : > { %4575 = vmatpush.msk.msrb.mxu2 %vm1699_vm0, %v3874_v61 }
 0x4ad   : > { %4576 = vmatmul.msk.f32.vlgmr.msrb.gmra.mxu2 %vm1738_vm2, %v4572_v12  ;;  %4578 = vmatmul.msk.f32.vlgmr.msrb.gmra.mxu3 %vm1738_vm2, %v4572_v12 }
 0x4b2   : > { %v3963_v18 = vpop.permute.xlu1 %3962  ;;  %v4063_v24 = vpop.permute.xlu2 %4062 }
 0x4b3   : > { %v3968_v20 = vsel %vm1025_vm8, %v3961_v16, %v3963_v18  ;;  %v3969_v21 = vsel %vm1025_vm8, %v3963_v18, %v3965_v41  ;;  %v3967_v3 = vpop.permute.xlu0 %3966 }
 0x4b4   : > { %v3970_v22 = vsel %vm1025_vm8, %v3965_v41, %v3967_v3  ;;  %4580 = vmatpush.msk.msra.mxu0 %vm1699_vm0, %v3968_v20  ;;  %4582 = vmatpush.msk.msra.mxu1 %vm1699_vm0, %v3969_v21 }
 0x4b5   : > { %4584 = vmatpush.msk.msra.mxu2 %vm1699_vm0, %v3970_v22  ;;  %4581 = vmatmul.msk.f32.vlgmr.msra.gmra.mxu0 %vm1738_vm2, %v4579_v19 }
 0x4b6   : > { %4583 = vmatmul.msk.f32.vlgmr.msra.gmra.mxu1 %vm1738_vm2, %v4579_v19  ;;  %4585 = vmatmul.msk.f32.vlgmr.msra.gmra.mxu2 %vm1738_vm2, %v4579_v19 }
 0x4ba   : > { %v4057_v23 = vpop.permute.xlu1 %4056 }
 0x4bb   : > { %v4061_v25 = vpop.permute.xlu0 %4060  ;;  %v4064_v26 = vsel %vm1108_vm9, %v4057_v23, %v4059_v15 }
 0x4bc   : > { %v4065_v28 = vsel %vm1108_vm9, %v4059_v15, %v4061_v25  ;;  %v4066_v29 = vsel %vm1108_vm9, %v4061_v25, %v4063_v24  ;;  %4587 = vmatpush.msk.msra.mxu3 %vm1699_vm0, %v4064_v26 }
 0x4bd   : > { %4589 = vmatpush.msk.msrb.mxu0 %vm1699_vm0, %v4065_v28  ;;  %4591 = vmatpush.msk.msrb.mxu1 %vm1699_vm0, %v4066_v29 }
 0x4be   : > { %4588 = vmatmul.msk.f32.vlgmr.msra.gmra.mxu3 %vm1738_vm2, %v4586_v27  ;;  %4590 = vmatmul.msk.f32.vlgmr.msrb.gmra.mxu0 %vm1738_vm2, %v4586_v27 }
 0x4bf   : > { %4592 = vmatmul.msk.f32.vlgmr.msrb.gmra.mxu1 %vm1738_vm2, %v4586_v27 }
 0x4c2   : > { %v4155_v30 = vpop.permute.xlu1 %4154 }
 0x4c3   : > { %v4159_v31 = vpop.permute.xlu0 %4158  ;;  %v4161_v33 = vsel %vm1191_vm10, %v4155_v30, %v4157_v17 }
 0x4c4   : > { %v4162_v32 = vsel %vm1191_vm10, %v4157_v17, %v4159_v31  ;;  %4596 = vmatpush.msk.msrb.mxu3 %vm1699_vm0, %v4161_v33 }
 0x4c5   : > { %4598 = vmatpush.msk.msra.mxu0 %vm1699_vm0, %v4162_v32 }
 0x4c6   : > { %4597 = vmatmul.msk.f32.vlgmr.msrb.gmra.mxu3 %vm1738_vm2, %v4593_v35  ;;  %4599 = vmatmul.msk.f32.vlgmr.msra.gmra.mxu0 %vm1738_vm2, %v4593_v35 }
 0x4ca   : > { %v4153_v36 = vpop.permute.xlu1 %4152 }
 0x4cb   : > { %v4160_v37 = vsel %vm1191_vm10, %v4153_v36, %v4155_v30 }
 0x4cc   : > { %4594 = vmatpush.msk.msrb.mxu2 %vm1699_vm0, %v4160_v37 }
 0x4cd   : > { %4595 = vmatmul.msk.f32.vlgmr.msrb.gmra.mxu2 %vm1738_vm2, %v4593_v35 }
 0x4d2   : > { %v4239_v16 = vpop.permute.xlu1 %4238 }
 0x4eb   : > { %v3501_v39 = vpop.f32.mrf.mxu0 }
 0x4ef   : > { %v3461_v38 = vpop.f32.mrf.mxu2 }
 0x4f0   : > { %v3481_v34 = vpop.f32.mrf.mxu3  ;;  %v3537_v8 = vadd.f32 %v3536_v40, %v3461_v38 }
 0x4f7   : > { %v3556_v42 = vpop.f32.mrf.mxu2 }
 0x4f8   : > { %v3576_v43 = vpop.f32.mrf.mxu3  ;;  %v3557_v4 = vadd.f32 %v3556_v42, %v3481_v34 }
 0x4f9   : > { %v3625_v44 = vpop.f32.mrf.mxu0  ;;  %v3577_v63 = vadd.f32 %v3576_v43, %v3501_v39 }
 0x4fa   : > { %v3645_v46 = vpop.f32.mrf.mxu1  ;;  %v3668_v45 = vadd.f32 %v3625_v44, %v3537_v8 }
 0x4fb   : > { %v3669_v6 = vadd.f32 %v3645_v46, %v3557_v4 }
 0x500   : > { %v3665_v49 = vpop.f32.mrf.mxu2 }
 0x501   : > { %v3670_v1 = vadd.f32 %v3665_v49, %v3577_v63 }
 0x508   : > { %v3717_v54 = vpop.f32.mrf.mxu3 }
 0x509   : > { %v3757_v53 = vpop.f32.mrf.mxu1  ;;  %v3760_v14 = vadd.f32 %v3717_v54, %v3668_v45 }
 0x50a   : > { %v3737_v51 = vpop.f32.mrf.mxu0  ;;  %v3762_v52 = vadd.f32 %v3757_v53, %v3670_v1 }
 0x50b   : > { %v3761_v55 = vadd.f32 %v3737_v51, %v3669_v6 }
 0x517   : > { %v3809_v50 = vpop.f32.mrf.mxu2 }
 0x518   : > { %v3852_v18 = vadd.f32 %v3809_v50, %v3760_v14 }
 0x519   : > { %v3901_v60 = vpop.f32.mrf.mxu1 }
 0x51a   : > { %v3944_v22 = vadd.f32 %v3901_v60, %v3852_v18 }
 0x521   : > { %v3849_v59 = vpop.f32.mrf.mxu0 }
 0x522   : > { %v3854_v7 = vadd.f32 %v3849_v59, %v3762_v52 }
 0x528   : > { %v3829_v56 = vpop.f32.mrf.mxu3 }
 0x529   : > { %v3853_v12 = vadd.f32 %v3829_v56, %v3761_v55 }
 0x530   : > { %v3921_v0 = vpop.f32.mrf.mxu2  ;;  %v3941_v5 = vpop.f32.mrf.mxu3 }
 0x531   : > { %v3946_v62 = vadd.f32 %v3941_v5, %v3854_v7  ;;  %v3945_v41 = vadd.f32 %v3921_v0, %v3853_v12 }
 0x532   : > { %v3997_v2 = vpop.f32.mrf.mxu0 }
 0x533   : > { %v4017_v57 = vpop.f32.mrf.mxu1  ;;  %v4040_v23 = vadd.f32 %v3997_v2, %v3944_v22 }
 0x534   : > { %v4041_v61 = vadd.f32 %v4017_v57, %v3945_v41 }
 0x539   : > { %v4037_v9 = vpop.f32.mrf.mxu2 }
 0x53a   : > { %v4042_v11 = vadd.f32 %v4037_v9, %v3946_v62 }
 0x53b   : > { %v4113_v10 = vpop.f32.mrf.mxu0 }
 0x53c   : > { %v4133_v48 = vpop.f32.mrf.mxu1  ;;  %v4137_v19 = vadd.f32 %v4113_v10, %v4041_v61 }
 0x53d   : > { %v4138_v47 = vadd.f32 %v4133_v48, %v4042_v11 }
 0x541   : > { %v4093_v13 = vpop.f32.mrf.mxu3 }
 0x542   : > { %v4136_v25 = vadd.f32 %v4093_v13, %v4040_v23 }
 0x543   : > { %v4229_v15 = vpop.f32.mrf.mxu0 }
 0x544   : > { %v4234_v58 = vadd.f32 %v4229_v15, %v4138_v47 }
 0x546   : > { %v4243_v17 = vadd.f32 %v4239_v16, %v4234_v58 }
 0x548   : > { %v4246_v20 = vmax.f32 %v4243_v17, 0.0 }
 0x549   : > { %v4209_v21 = vpop.f32.mrf.mxu3 }
 0x54a   : > { %v4233_v3 = vadd.f32 %v4209_v21, %v4137_v19  ;;  %4254 = vst.msk [vmem:[%s367_s30 + $0x8] sm:$0xf] %vm4253_vm1, %v4246_v20 }
 0x54c   : > { %v4242_v24 = vadd.f32 %v4239_v16, %v4233_v3 }
 0x54e   : > { %v4245_v27 = vmax.f32 %v4242_v24, 0.0 }
 0x550   : > { %v4189_v26 = vpop.f32.mrf.mxu2  ;;  %v4249_v30 = vrot.slane %v4245_v27, 4 }
 0x551   : > { %v4232_v28 = vadd.f32 %v4189_v26, %v4136_v25 }
 0x553   : > { %v4241_v29 = vadd.f32 %v4239_v16, %v4232_v28 }
 0x555   : > { %v4244_v31 = vmax.f32 %v4241_v29, 0.0 }
 0x557   : > { %v4250_v33 = vsel %vm1699_vm0, %v4244_v31, %v4249_v30 }
 0x558   : > { %4252 = vst [vmem:[%s367_s30] sm:$0xff] %v4250_v33 }
 0x559   : > { %4803 = shalt.err (!%p4800_p3)
}
 0x55a   : > { %4607 = dma.vmem_to_hbm [thread:$0]  (%p4951_p5), %s4270_s21, 192, %s4272_s20, %s4256_s17  }
 0x55b PF: > { %p4613_p4 = scmp.ge.s32.totalorder %s4838_s16, 2  ;;  %s4283_s26 = sand.u32 1, %s4826_s13  }
 0x55c   : > { %s4284_s30 = scalar_lea.sflag [#allocation5], %s4283_s26 }
 0x55d   : > { %p4610_p7 = pnand %p4613_p4, %p4955_p6 }
 0x55f   : > { %p4611_p8 = pneg %p4610_p7 }
 0x561   : > { %4821 = dma.done.wait (%p4611_p8), %s4284_s30, 192  }
 0x562   : > { %4823 = vsyncadd (%p4611_p8), %s4284_s30, 4294967104  ;;  %p20_p9 = scmp.ge.s32.totalorder %s4938_s19, 4   ;;  %s5702_s13 = smov %s4830_s14 }
 0x563   : > { %s5703_s14 = smov %s4834_s15  ;;  %s5704_s15 = smov %s4949_s22 }
 0x564   : > { %s5705_s16 = smov %s4938_s19  ;;  %22 = sbr.rel (!%p20_p9) target bundleno = 3 (0x3), region = 164 }
 0x569   :  { %4290 = vsyncpa [#allocation5], 1 }
 0x56a   :  { %4292 = vsyncpa [#allocation5 + $0x1], 1 }

</bundles_post_ra>
